<compile_context>
chip_gen: v6e
topology: v6e:2x2x1
jax: 0.10.0
libtpu: 0.0.40
codegen_flags: <defaults>
</compile_context>

<pallas_src>
import functools

import jax
import jax.numpy as jnp
from jax.experimental import pallas as pl
from jax.experimental.pallas import tpu as pltpu


_SQRT_HALF = 0.7071067811865476


def _erf_poly(z):
    # Abramowitz & Stegun 7.1.26 rational approximation, |error| <= 1.5e-7.
    # Gives exact-erf GELU semantics (F.gelu default) using only ops that
    # lower cleanly in Mosaic (mul/add/exp/abs/where + EUP reciprocal).
    a1, a2, a3, a4, a5 = (0.254829592, -0.284496736, 1.421413741,
                          -1.453152027, 1.061405429)
    p = 0.3275911
    sgn = jnp.where(z >= 0.0, 1.0, -1.0)
    za = jnp.abs(z)
    d = 1.0 + p * za
    # EUP reciprocal (separate VLIW slot) + one Newton step for f32 accuracy.
    r = pl.reciprocal(d, approx=True)
    t = r * (2.0 - d * r)
    poly = t * (a1 + t * (a2 + t * (a3 + t * (a4 + t * a5))))
    return sgn * (1.0 - poly * jnp.exp(-za * za))


def _gelu_exact(v):
    return 0.5 * v * (1.0 + _erf_poly(v * _SQRT_HALF))


def _ffn_kernel(x_ref, w_in_ref, b_in_ref, w_dw_ref, b_dw_ref,
                w_out_ref, b_out_ref, out_ref, *, TH, H, W, C2, hf, mxu_dtype):
    # x_ref:    (H_pad + 2, Wp, Cin)  zero-padded, channels-last image, batch b
    # w_in_ref: (Cin, C2)      b_in_ref:  (1, C2)
    # w_dw_ref: (3, 3, C2)     b_dw_ref:  (1, C2)
    # w_out_ref:(hf, Cout)     b_out_ref: (1, Cout)
    # out_ref:  (TH, Wp, Cout)
    t = pl.program_id(1)

    start = t * TH
    if TH % 8 == 0:
        start = pl.multiple_of(start, 8)
    # Row window with a 1-row halo above and below the current output tile.
    x_win = x_ref[pl.ds(start, TH + 2), :, :]
    Wp = x_win.shape[1]
    cin = x_win.shape[2]

    # ---- project_in: 1x1 conv == channel matmul (both gate halves fused) ----
    a = x_win.reshape((TH + 2) * Wp, cin).astype(mxu_dtype)
    w_in = w_in_ref[...].astype(mxu_dtype)
    y = jnp.dot(a, w_in, preferred_element_type=jnp.float32)
    y = y.reshape(TH + 2, Wp, C2)

    # Zero-padded input rows give exactly-zero matmul rows, so the conv's
    # zero-padding in y-space only requires suppressing the *bias* on pad
    # rows: a (TH+2, 1, C2) row-masked bias instead of a full-tile select.
    row = jax.lax.broadcasted_iota(jnp.int32, (TH + 2, 1, 1), 0)
    prow = row + t * TH                       # row index in the padded image
    valid_row = jnp.logical_and(prow >= 1, prow <= H)
    b_in = b_in_ref[...].astype(jnp.float32).reshape(1, 1, C2)
    y = y + jnp.where(valid_row, b_in, 0.0)

    # ---- 3x3 depthwise conv: XLU rolls for the width shifts, nine VPU MACs --
    # Left/right taps: roll along the width (sublane) axis, then zero the
    # column that wrapped around / corresponds to image zero-padding.
    col = jax.lax.broadcasted_iota(jnp.int32, (1, Wp, 1), 1)
    yl = jnp.where(col >= 1, pltpu.roll(y, shift=1, axis=1), 0.0)
    yr = jnp.where(col <= W - 2, pltpu.roll(y, shift=Wp - 1, axis=1), 0.0)

    k = w_dw_ref[...].astype(jnp.float32)                 # (3, 3, C2)
    z = b_dw_ref[...].astype(jnp.float32)                 # (1, C2), broadcasts
    for dh in range(3):
        for dw, src in enumerate((yl, y, yr)):
            z = z + src[dh:dh + TH] * k[dh:dh + 1, dw:dw + 1, :]

    # ---- gated GELU: chunk along channels, gelu(x1) * x2 (kept in f32) ----
    g = _gelu_exact(z[:, :, :hf]) * z[:, :, hf:]

    # ---- project_out: 1x1 conv == channel matmul ----
    gm = g.reshape(TH * Wp, hf).astype(mxu_dtype)
    w_out = w_out_ref[...].astype(mxu_dtype)
    out = jnp.dot(gm, w_out, preferred_element_type=jnp.float32)
    out = out + b_out_ref[...].astype(jnp.float32)
    out_ref[...] = out.reshape(TH, Wp, -1).astype(out_ref.dtype)


def feed_forward(x, w_in, b_in, w_dw, b_dw, w_out, b_out, *,
                 row_tile=32, channels_last=False):
    """FeedForward forward pass.

    x: (B, C, H, W) (or (B, H, W, C) if channels_last=True);
    w_in: (2*hf, C, 1, 1); w_dw: (2*hf, 1, 3, 3); w_out: (C, hf, 1, 1);
    biases 1-D.  Returns the same layout as the input.
    """
    if channels_last:
        x_nhwc = x
    else:
        x_nhwc = jnp.transpose(x, (0, 2, 3, 1))
    B, H, W, C = x_nhwc.shape
    C2 = w_in.shape[0]
    hf = C2 // 2

    TH = max(1, min(row_tile, H))
    num_th = pl.cdiv(H, TH)
    H_pad = num_th * TH
    W8 = ((W + 7) // 8) * 8          # sublane-align width (layout-free reshapes)

    # Channels-last + 1 zero halo row on top, (H_pad - H + 1) rows at bottom,
    # width rounded up to a multiple of 8 with zero columns (single fused pad).
    x_p = jnp.pad(x_nhwc, ((0, 0), (1, H_pad - H + 1), (0, W8 - W), (0, 0)))

    w_in_t = jnp.transpose(w_in.reshape(C2, C))                # (C, C2)
    w_dw_t = jnp.transpose(w_dw.reshape(C2, 3, 3), (1, 2, 0))  # (3, 3, C2)
    w_out_t = jnp.transpose(w_out.reshape(C, hf))              # (hf, C)
    b_in2 = b_in.reshape(1, C2)
    b_dw2 = b_dw.reshape(1, C2)
    b_out2 = b_out.reshape(1, C)

    # bf16 operands go straight to the MXU on v6e/v7x; accumulation stays f32.
    mxu_dtype = jnp.bfloat16 if x.dtype == jnp.bfloat16 else jnp.float32

    kernel = functools.partial(_ffn_kernel, TH=TH, H=H, W=W, C2=C2, hf=hf,
                               mxu_dtype=mxu_dtype)

    # VMEM budget computed from the actual resident blocks + intermediates
    # (image and output blocks are double-buffered by the pipeline).
    itemsize = jnp.dtype(x.dtype).itemsize
    img_b = (H_pad + 2) * W8 * C * itemsize
    wts_b = (C * C2 + 9 * C2 + hf * C + 2 * C2 + C) * 4
    out_b = TH * W8 * C * itemsize
    inter_b = 6 * (TH + 2) * W8 * C2 * 4      # y, yl, yr, z, g + slack (f32)
    need = 2 * img_b + 2 * wts_b + 2 * out_b + inter_b
    vmem_limit = int(min(max(need * 3 // 2, 32 * 1024 * 1024),
                         100 * 1024 * 1024))

    flops = 2 * B * H * W * (C * C2 + 9 * C2 + hf * C)
    transcendentals = 2 * B * H * W * hf          # exp + reciprocal per element
    bytes_accessed = int(itemsize * (x_p.size + B * H_pad * W8 * C)
                         + 4 * (w_in_t.size + w_dw_t.size + w_out_t.size
                                + 2 * C2 + C))

    out_p = pl.pallas_call(
        kernel,
        out_shape=jax.ShapeDtypeStruct((B, H_pad, W8, C), x.dtype),
        grid=(B, num_th),
        in_specs=[
            # full (padded) image of batch b: constant across the row axis ->
            # DMA'd once per batch element, stays VMEM resident.
            pl.BlockSpec((None, H_pad + 2, W8, C), lambda b, t: (b, 0, 0, 0)),
            # weights/biases: constant index_maps -> loaded once, resident.
            pl.BlockSpec((C, C2), lambda b, t: (0, 0)),
            pl.BlockSpec((1, C2), lambda b, t: (0, 0)),
            pl.BlockSpec((3, 3, C2), lambda b, t: (0, 0, 0)),
            pl.BlockSpec((1, C2), lambda b, t: (0, 0)),
            pl.BlockSpec((hf, C), lambda b, t: (0, 0)),
            pl.BlockSpec((1, C), lambda b, t: (0, 0)),
        ],
        out_specs=pl.BlockSpec((None, TH, W8, C), lambda b, t: (b, t, 0, 0)),
        compiler_params=pltpu.CompilerParams(
            # Disjoint output tiles / no accumulator -> both axes parallel
            # (lets v7x's two TensorCores split the row axis when B is odd/1).
            dimension_semantics=("parallel", "parallel"),
            vmem_limit_bytes=vmem_limit),
        cost_estimate=pl.CostEstimate(
            flops=flops,
            transcendentals=transcendentals,
            bytes_accessed=bytes_accessed),
    )(x_p, w_in_t, b_in2, w_dw_t, b_dw2, w_out_t, b_out2)

    out = out_p[:, :H, :W, :]                 # drop row/column padding
    if channels_last:
        return out
    return jnp.transpose(out, (0, 3, 1, 2))   # back to NCHW


def _reference(x, w_in, b_in, w_dw, b_dw, w_out, b_out):
    """Pure-JAX/XLA mirror of the PyTorch FeedForward forward pass."""
    C2 = w_in.shape[0]
    dn = ('NCHW', 'OIHW', 'NCHW')
    y = jax.lax.conv_general_dilated(x, w_in, (1, 1), 'VALID',
                                     dimension_numbers=dn)
    y = y + b_in[None, :, None, None]
    z = jax.lax.conv_general_dilated(y, w_dw, (1, 1), 'SAME',
                                     feature_group_count=C2,
                                     dimension_numbers=dn)
    z = z + b_dw[None, :, None, None]
    x1, x2 = jnp.split(z, 2, axis=1)
    g = jax.nn.gelu(x1, approximate=False) * x2
    out = jax.lax.conv_general_dilated(g, w_out, (1, 1), 'VALID',
                                       dimension_numbers=dn)
    return out + b_out[None, :, None, None]


if __name__ == "__main__":
    key = jax.random.PRNGKey(0)
    ks = jax.random.split(key, 7)

    # FeedForward(dim=4, ffn_expansion_factor=2, bias=True) at small shapes.
    B, C, H, W = 2, 4, 16, 16
    hf = int(C * 2)          # hidden_features
    C2 = hf * 2              # hidden_features * 2

    x = jax.random.normal(ks[0], (B, C, H, W), jnp.float32)
    w_in = jax.random.normal(ks[1], (C2, C, 1, 1), jnp.float32) / jnp.sqrt(C)
    b_in = 0.1 * jax.random.normal(ks[2], (C2,), jnp.float32)
    w_dw = jax.random.normal(ks[3], (C2, 1, 3, 3), jnp.float32) / 3.0
    b_dw = 0.1 * jax.random.normal(ks[4], (C2,), jnp.float32)
    w_out = jax.random.normal(ks[5], (C, hf, 1, 1), jnp.float32) / jnp.sqrt(hf)
    b_out = 0.1 * jax.random.normal(ks[6], (C,), jnp.float32)

    out = feed_forward(x, w_in, b_in, w_dw, b_dw, w_out, b_out, row_tile=32)
    out = jax.block_until_ready(out)

    ref = _reference(x, w_in, b_in, w_dw, b_dw, w_out, b_out)
    assert out.shape == (B, C, H, W)
    assert jnp.allclose(out, ref, atol=2e-4, rtol=2e-4), (
        "mismatch vs reference: max abs err = "
        f"{jnp.max(jnp.abs(out - ref))}")

    print("KERNEL_OK")
</pallas_src>

<mosaic_0001>
module attributes {stable_mosaic.version = 11 : i64} {
  func.func @_ffn_kernel(%arg0: i32, %arg1: i32, %arg2: memref<1x18x16x4xf32, #tpu.memory_space<vmem>>, %arg3: memref<4x16xf32, #tpu.memory_space<vmem>>, %arg4: memref<1x16xf32, #tpu.memory_space<vmem>>, %arg5: memref<3x3x16xf32, #tpu.memory_space<vmem>>, %arg6: memref<1x16xf32, #tpu.memory_space<vmem>>, %arg7: memref<8x4xf32, #tpu.memory_space<vmem>>, %arg8: memref<1x4xf32, #tpu.memory_space<vmem>>, %arg9: memref<1x16x16x4xf32, #tpu.memory_space<vmem>>) attributes {dimension_semantics = [#tpu.dimension_semantics<parallel>, #tpu.dimension_semantics<parallel>], iteration_bounds = array<i64: 2, 1>, scalar_prefetch = 0 : i64, scratch_operands = 0 : i64, tpu.core_type = #tpu.core_type<tc>, window_params = [{transform_indices = @transform_0, window_bounds = array<i64: 1, 18, 16, 4>}, {pipeline_mode = #tpu.pipeline_mode<synchronous>, transform_indices = @transform_1, window_bounds = array<i64: 4, 16>}, {pipeline_mode = #tpu.pipeline_mode<synchronous>, transform_indices = @transform_2, window_bounds = array<i64: 1, 16>}, {pipeline_mode = #tpu.pipeline_mode<synchronous>, transform_indices = @transform_3, window_bounds = array<i64: 3, 3, 16>}, {pipeline_mode = #tpu.pipeline_mode<synchronous>, transform_indices = @transform_4, window_bounds = array<i64: 1, 16>}, {pipeline_mode = #tpu.pipeline_mode<synchronous>, transform_indices = @transform_5, window_bounds = array<i64: 8, 4>}, {pipeline_mode = #tpu.pipeline_mode<synchronous>, transform_indices = @transform_6, window_bounds = array<i64: 1, 4>}, {transform_indices = @transform_7, window_bounds = array<i64: 1, 16, 16, 4>}]} {
    %c16_i32 = arith.constant 16 : i32
    %0 = arith.muli %arg1, %c16_i32 : i32
    %1 = tpu.assume_multiple %0, 8 : i32
    %c0 = arith.constant 0 : index
    %2 = arith.index_cast %1 : i32 to index
    %c0_0 = arith.constant 0 : index
    %c0_1 = arith.constant 0 : index
    %3 = vector.load %arg2[%c0, %2, %c0_0, %c0_1] : memref<1x18x16x4xf32, #tpu.memory_space<vmem>>, vector<1x18x16x4xf32>
    %4 = vector.shape_cast %3 : vector<1x18x16x4xf32> to vector<18x16x4xf32>
    %5 = vector.shape_cast %4 : vector<18x16x4xf32> to vector<288x4xf32>
    %c0_2 = arith.constant 0 : index
    %c0_3 = arith.constant 0 : index
    %6 = vector.load %arg3[%c0_2, %c0_3] : memref<4x16xf32, #tpu.memory_space<vmem>>, vector<4x16xf32>
    %cst = arith.constant dense<0.000000e+00> : vector<288x16xf32>
    %7 = tpu.matmul %5, %6, %cst {dimension_numbers = #tpu.dot_dimension_numbers<[1], [0], [0], [1], [0, 0, 1, 1], [], []>} : vector<288x4xf32>, vector<4x16xf32>, vector<288x16xf32> -> vector<288x16xf32>
    %8 = vector.shape_cast %7 : vector<288x16xf32> to vector<18x16x16xf32>
    %9 = tpu.iota {dimensions = array<i32: 0>} : vector<18x1x1xi32>
    %c16_i32_4 = arith.constant 16 : i32
    %10 = arith.muli %arg1, %c16_i32_4 : i32
    %11 = vector.broadcast %10 : i32 to vector<18x1x1xi32>
    %12 = arith.addi %9, %11 : vector<18x1x1xi32>
    %c1_i32 = arith.constant 1 : i32
    %13 = vector.broadcast %c1_i32 : i32 to vector<18x1x1xi32>
    %14 = arith.cmpi sge, %12, %13 : vector<18x1x1xi32>
    %c16_i32_5 = arith.constant 16 : i32
    %15 = vector.broadcast %c16_i32_5 : i32 to vector<18x1x1xi32>
    %16 = arith.cmpi sle, %12, %15 : vector<18x1x1xi32>
    %17 = arith.andi %14, %16 : vector<18x1x1xi1>
    %c0_6 = arith.constant 0 : index
    %c0_7 = arith.constant 0 : index
    %18 = vector.load %arg4[%c0_6, %c0_7] : memref<1x16xf32, #tpu.memory_space<vmem>>, vector<1x16xf32>
    %19 = vector.shape_cast %18 : vector<1x16xf32> to vector<1x1x16xf32>
    %cst_8 = arith.constant 0.000000e+00 : f32
    %20 = vector.shape_cast %17 : vector<18x1x1xi1> to vector<18x1x1xi1>
    %21 = vector.broadcast %20 : vector<18x1x1xi1> to vector<18x1x16xi1>
    %22 = vector.shape_cast %19 : vector<1x1x16xf32> to vector<1x1x16xf32>
    %23 = vector.broadcast %22 : vector<1x1x16xf32> to vector<18x1x16xf32>
    %24 = vector.broadcast %cst_8 : f32 to vector<18x1x16xf32>
    %25 = arith.select %21, %23, %24 : vector<18x1x16xi1>, vector<18x1x16xf32>
    %26 = vector.broadcast %25 : vector<18x1x16xf32> to vector<18x16x16xf32>
    %27 = arith.addf %8, %26 : vector<18x16x16xf32>
    %28 = tpu.iota {dimensions = array<i32: 1>} : vector<1x16x1xi32>
    %c1_i32_9 = arith.constant 1 : i32
    %29 = vector.broadcast %c1_i32_9 : i32 to vector<1x16x1xi32>
    %30 = arith.cmpi sge, %28, %29 : vector<1x16x1xi32>
    %c1_i32_10 = arith.constant 1 : i32
    %31 = tpu.dynamic_rotate %27 by %c1_i32_10 dim 1 : vector<18x16x16xf32>, i32 -> vector<18x16x16xf32>
    %cst_11 = arith.constant 0.000000e+00 : f32
    %32 = vector.shape_cast %30 : vector<1x16x1xi1> to vector<1x16x1xi1>
    %33 = vector.broadcast %32 : vector<1x16x1xi1> to vector<18x16x16xi1>
    %34 = vector.broadcast %cst_11 : f32 to vector<18x16x16xf32>
    %35 = arith.select %33, %31, %34 : vector<18x16x16xi1>, vector<18x16x16xf32>
    %c14_i32 = arith.constant 14 : i32
    %36 = vector.broadcast %c14_i32 : i32 to vector<1x16x1xi32>
    %37 = arith.cmpi sle, %28, %36 : vector<1x16x1xi32>
    %c15_i32 = arith.constant 15 : i32
    %38 = tpu.dynamic_rotate %27 by %c15_i32 dim 1 : vector<18x16x16xf32>, i32 -> vector<18x16x16xf32>
    %cst_12 = arith.constant 0.000000e+00 : f32
    %39 = vector.shape_cast %37 : vector<1x16x1xi1> to vector<1x16x1xi1>
    %40 = vector.broadcast %39 : vector<1x16x1xi1> to vector<18x16x16xi1>
    %41 = vector.broadcast %cst_12 : f32 to vector<18x16x16xf32>
    %42 = arith.select %40, %38, %41 : vector<18x16x16xi1>, vector<18x16x16xf32>
    %c0_13 = arith.constant 0 : index
    %c0_14 = arith.constant 0 : index
    %c0_15 = arith.constant 0 : index
    %43 = vector.load %arg5[%c0_13, %c0_14, %c0_15] : memref<3x3x16xf32, #tpu.memory_space<vmem>>, vector<3x3x16xf32>
    %c0_16 = arith.constant 0 : index
    %c0_17 = arith.constant 0 : index
    %44 = vector.load %arg6[%c0_16, %c0_17] : memref<1x16xf32, #tpu.memory_space<vmem>>, vector<1x16xf32>
    %45 = vector.extract_strided_slice %35 {offsets = [0, 0, 0], sizes = [16, 16, 16], strides = [1, 1, 1]} : vector<18x16x16xf32> to vector<16x16x16xf32>
    %46 = vector.extract_strided_slice %43 {offsets = [0, 0, 0], sizes = [1, 1, 16], strides = [1, 1, 1]} : vector<3x3x16xf32> to vector<1x1x16xf32>
    %47 = vector.broadcast %46 : vector<1x1x16xf32> to vector<16x16x16xf32>
    %48 = arith.mulf %45, %47 : vector<16x16x16xf32>
    %49 = vector.shape_cast %44 : vector<1x16xf32> to vector<1x1x16xf32>
    %50 = vector.broadcast %49 : vector<1x1x16xf32> to vector<16x16x16xf32>
    %51 = arith.addf %50, %48 : vector<16x16x16xf32>
    %52 = vector.extract_strided_slice %27 {offsets = [0, 0, 0], sizes = [16, 16, 16], strides = [1, 1, 1]} : vector<18x16x16xf32> to vector<16x16x16xf32>
    %53 = vector.extract_strided_slice %43 {offsets = [0, 1, 0], sizes = [1, 1, 16], strides = [1, 1, 1]} : vector<3x3x16xf32> to vector<1x1x16xf32>
    %54 = vector.broadcast %53 : vector<1x1x16xf32> to vector<16x16x16xf32>
    %55 = arith.mulf %52, %54 : vector<16x16x16xf32>
    %56 = arith.addf %51, %55 : vector<16x16x16xf32>
    %57 = vector.extract_strided_slice %42 {offsets = [0, 0, 0], sizes = [16, 16, 16], strides = [1, 1, 1]} : vector<18x16x16xf32> to vector<16x16x16xf32>
    %58 = vector.extract_strided_slice %43 {offsets = [0, 2, 0], sizes = [1, 1, 16], strides = [1, 1, 1]} : vector<3x3x16xf32> to vector<1x1x16xf32>
    %59 = vector.broadcast %58 : vector<1x1x16xf32> to vector<16x16x16xf32>
    %60 = arith.mulf %57, %59 : vector<16x16x16xf32>
    %61 = arith.addf %56, %60 : vector<16x16x16xf32>
    %62 = vector.extract_strided_slice %35 {offsets = [1, 0, 0], sizes = [16, 16, 16], strides = [1, 1, 1]} : vector<18x16x16xf32> to vector<16x16x16xf32>
    %63 = vector.extract_strided_slice %43 {offsets = [1, 0, 0], sizes = [1, 1, 16], strides = [1, 1, 1]} : vector<3x3x16xf32> to vector<1x1x16xf32>
    %64 = vector.broadcast %63 : vector<1x1x16xf32> to vector<16x16x16xf32>
    %65 = arith.mulf %62, %64 : vector<16x16x16xf32>
    %66 = arith.addf %61, %65 : vector<16x16x16xf32>
    %67 = vector.extract_strided_slice %27 {offsets = [1, 0, 0], sizes = [16, 16, 16], strides = [1, 1, 1]} : vector<18x16x16xf32> to vector<16x16x16xf32>
    %68 = vector.extract_strided_slice %43 {offsets = [1, 1, 0], sizes = [1, 1, 16], strides = [1, 1, 1]} : vector<3x3x16xf32> to vector<1x1x16xf32>
    %69 = vector.broadcast %68 : vector<1x1x16xf32> to vector<16x16x16xf32>
    %70 = arith.mulf %67, %69 : vector<16x16x16xf32>
    %71 = arith.addf %66, %70 : vector<16x16x16xf32>
    %72 = vector.extract_strided_slice %42 {offsets = [1, 0, 0], sizes = [16, 16, 16], strides = [1, 1, 1]} : vector<18x16x16xf32> to vector<16x16x16xf32>
    %73 = vector.extract_strided_slice %43 {offsets = [1, 2, 0], sizes = [1, 1, 16], strides = [1, 1, 1]} : vector<3x3x16xf32> to vector<1x1x16xf32>
    %74 = vector.broadcast %73 : vector<1x1x16xf32> to vector<16x16x16xf32>
    %75 = arith.mulf %72, %74 : vector<16x16x16xf32>
    %76 = arith.addf %71, %75 : vector<16x16x16xf32>
    %77 = vector.extract_strided_slice %35 {offsets = [2, 0, 0], sizes = [16, 16, 16], strides = [1, 1, 1]} : vector<18x16x16xf32> to vector<16x16x16xf32>
    %78 = vector.extract_strided_slice %43 {offsets = [2, 0, 0], sizes = [1, 1, 16], strides = [1, 1, 1]} : vector<3x3x16xf32> to vector<1x1x16xf32>
    %79 = vector.broadcast %78 : vector<1x1x16xf32> to vector<16x16x16xf32>
    %80 = arith.mulf %77, %79 : vector<16x16x16xf32>
    %81 = arith.addf %76, %80 : vector<16x16x16xf32>
    %82 = vector.extract_strided_slice %27 {offsets = [2, 0, 0], sizes = [16, 16, 16], strides = [1, 1, 1]} : vector<18x16x16xf32> to vector<16x16x16xf32>
    %83 = vector.extract_strided_slice %43 {offsets = [2, 1, 0], sizes = [1, 1, 16], strides = [1, 1, 1]} : vector<3x3x16xf32> to vector<1x1x16xf32>
    %84 = vector.broadcast %83 : vector<1x1x16xf32> to vector<16x16x16xf32>
    %85 = arith.mulf %82, %84 : vector<16x16x16xf32>
    %86 = arith.addf %81, %85 : vector<16x16x16xf32>
    %87 = vector.extract_strided_slice %42 {offsets = [2, 0, 0], sizes = [16, 16, 16], strides = [1, 1, 1]} : vector<18x16x16xf32> to vector<16x16x16xf32>
    %88 = vector.extract_strided_slice %43 {offsets = [2, 2, 0], sizes = [1, 1, 16], strides = [1, 1, 1]} : vector<3x3x16xf32> to vector<1x1x16xf32>
    %89 = vector.broadcast %88 : vector<1x1x16xf32> to vector<16x16x16xf32>
    %90 = arith.mulf %87, %89 : vector<16x16x16xf32>
    %91 = arith.addf %86, %90 : vector<16x16x16xf32>
    %92 = vector.extract_strided_slice %91 {offsets = [0, 0, 0], sizes = [16, 16, 8], strides = [1, 1, 1]} : vector<16x16x16xf32> to vector<16x16x8xf32>
    %cst_18 = arith.constant 5.000000e-01 : f32
    %93 = vector.broadcast %cst_18 : f32 to vector<16x16x8xf32>
    %94 = arith.mulf %93, %92 : vector<16x16x8xf32>
    %cst_19 = arith.constant 0.707106769 : f32
    %95 = vector.broadcast %cst_19 : f32 to vector<16x16x8xf32>
    %96 = arith.mulf %92, %95 : vector<16x16x8xf32>
    %cst_20 = arith.constant 0.000000e+00 : f32
    %97 = vector.broadcast %cst_20 : f32 to vector<16x16x8xf32>
    %98 = arith.cmpf oge, %96, %97 : vector<16x16x8xf32>
    %cst_21 = arith.constant 1.000000e+00 : f32
    %cst_22 = arith.constant -1.000000e+00 : f32
    %99 = vector.broadcast %cst_21 : f32 to vector<16x16x8xf32>
    %100 = vector.broadcast %cst_22 : f32 to vector<16x16x8xf32>
    %101 = arith.select %98, %99, %100 : vector<16x16x8xi1>, vector<16x16x8xf32>
    %102 = math.absf %96 : vector<16x16x8xf32>
    %cst_23 = arith.constant 0.327591091 : f32
    %103 = vector.broadcast %cst_23 : f32 to vector<16x16x8xf32>
    %104 = arith.mulf %103, %102 : vector<16x16x8xf32>
    %cst_24 = arith.constant 1.000000e+00 : f32
    %105 = vector.broadcast %cst_24 : f32 to vector<16x16x8xf32>
    %106 = arith.addf %105, %104 : vector<16x16x8xf32>
    %107 = tpu.reciprocal %106 {approx = true} : vector<16x16x8xf32> -> vector<16x16x8xf32>
    %108 = arith.mulf %106, %107 : vector<16x16x8xf32>
    %cst_25 = arith.constant 2.000000e+00 : f32
    %109 = vector.broadcast %cst_25 : f32 to vector<16x16x8xf32>
    %110 = arith.subf %109, %108 : vector<16x16x8xf32>
    %111 = arith.mulf %107, %110 : vector<16x16x8xf32>
    %cst_26 = arith.constant 1.06140542 : f32
    %112 = vector.broadcast %cst_26 : f32 to vector<16x16x8xf32>
    %113 = arith.mulf %111, %112 : vector<16x16x8xf32>
    %cst_27 = arith.constant -1.45315206 : f32
    %114 = vector.broadcast %cst_27 : f32 to vector<16x16x8xf32>
    %115 = arith.addf %114, %113 : vector<16x16x8xf32>
    %116 = arith.mulf %111, %115 : vector<16x16x8xf32>
    %cst_28 = arith.constant 1.42141378 : f32
    %117 = vector.broadcast %cst_28 : f32 to vector<16x16x8xf32>
    %118 = arith.addf %117, %116 : vector<16x16x8xf32>
    %119 = arith.mulf %111, %118 : vector<16x16x8xf32>
    %cst_29 = arith.constant -0.284496725 : f32
    %120 = vector.broadcast %cst_29 : f32 to vector<16x16x8xf32>
    %121 = arith.addf %120, %119 : vector<16x16x8xf32>
    %122 = arith.mulf %111, %121 : vector<16x16x8xf32>
    %cst_30 = arith.constant 0.254829586 : f32
    %123 = vector.broadcast %cst_30 : f32 to vector<16x16x8xf32>
    %124 = arith.addf %123, %122 : vector<16x16x8xf32>
    %125 = arith.mulf %111, %124 : vector<16x16x8xf32>
    %cst_31 = arith.constant 0.000000e+00 : f32
    %126 = vector.broadcast %cst_31 : f32 to vector<16x16x8xf32>
    %127 = arith.subf %126, %102 : vector<16x16x8xf32>
    %128 = arith.mulf %127, %102 : vector<16x16x8xf32>
    %129 = math.exp %128 : vector<16x16x8xf32>
    %130 = arith.mulf %125, %129 : vector<16x16x8xf32>
    %cst_32 = arith.constant 1.000000e+00 : f32
    %131 = vector.broadcast %cst_32 : f32 to vector<16x16x8xf32>
    %132 = arith.subf %131, %130 : vector<16x16x8xf32>
    %133 = arith.mulf %101, %132 : vector<16x16x8xf32>
    %cst_33 = arith.constant 1.000000e+00 : f32
    %134 = vector.broadcast %cst_33 : f32 to vector<16x16x8xf32>
    %135 = arith.addf %134, %133 : vector<16x16x8xf32>
    %136 = arith.mulf %94, %135 : vector<16x16x8xf32>
    %137 = vector.extract_strided_slice %91 {offsets = [0, 0, 8], sizes = [16, 16, 8], strides = [1, 1, 1]} : vector<16x16x16xf32> to vector<16x16x8xf32>
    %138 = arith.mulf %136, %137 : vector<16x16x8xf32>
    %139 = vector.shape_cast %138 : vector<16x16x8xf32> to vector<256x8xf32>
    %c0_34 = arith.constant 0 : index
    %c0_35 = arith.constant 0 : index
    %140 = vector.load %arg7[%c0_34, %c0_35] : memref<8x4xf32, #tpu.memory_space<vmem>>, vector<8x4xf32>
    %cst_36 = arith.constant dense<0.000000e+00> : vector<256x4xf32>
    %141 = tpu.matmul %139, %140, %cst_36 {dimension_numbers = #tpu.dot_dimension_numbers<[1], [0], [0], [1], [0, 0, 1, 1], [], []>} : vector<256x8xf32>, vector<8x4xf32>, vector<256x4xf32> -> vector<256x4xf32>
    %c0_37 = arith.constant 0 : index
    %c0_38 = arith.constant 0 : index
    %142 = vector.load %arg8[%c0_37, %c0_38] : memref<1x4xf32, #tpu.memory_space<vmem>>, vector<1x4xf32>
    %143 = vector.broadcast %142 : vector<1x4xf32> to vector<256x4xf32>
    %144 = arith.addf %141, %143 : vector<256x4xf32>
    %145 = vector.shape_cast %144 : vector<256x4xf32> to vector<16x16x4xf32>
    %c0_39 = arith.constant 0 : index
    %c0_40 = arith.constant 0 : index
    %c0_41 = arith.constant 0 : index
    %c0_42 = arith.constant 0 : index
    %146 = vector.load %arg9[%c0_39, %c0_40, %c0_41, %c0_42] : memref<1x16x16x4xf32, #tpu.memory_space<vmem>>, vector<1x16x16x4xf32>
    %147 = vector.shape_cast %146 : vector<1x16x16x4xf32> to vector<16x16x4xf32>
    %148 = vector.shape_cast %145 : vector<16x16x4xf32> to vector<1x16x16x4xf32>
    tpu.vector_store %arg9[%c0_39, %c0_40, %c0_41, %c0_42], %148 {strides = array<i32>} : memref<1x16x16x4xf32, #tpu.memory_space<vmem>>, vector<1x16x16x4xf32>,
    return
  }
  func.func @transform_0(%arg0: i32, %arg1: i32) -> (i32, i32, i32, i32) {
    %c0_i32 = arith.constant 0 : i32
    %c0_i32_0 = arith.constant 0 : i32
    %c0_i32_1 = arith.constant 0 : i32
    %c0_i32_2 = arith.constant 0 : i32
    return %arg0, %c0_i32, %c0_i32_0, %c0_i32_1 : i32, i32, i32, i32
  }
  func.func @transform_1(%arg0: i32, %arg1: i32) -> (i32, i32) {
    %c0_i32 = arith.constant 0 : i32
    %c0_i32_0 = arith.constant 0 : i32
    %c0_i32_1 = arith.constant 0 : i32
    return %c0_i32, %c0_i32_0 : i32, i32
  }
  func.func @transform_2(%arg0: i32, %arg1: i32) -> (i32, i32) {
    %c0_i32 = arith.constant 0 : i32
    %c0_i32_0 = arith.constant 0 : i32
    %c0_i32_1 = arith.constant 0 : i32
    return %c0_i32, %c0_i32_0 : i32, i32
  }
  func.func @transform_3(%arg0: i32, %arg1: i32) -> (i32, i32, i32) {
    %c0_i32 = arith.constant 0 : i32
    %c0_i32_0 = arith.constant 0 : i32
    %c0_i32_1 = arith.constant 0 : i32
    %c0_i32_2 = arith.constant 0 : i32
    return %c0_i32, %c0_i32_0, %c0_i32_1 : i32, i32, i32
  }
  func.func @transform_4(%arg0: i32, %arg1: i32) -> (i32, i32) {
    %c0_i32 = arith.constant 0 : i32
    %c0_i32_0 = arith.constant 0 : i32
    %c0_i32_1 = arith.constant 0 : i32
    return %c0_i32, %c0_i32_0 : i32, i32
  }
  func.func @transform_5(%arg0: i32, %arg1: i32) -> (i32, i32) {
    %c0_i32 = arith.constant 0 : i32
    %c0_i32_0 = arith.constant 0 : i32
    %c0_i32_1 = arith.constant 0 : i32
    return %c0_i32, %c0_i32_0 : i32, i32
  }
  func.func @transform_6(%arg0: i32, %arg1: i32) -> (i32, i32) {
    %c0_i32 = arith.constant 0 : i32
    %c0_i32_0 = arith.constant 0 : i32
    %c0_i32_1 = arith.constant 0 : i32
    return %c0_i32, %c0_i32_0 : i32, i32
  }
  func.func @transform_7(%arg0: i32, %arg1: i32) -> (i32, i32, i32, i32) {
    %c0_i32 = arith.constant 0 : i32
    %c0_i32_0 = arith.constant 0 : i32
    %c0_i32_1 = arith.constant 0 : i32
    return %arg0, %arg1, %c0_i32, %c0_i32_0 : i32, i32, i32, i32
  }
}

</mosaic_0001>

<bundles_post_ra>
// kernel: tpu_custom_call.1
= control target key start
LH: loop header
LB: loop body
LE: loop exit
PB: predicated region body
PF: predicated region fallthrough
CT: control target
= control target key end

     0   :  { %s3854_s24 = smov 0   ;;  %s3856_s25 = smov 0   ;;  %s6291_s0 = inlined_call_operand.vmem [shape: f32[2,18,16,4], index: 0, kind: input, shape index: {}]   ;;  %s6292_s1 = inlined_call_operand.vmem [shape: f32[4,16], index: 1, kind: input, shape index: {}]   ;;  %s6293_s2 = inlined_call_operand.vmem [shape: f32[1,16], index: 2, kind: input, shape index: {}]   ;;  %s6294_s3 = inlined_call_operand.vmem [shape: f32[3,3,16], index: 3, kind: input, shape index: {}]   ;;  %s6295_s4 = inlined_call_operand.vmem [shape: f32[1,16], index: 4, kind: input, shape index: {}]   ;;  %s6296_s5 = inlined_call_operand.vmem [shape: f32[8,4], index: 5, kind: input, shape index: {}]   ;;  %s6297_s6 = inlined_call_operand.vmem [shape: f32[1,4], index: 6, kind: input, shape index: {}]   ;;  %s6298_s7 = inlined_call_operand.vmem [shape: f32[2,16,16,4], index: 7, kind: output, shape index: {}]  }
   0x1   :  { %s3858_s26 = smov 0  }
   0x2 LB: > { %s29_s27 = sadd.s32 1, %s3805_s25  ;;  %p3371_p0 = scmp.ge.s32.totalorder %s3809_s26, 1  ;;  %s3809_s26 = sphi %s3858_s26, %s17_s26   ;;  %s3805_s25 = sphi %s3856_s25, %s6749_s25   ;;  %s3801_s24 = sphi %s3854_s24, %s6748_s24  }
   0x3   : > { %p31_p1 = scmp.ge.s32.totalorder %s29_s27, 2  ;;  %p251_p2 = scmp.lt.s32.totalorder %s3809_s26, 3 }
   0x5   : > { %s6751_s27 = smov (%p31_p1, %s29_s27), 0  ;;  %p252_p3 = pnand %p3371_p0, %p251_p2 }
   0x7   : > { %255 = sbr.rel (%p252_p3) target bundleno = 875 (0x36b), region = 48 }
   0xc   : > { %v343_v0 = vld [vmem:[%s6292_s1] sm:$0xf]  ;;  %vm453_vm0 = vcmask 1043456   ;;  %p288_p4 = scmp.lt.s32.totalorder %s3801_s24, 1  ;;  %vm344_vm1 = vcmask 31744   ;;  %v847_v37 = vlaneseq  ;;  %v3811_v40 = vmov 0.0  }
   0xd   : > { %3520 = vmatprep.subr.msk.mxu0 %vm453_vm0, %v343_v0  ;;  %3626 = vmatprep.subr.msk.mxu1 %vm453_vm0, %v343_v0  ;;  %v1206_v46 = vld [vmem:[%s6294_s3] sm:$0x7]  ;;  %s3812_s21 = smov 120   ;;  %vm2924_vm10 = vcmask 64512  }
   0xe   : > { %3521 = vmatpush3.msk.msra.mxu0 %vm453_vm0, %v343_v0  ;;  %s6753_s24 = smov (!%p288_p4, %s3801_s24), 1  ;;  %3627 = vmatpush3.msk.msra.mxu1 %vm453_vm0, %v343_v0  ;;  %v3955_v38 = vshrl.u32 %v847_v37, 7  ;;  %v3973_v52 = vld [vmem:[%s6293_s2] ss:$0 sm:$0xff]  ;;  %v1207_v0 = vld [vmem:[%s6294_s3 + $0x4] sm:$0x7] }
   0xf   : > { %s3628_s30 = smul.u32 288, %s6753_s24  ;;  %v3989_v60 = vld [vmem:[%s6295_s4] ss:$0 sm:$0xff]  ;;  %s3448_s11 = sshll.u32 %s6753_s24, 8 }
  0x10   : > { %v849_v39 = vsub.s32 0, %v3955_v38  ;;  %vm1014_vm2 = vcmp.lt.s32.totalorder %v3955_v38, 1  ;;  %v1286_v47 = vsub.s32 1, %v3955_v38  ;;  %vm976_vm3 = vcmp.ge.s32.totalorder %v3955_v38, 1  ;;  %s6184_s16 = scalar_lea.vmem %s6298_s7, %s3448_s11 }
  0x11   : > { %s3881_s10 = scalar_lea.vmem %s6291_s0, %s3628_s30  ;;  %v3976_v53 = vadd.s32 8, %v3955_v38  ;;  %v1354_v54 = vsub.s32 2, %v3955_v38  ;;  %vm1129_vm4 = vcmp.lt.s32.totalorder %v3955_v38, 7 }
  0x12   : > { %v307_v1 = vld [vmem:[%s3881_s10] sm:$0xff]  ;;  %v308_v2 = vld [vmem:[%s3881_s10 + $0x8] sm:$0xff]  ;;  %v309_v3 = vld [vmem:[%s3881_s10 + $0x10] sm:$0xff]  ;;  %v3958_v41 = vrot.slane %v3811_v40, %v849_v39  ;;  %v3968_v50 = vrot.slane %v1206_v46, %v849_v39 }
  0x13   : > { %3522 = vmatprep.mubr.msk.f32.mxu0 %vm344_vm1, %v307_v1  ;;  %v310_v4 = vld [vmem:[%s3881_s10 + $0x18] sm:$0xff]  ;;  %v311_v5 = vld [vmem:[%s3881_s10 + $0x20] sm:$0xff]  ;;  %v312_v6 = vld [vmem:[%s3881_s10 + $0x28] sm:$0xff]  ;;  %v3995_v1 = vrot.slane %v1206_v46, %v1286_v47  ;;  %vm1092_vm5 = vcmp.le.s32.totalorder %v3976_v53, 14 }
  0x14   : > { %3523 = vmatmul.mubr.msk.f32.vlgmr.msra.gmra.mxu0 %vm344_vm1, %v308_v2  ;;  %v313_v7 = vld [vmem:[%s3881_s10 + $0x30] sm:$0xff]  ;;  %v314_v8 = vld [vmem:[%s3881_s10 + $0x38] sm:$0xff]  ;;  %v315_v11 = vld [vmem:[%s3881_s10 + $0x40] sm:$0xff]  ;;  %6404 = vst [vmem:[#allocation2_spill] sm:$0xff] %v3958_v41 }
  0x15   : > { %3525 = vmatprep.mubr.msk.f32.mxu0 %vm344_vm1, %v309_v3  ;;  %v341_v9 = vld [vmem:[%s3881_s10 + $0x110] sm:$0xff]  ;;  %v342_v10 = vld [vmem:[%s3881_s10 + $0x118] sm:$0xff]  ;;  %v316_v12 = vld [vmem:[%s3881_s10 + $0x48] sm:$0xff] }
  0x16   : > { %3573 = vmatprep.mubr.msk.f32.mxu1 %vm344_vm1, %v341_v9  ;;  %v317_v13 = vld [vmem:[%s3881_s10 + $0x50] sm:$0xff]  ;;  %v318_v14 = vld [vmem:[%s3881_s10 + $0x58] sm:$0xff]  ;;  %v319_v15 = vld [vmem:[%s3881_s10 + $0x60] sm:$0xff] }
  0x17   : > { %3574 = vmatmul.mubr.msk.f32.vlgmr.msra.gmra.mxu1 %vm344_vm1, %v342_v10  ;;  %v320_v16 = vld [vmem:[%s3881_s10 + $0x68] sm:$0xff]  ;;  %v321_v17 = vld [vmem:[%s3881_s10 + $0x70] sm:$0xff]  ;;  %v322_v18 = vld [vmem:[%s3881_s10 + $0x78] sm:$0xff] }
  0x18   : > { %3526 = vmatmul.mubr.msk.f32.gmra.mxu0 %vm344_vm1, %v310_v4  ;;  %v323_v19 = vld [vmem:[%s3881_s10 + $0x80] sm:$0xff]  ;;  %v324_v20 = vld [vmem:[%s3881_s10 + $0x88] sm:$0xff]  ;;  %v325_v21 = vld [vmem:[%s3881_s10 + $0x90] sm:$0xff] }
  0x19   : > { %3528 = vmatprep.mubr.msk.f32.mxu0 %vm344_vm1, %v311_v5  ;;  %v326_v22 = vld [vmem:[%s3881_s10 + $0x98] sm:$0xff]  ;;  %v327_v23 = vld [vmem:[%s3881_s10 + $0xa0] sm:$0xff]  ;;  %v328_v24 = vld [vmem:[%s3881_s10 + $0xa8] sm:$0xff]  ;;  %v4003_v5 = vrot.slane %v1206_v46, %v1354_v54 }
  0x1a   : > { %v329_v25 = vld [vmem:[%s3881_s10 + $0xb0] sm:$0xff]  ;;  %v330_v26 = vld [vmem:[%s3881_s10 + $0xb8] sm:$0xff]  ;;  %v331_v27 = vld [vmem:[%s3881_s10 + $0xc0] sm:$0xff] }
  0x1b   : > { %v332_v28 = vld [vmem:[%s3881_s10 + $0xc8] sm:$0xff]  ;;  %v333_v29 = vld [vmem:[%s3881_s10 + $0xd0] sm:$0xff]  ;;  %v334_v30 = vld [vmem:[%s3881_s10 + $0xd8] sm:$0xff] }
  0x1c   : > { %3529 = vmatmul.mubr.msk.f32.gmra.mxu0 %vm344_vm1, %v312_v6  ;;  %v335_v31 = vld [vmem:[%s3881_s10 + $0xe0] sm:$0xff]  ;;  %v336_v32 = vld [vmem:[%s3881_s10 + $0xe8] sm:$0xff]  ;;  %v337_v33 = vld [vmem:[%s3881_s10 + $0xf0] sm:$0xff]  ;;  %v4005_v6 = vrot.slane %v1207_v0, %v849_v39 }
  0x1d   : > { %3531 = vmatprep.mubr.msk.f32.mxu0 %vm344_vm1, %v313_v7  ;;  %v338_v34 = vld [vmem:[%s3881_s10 + $0xf8] sm:$0xff]  ;;  %v339_v35 = vld [vmem:[%s3881_s10 + $0x100] sm:$0xff]  ;;  %v340_v36 = vld [vmem:[%s3881_s10 + $0x108] sm:$0xff] }
  0x1e   : > { %v1208_v4 = vld [vmem:[%s6294_s3 + $0x8] sm:$0x7] }
  0x20   : > { %3532 = vmatmul.mubr.msk.f32.gmra.mxu0 %vm344_vm1, %v314_v8 }
  0x21   : > { %3534 = vmatprep.mubr.msk.f32.mxu0 %vm344_vm1, %v315_v11 }
  0x24   : > { %3535 = vmatmul.mubr.msk.f32.gmra.mxu0 %vm344_vm1, %v316_v12 }
  0x25   : > { %3537 = vmatprep.mubr.msk.f32.mxu0 %vm344_vm1, %v317_v13  ;;  %v4014_v13 = vrot.slane %v1207_v0, %v1286_v47 }
  0x28   : > { %3538 = vmatmul.mubr.msk.f32.gmra.mxu0 %vm344_vm1, %v318_v14  ;;  %v4016_v14 = vrot.slane %v1208_v4, %v849_v39 }
  0x29   : > { %3540 = vmatprep.mubr.msk.f32.mxu0 %vm344_vm1, %v319_v15 }
  0x2c   : > { %3541 = vmatmul.mubr.msk.f32.gmra.mxu0 %vm344_vm1, %v320_v16 }
  0x2d   : > { %3543 = vmatprep.mubr.msk.f32.mxu0 %vm344_vm1, %v321_v17 }
  0x30   : > { %3544 = vmatmul.mubr.msk.f32.gmra.mxu0 %vm344_vm1, %v322_v18  ;;  %v4018_v18 = vrot.slane %v1207_v0, %v1354_v54 }
  0x31   : > { %3546 = vmatprep.mubr.msk.f32.mxu0 %vm344_vm1, %v323_v19  ;;  %v4020_v19 = vrot.slane %v1208_v4, %v1286_v47 }
  0x34   : > { %3547 = vmatmul.mubr.msk.f32.gmra.mxu0 %vm344_vm1, %v324_v20 }
  0x35   : > { %3549 = vmatprep.mubr.msk.f32.mxu0 %vm344_vm1, %v325_v21 }
  0x38   : > { %3550 = vmatmul.mubr.msk.f32.gmra.mxu0 %vm344_vm1, %v326_v22 }
  0x39   : > { %3552 = vmatprep.mubr.msk.f32.mxu0 %vm344_vm1, %v327_v23 }
  0x3c   : > { %3553 = vmatmul.mubr.msk.f32.gmra.mxu0 %vm344_vm1, %v328_v24 }
  0x3d   : > { %3555 = vmatprep.mubr.msk.f32.mxu0 %vm344_vm1, %v329_v25 }
  0x40   : > { %3556 = vmatmul.mubr.msk.f32.gmra.mxu0 %vm344_vm1, %v330_v26 }
  0x41   : > { %3558 = vmatprep.mubr.msk.f32.mxu0 %vm344_vm1, %v331_v27 }
  0x44   : > { %3559 = vmatmul.mubr.msk.f32.gmra.mxu0 %vm344_vm1, %v332_v28 }
  0x45   : > { %3561 = vmatprep.mubr.msk.f32.mxu0 %vm344_vm1, %v333_v29 }
  0x48   : > { %3562 = vmatmul.mubr.msk.f32.gmra.mxu0 %vm344_vm1, %v334_v30 }
  0x49   : > { %3564 = vmatprep.mubr.msk.f32.mxu0 %vm344_vm1, %v335_v31 }
  0x4c   : > { %3565 = vmatmul.mubr.msk.f32.gmra.mxu0 %vm344_vm1, %v336_v32 }
  0x4d   : > { %3567 = vmatprep.mubr.msk.f32.mxu0 %vm344_vm1, %v337_v33 }
  0x50   : > { %3568 = vmatmul.mubr.msk.f32.gmra.mxu0 %vm344_vm1, %v338_v34 }
  0x51   : > { %3570 = vmatprep.mubr.msk.f32.mxu0 %vm344_vm1, %v339_v35 }
  0x54   : > { %3571 = vmatmul.mubr.msk.f32.gmra.mxu0 %vm344_vm1, %v340_v36  ;;  %v4040_v36 = vrot.slane %v1208_v4, %v1354_v54 }
  0xd4   : > { %v3524_v42 = vpop.f32.mrf.mxu0 }
  0xd5   : > { %v938_v43 = vadd.f32 %v3524_v42, %v3958_v41 }
  0xd6   : > { %v523_v44 = vpop.f32.mrf.mxu0 }
  0xd7   : > { %v937_v45 = vadd.f32 %v3958_v41, %v523_v44  ;;  %v996_v49 = vrot.slane %v938_v43, 7  ;;  %v1111_v63 = vrot.slane %v938_v43, 1  ;;  %v1289_v27 = vmul.f32 %v3995_v1, %v938_v43 }
  0xd8   : > { %v3527_v48 = vpop.f32.mrf.mxu0 }
  0xd9   : > { %v978_v51 = vrot.slane %v937_v45, 7  ;;  %v1093_v58 = vrot.slane %v937_v45, 1  ;;  %v940_v61 = vadd.f32 %v3527_v48, %v3973_v52  ;;  %v1288_v12 = vmul.f32 %v3995_v1, %v937_v45 }
  0xda   : > { %v533_v55 = vpop.f32.mrf.mxu0 }
  0xdb   : > { %v1015_v56 = vsel %vm1014_vm2, %v978_v51, %v996_v49  ;;  %v1033_v57 = vsel %vm1014_vm2, %v996_v49, %v978_v51  ;;  %v939_v7 = vadd.f32 %v3973_v52, %v533_v55  ;;  %v1130_v9 = vsel %vm1129_vm4, %v1093_v58, %v1111_v63 }
  0xdc   : > { %v1055_v59 = vsel %vm976_vm3, %v1033_v57, 0.0  ;;  %v3530_v62 = vpop.f32.mrf.mxu0  ;;  %v1215_v3 = vmul.f32 %v3968_v50, %v1015_v56  ;;  %v1148_v10 = vsel %vm1129_vm4, %v1111_v63, %v1093_v58  ;;  %v997_v15 = vrot.slane %v940_v61, 7 }
  0xdd   : > { %v1214_v2 = vmul.f32 %v3968_v50, %v1055_v59  ;;  %v979_v16 = vrot.slane %v939_v7, 7  ;;  %v1171_v22 = vsel %vm1092_vm5, %v1148_v10, 0.0  ;;  %v1356_v23 = vmul.f32 %v4003_v5, %v1130_v9 }
  0xde   : > { %v543_v8 = vpop.f32.mrf.mxu0  ;;  %v1253_v20 = vadd.f32 %v3989_v60, %v1215_v3  ;;  %v1094_v25 = vrot.slane %v939_v7, 1  ;;  %v4034_v30 = vadd.f32 %v3530_v62, %v3973_v52  ;;  %v1112_v32 = vrot.slane %v940_v61, 1 }
  0xdf   : > { %v1252_v11 = vadd.f32 %v3989_v60, %v1214_v2  ;;  %v1034_v24 = vsel %vm1014_vm2, %v997_v15, %v979_v16  ;;  %v1016_v28 = vsel %vm1014_vm2, %v979_v16, %v997_v15  ;;  %v4038_v34 = vadd.f32 %v3973_v52, %v543_v8 }
  0xe0   : > { %v3533_v17 = vpop.f32.mrf.mxu0  ;;  %v1057_v29 = vsel %vm976_vm3, %v1034_v24, 0.0  ;;  %v1321_v37 = vadd.f32 %v1289_v27, %v1253_v20  ;;  %v1357_v39 = vmul.f32 %v4003_v5, %v1171_v22  ;;  %v4044_v40 = vmul.f32 %v3995_v1, %v940_v61 }
  0xe1   : > { %v1320_v21 = vadd.f32 %v1288_v12, %v1252_v11  ;;  %v1216_v33 = vmul.f32 %v3968_v50, %v1057_v29  ;;  %v1131_v42 = vsel %vm1129_vm4, %v1094_v25, %v1112_v32  ;;  %v1217_v43 = vmul.f32 %v3968_v50, %v1016_v28 }
  0xe2   : > { %v553_v26 = vpop.f32.mrf.mxu0  ;;  %v1424_v45 = vmul.f32 %v4005_v6, %v1057_v29  ;;  %v4052_v47 = vmul.f32 %v4014_v13, %v940_v61  ;;  %v1290_v48 = vmul.f32 %v3995_v1, %v939_v7  ;;  %v1492_v49 = vmul.f32 %v4014_v13, %v939_v7 }
  0xe3   : > { %v1388_v31 = vadd.f32 %v1356_v23, %v1320_v21  ;;  %v1254_v44 = vadd.f32 %v3989_v60, %v1216_v33  ;;  %v6300_v51 = vrot.slane %v4034_v30, 7  ;;  %v4059_v55 = vmul.f32 %v3995_v1, %v4034_v30 }
  0xe4   : > { %v3536_v35 = vpop.f32.mrf.mxu0  ;;  %v6299_v56 = vrot.slane %v4038_v34, 7  ;;  %v4063_v57 = vadd.f32 %v3533_v17, %v3973_v52  ;;  %v1389_v59 = vadd.f32 %v1357_v39, %v1321_v37  ;;  %v1149_v61 = vsel %vm1129_vm4, %v1112_v32, %v1094_v25 }
  0xe5   : > { %v1456_v54 = vadd.f32 %v1424_v45, %v1388_v31  ;;  %v1358_v62 = vmul.f32 %v4003_v5, %v1131_v42  ;;  %v4069_v63 = vadd.f32 %v3973_v52, %v553_v26  ;;  %v4072_v0 = vadd.f32 %v3989_v60, %v1217_v43 }
  0xe6   : > { %v563_v46 = vpop.f32.mrf.mxu0  ;;  %v1322_v2 = vadd.f32 %v1290_v48, %v1254_v44  ;;  %v1425_v3 = vmul.f32 %v4005_v6, %v1016_v28  ;;  %v4076_v4 = vadd.f32 %v3536_v35, %v3973_v52  ;;  %v4080_v8 = vmul.f32 %v4014_v13, %v4034_v30 }
  0xe7   : > { %v4084_v9 = vmul.f32 %v3995_v1, %v4038_v34  ;;  %v4088_v10 = vmul.f32 %v4014_v13, %v4038_v34  ;;  %v4091_v11 = vadd.f32 %v3973_v52, %v563_v46  ;;  %v1524_v12 = vadd.f32 %v1492_v49, %v1456_v54 }
  0xe8   : > { %v3539_v58 = vpop.f32.mrf.mxu0  ;;  %v4096_v16 = vmul.f32 %v3995_v1, %v4063_v57  ;;  %v1035_v20 = vsel %vm1014_vm2, %v6300_v51, %v6299_v56  ;;  %v4106_v21 = vmul.f32 %v4014_v13, %v4063_v57  ;;  %v4111_v23 = vmul.f32 %v3995_v1, %v4069_v63 }
  0xe9   : > { %v4114_v24 = vadd.f32 %v3539_v58, %v3973_v52  ;;  %v4116_v25 = vadd.f32 %v1358_v62, %v1322_v2  ;;  %v4120_v26 = vmul.f32 %v4014_v13, %v4069_v63  ;;  %v4128_v31 = vmul.f32 %v3995_v1, %v4076_v4 }
  0xea   : > { %v573_v7 = vpop.f32.mrf.mxu0  ;;  %v1059_v32 = vsel %vm976_vm3, %v1035_v20, 0.0  ;;  %v1095_v33 = vrot.slane %v4038_v34, 1  ;;  %v1113_v35 = vrot.slane %v4034_v30, 1  ;;  %v4136_v37 = vmul.f32 %v4014_v13, %v4076_v4 }
  0xeb   : > { %v4124_v28 = vadd.f32 %v3973_v52, %v573_v7  ;;  %v4141_v43 = vmul.f32 %v3995_v1, %v4091_v11  ;;  %v1560_v44 = vmul.f32 %v4018_v18, %v1131_v42  ;;  %v4146_v45 = vmul.f32 %v4014_v13, %v4091_v11 }
  0xec   : > { %v3542_v17 = vpop.f32.mrf.mxu0  ;;  %v4151_v48 = vmul.f32 %v3995_v1, %v4114_v24  ;;  %v4158_v54 = vmul.f32 %v4014_v13, %v4114_v24  ;;  %v1628_v2 = vmul.f32 %v4016_v14, %v1059_v32  ;;  %v1132_v46 = vsel %vm1129_vm4, %v1095_v33, %v1113_v35 }
  0xed   : > { %v4154_v49 = vadd.f32 %v3542_v17, %v3973_v52  ;;  %v1592_v62 = vadd.f32 %v1560_v44, %v1524_v12  ;;  %v4164_v7 = vmul.f32 %v3995_v1, %v4124_v28  ;;  %v4168_v20 = vmul.f32 %v4014_v13, %v4124_v28 }
  0xee   : > { %v583_v29 = vpop.f32.mrf.mxu0  ;;  %6405 = vst [vmem:[#allocation3_spill] sm:$0xff] %v4151_v48  ;;  %6406 = vst [vmem:[#allocation4_spill] sm:$0xff] %v4158_v54  ;;  %v1696_v44 = vmul.f32 %v4020_v19, %v4038_v34  ;;  %v1218_v27 = vmul.f32 %v3968_v50, %v1059_v32  ;;  %v1457_v22 = vadd.f32 %v1425_v3, %v1389_v59  ;;  %v1173_v51 = vsel %vm1092_vm5, %v1149_v61, 0.0 }
  0xef   : > { %v4171_v17 = vadd.f32 %v3973_v52, %v583_v29  ;;  %v1660_v12 = vadd.f32 %v1628_v2, %v1592_v62  ;;  %v4184_v15 = vmul.f32 %v3995_v1, %v4154_v49  ;;  %v4188_v29 = vmul.f32 %v4014_v13, %v4154_v49 }
  0xf0   : > { %v3545_v42 = vpop.f32.mrf.mxu0  ;;  %v1764_v62 = vmul.f32 %v4040_v36, %v1132_v46  ;;  %v1562_v59 = vmul.f32 %v4018_v18, %v1132_v46  ;;  %v6413_v61 = vrot.slane %v4034_v30, 7  ;;  %v6414_v39 = vrot.slane %v4038_v34, 7 }
  0xf1   : > { %v4176_v58 = vadd.f32 %v3545_v42, %v3973_v52  ;;  %6408 = vst [vmem:[#allocation6_spill] sm:$0xff] %v4184_v15  ;;  %6409 = vst [vmem:[#allocation7_spill] sm:$0xff] %v4188_v29  ;;  %v1360_v42 = vmul.f32 %v4003_v5, %v1132_v46  ;;  %v1728_v56 = vadd.f32 %v1696_v44, %v1660_v12 }
  0xf2   : > { %v593_v2 = vpop.f32.mrf.mxu0  ;;  %v4197_v41 = vmul.f32 %v3995_v1, %v4171_v17  ;;  %v4201_v15 = vmul.f32 %v4014_v13, %v4171_v17  ;;  %v1256_v44 = vadd.f32 %v3989_v60, %v1218_v27  ;;  %v1017_v29 = vsel %vm1014_vm2, %v6414_v39, %v6413_v61 }
  0xf3   : > { %6407 = vst [vmem:[#allocation5_spill] sm:$0xff] %v4176_v58  ;;  %v4205_v12 = vadd.f32 %v1764_v62, %v1728_v56  ;;  %v1150_v46 = vsel %vm1129_vm4, %v1113_v35, %v1095_v33  ;;  %v1525_v3 = vadd.f32 %v4052_v47, %v1457_v22  ;;  %v1561_v56 = vmul.f32 %v4018_v18, %v1173_v51 }
  0xf4   : > { %6410 = vst [vmem:[#allocation8_spill] sm:$0xff] %v4197_v41  ;;  %6411 = vst [vmem:[#allocation9_spill] sm:$0xff] %v4201_v15  ;;  %v4216_v41 = vmul.f32 %v3995_v1, %v4176_v58  ;;  %v4224_v27 = vmul.f32 %v4014_v13, %v4176_v58  ;;  %v1426_v34 = vmul.f32 %v4005_v6, %v1059_v32  ;;  %v3548_v33 = vpop.f32.mrf.mxu0  ;;  %v6418_v61 = vrot.slane %v4069_v63, 7 }
  0xf5   : > { %6412 = vst [vmem:[#allocation10_spill] sm:$0xff] %v4205_v12  ;;  %2788 = vrot.lane.b32.xlu0 %v4205_v12, %s3812_s21  ;;  %v4230_v39 = vmul.f32 0.70710677, %v4205_v12  ;;  %v4233_v62 = vadd.f32 %v3973_v52, %v593_v2  ;;  %v4236_v47 = vadd.f32 %v3548_v33, %v3973_v52  ;;  %v1593_v22 = vadd.f32 %v1561_v56, %v1525_v3 }
  0xf6   : > { %6415 = vst [vmem:[#allocation11_spill] sm:$0xff] %v4216_v41  ;;  %6416 = vst [vmem:[#allocation12_spill] sm:$0xff] %v4224_v27  ;;  %v1629_v35 = vmul.f32 %v4016_v14, %v1017_v29  ;;  %v6419_v27 = vrot.slane %v4063_v57, 7  ;;  %v1324_v12 = vadd.f32 %v4084_v9, %v1256_v44  ;;  %v1175_v2 = vsel %vm1092_vm5, %v1150_v46, 0.0 }
  0xf7   : > { %6417 = vst [vmem:[#allocation13_spill] sm:$0xff] %v4230_v39  ;;  %v1956_v41 = vand.u32 2147483647, %v4230_v39  ;;  %v1219_v33 = vmul.f32 %v3968_v50, %v1017_v29  ;;  %v1697_v3 = vmul.f32 %v4020_v19, %v4034_v30  ;;  %v1458_v58 = vadd.f32 %v1426_v34, %v4116_v25 }
  0xf8   : > { %v1036_v32 = vsel %vm1014_vm2, %v6419_v27, %v6418_v61  ;;  %v1661_v15 = vadd.f32 %v1629_v35, %v1593_v22  ;;  %v1096_v9 = vrot.slane %v4069_v63, 1  ;;  %v1114_v44 = vrot.slane %v4063_v57, 1 }
  0xf9   : > { %v1061_v56 = vsel %vm976_vm3, %v1036_v32, 0.0  ;;  %v1988_v54 = vmul.f32 0.3275911, %v1956_v41  ;;  %v2468_v27 = vsub.f32 0.0, %v1956_v41  ;;  %v1765_v39 = vmul.f32 %v4040_v36, %v1175_v2 }
  0xfa   : > { %v1729_v46 = vadd.f32 %v1697_v3, %v1661_v15  ;;  %v1526_v22 = vadd.f32 %v4088_v10, %v1458_v58  ;;  %v4264_v30 = vmul.f32 %v3995_v1, %v4233_v62  ;;  %v4268_v25 = vmul.f32 %v4014_v13, %v4233_v62 }
  0xfb   : > { %v4260_v35 = vadd.f32 1.0, %v1988_v54  ;;  %v1257_v34 = vadd.f32 %v3989_v60, %v1219_v33  ;;  %v2500_v32 = vmul.f32 %v2468_v27, %v1956_v41  ;;  %v1630_v3 = vmul.f32 %v4016_v14, %v1061_v56  ;;  %v603_v33 = vpop.f32.mrf.mxu0 }
  0xfc   : > { %6420 = vst [vmem:[#allocation14_spill] sm:$0xff] %v4264_v30  ;;  %6421 = vst [vmem:[#allocation15_spill] sm:$0xff] %v4268_v25  ;;  %v4271_v48 = vadd.f32 %v1765_v39, %v1729_v46  ;;  %v1594_v15 = vadd.f32 %v1562_v59, %v1526_v22  ;;  %v4277_v54 = vmul.f32 %v3995_v1, %v4236_v47 }
  0xfd   : > { %v4281_v58 = vmul.f32 %v4014_v13, %v4236_v47  ;;  %v1133_v61 = vsel %vm1129_vm4, %v1096_v9, %v1114_v44  ;;  %3656 = vrcp.f32 %v4260_v35  ;;  %v1698_v39 = vmul.f32 %v4020_v19, %v4069_v63 }
  0xfe   : > { %6422 = vst [vmem:[#allocation16_spill] sm:$0xff] %v4271_v48  ;;  %6423 = vst [vmem:[#allocation17_spill] sm:$0xff] %v4277_v54  ;;  %2790 = vrot.lane.b32.xlu0 %v4271_v48, %s3812_s21  ;;  %v4289_v41 = vmul.f32 0.70710677, %v4271_v48  ;;  %v1662_v59 = vadd.f32 %v1630_v3, %v1594_v15  ;;  %v1392_v27 = vadd.f32 %v1360_v42, %v1324_v12 }
  0xff   : > { %6424 = vst [vmem:[#allocation18_spill] sm:$0xff] %v4281_v58  ;;  %v1359_v46 = vmul.f32 %v4003_v5, %v1173_v51  ;;  %v1325_v22 = vadd.f32 %v4059_v55, %v1257_v34  ;;  %v1220_v10 = vmul.f32 %v3968_v50, %v1061_v56  ;;  %v2532_v58 = vmul.f32 1.442695, %v2500_v32  ;;  %v3551_v34 = vpop.f32.mrf.mxu0 }
 0x100   : > { %6425 = vst [vmem:[#allocation19_spill] sm:$0xff] %v4289_v41  ;;  %v1957_v54 = vand.u32 2147483647, %v4289_v41  ;;  %v1730_v25 = vadd.f32 %v1698_v39, %v1662_v59  ;;  %v1766_v30 = vmul.f32 %v4040_v36, %v1133_v61  ;;  %v1361_v48 = vmul.f32 %v4003_v5, %v1175_v2 }
 0x101   : > { %v1563_v15 = vmul.f32 %v4018_v18, %v1175_v2  ;;  %v1427_v3 = vmul.f32 %v4005_v6, %v1017_v29  ;;  %v4302_v42 = vadd.f32 %v3973_v52, %v603_v33  ;;  %v1362_v55 = vmul.f32 %v4003_v5, %v1133_v61 }
 0x102   : > { %v1989_v51 = vmul.f32 0.3275911, %v1957_v54  ;;  %v4305_v12 = vadd.f32 %v1766_v30, %v1730_v25  ;;  %v6427_v32 = vrot.slane %v4063_v57, 7  ;;  %v6428_v59 = vrot.slane %v4069_v63, 7 }
 0x103   : > { %v1564_v2 = vmul.f32 %v4018_v18, %v1133_v61  ;;  %v1258_v29 = vadd.f32 %v3989_v60, %v1220_v10  ;;  %v4316_v33 = vadd.f32 %v3551_v34, %v3973_v52  ;;  %v1323_v41 = vadd.f32 %v4044_v40, %v4072_v0 }
 0x104   : > { %6426 = vst [vmem:[#allocation20_spill] sm:$0xff] %v4305_v12  ;;  %v1018_v39 = vsel %vm1014_vm2, %v6428_v59, %v6427_v32  ;;  %3658 = vpow2.f32 %v2532_v58  ;;  %v4320_v30 = vadd.f32 %v1361_v48, %v1325_v22  ;;  %2792 = vrot.lane.b32.xlu1 %v4305_v12, %s3812_s21  ;;  %v1428_v63 = vmul.f32 %v4005_v6, %v1061_v56 }
 0x105   : > { %v4326_v25 = vmul.f32 0.70710677, %v4305_v12  ;;  %v2469_v61 = vsub.f32 0.0, %v1957_v54  ;;  %v1391_v32 = vadd.f32 %v1359_v46, %v1323_v41  ;;  %v1221_v34 = vmul.f32 %v3968_v50, %v1018_v39 }
 0x106   : > { %v4330_v59 = vadd.f32 1.0, %v1989_v51  ;;  %v4335_v0 = vmul.f32 %v3995_v1, %v4302_v42  ;;  %v4339_v48 = vmul.f32 %v4014_v13, %v4302_v42  ;;  %v1326_v56 = vadd.f32 %v4111_v23, %v1258_v29 }
 0x107   : > { %6429 = vst [vmem:[#allocation21_spill] sm:$0xff] %v4326_v25  ;;  %v1958_v40 = vand.u32 2147483647, %v4326_v25  ;;  %v1151_v41 = vsel %vm1129_vm4, %v1114_v44, %v1096_v9  ;;  %v1459_v46 = vadd.f32 %v1427_v3, %v1391_v32  ;;  %v4347_v10 = vmul.f32 %v3995_v1, %v4316_v33 }
 0x108   : > { %6430 = vst [vmem:[#allocation22_spill] sm:$0xff] %v4335_v0  ;;  %6431 = vst [vmem:[#allocation23_spill] sm:$0xff] %v4339_v48  ;;  %v6433_v12 = vrot.slane %v4091_v11, 7  ;;  %v6434_v25 = vrot.slane %v4076_v4, 7  ;;  %v2501_v23 = vmul.f32 %v2469_v61, %v1957_v54  ;;  %v1259_v58 = vadd.f32 %v3989_v60, %v1221_v34 }
 0x109   : > { %v1990_v22 = vmul.f32 0.3275911, %v1958_v40  ;;  %v2470_v51 = vsub.f32 0.0, %v1958_v40  ;;  %6432 = vst [vmem:[#allocation24_spill] sm:$0xff] %v4347_v10  ;;  %v1527_v29 = vadd.f32 %v4080_v8, %v1459_v46  ;;  %v1460_v9 = vadd.f32 %v1428_v63, %v1392_v27 }
 0x10a   : > { %v1037_v48 = vsel %vm1014_vm2, %v6434_v25, %v6433_v12  ;;  %3660 = vrcp.f32 %v4330_v59  ;;  %v1177_v3 = vsel %vm1092_vm5, %v1151_v41, 0.0  ;;  %v1631_v32 = vmul.f32 %v4016_v14, %v1018_v39  ;;  %v3657_v10 = vpop.eup %3656 }
 0x10b   : > { %v4358_v44 = vadd.f32 1.0, %v1990_v22  ;;  %v1595_v0 = vadd.f32 %v1563_v15, %v1527_v29  ;;  %v1063_v12 = vsel %vm976_vm3, %v1037_v48, 0.0  ;;  %v1097_v54 = vrot.slane %v4091_v11, 1 }
 0x10c   : > { %v1115_v8 = vrot.slane %v4076_v4, 1  ;;  %v2502_v25 = vmul.f32 %v2470_v51, %v1958_v40  ;;  %v4369_v27 = vmul.f32 %v4014_v13, %v4316_v33  ;;  %v1699_v63 = vmul.f32 %v4020_v19, %v4063_v57 }
 0x10d   : > { %v1528_v61 = vadd.f32 %v4120_v26, %v1460_v9  ;;  %v2534_v34 = vmul.f32 1.442695, %v2501_v23  ;;  %3662 = vrcp.f32 %v4358_v44  ;;  %v1663_v15 = vadd.f32 %v1631_v32, %v1595_v0 }
 0x10e   : > { %6435 = vst [vmem:[#allocation25_spill] sm:$0xff] %v4369_v27  ;;  %v1327_v48 = vadd.f32 %v4096_v16, %v1259_v58  ;;  %v2084_v41 = vmul.f32 %v3657_v10, %v4260_v35  ;;  %v1363_v46 = vmul.f32 %v4003_v5, %v1177_v3  ;;  %v1632_v22 = vmul.f32 %v4016_v14, %v1063_v12  ;;  %v613_v35 = vpop.f32.mrf.mxu0 }
 0x10f   : > { %v1596_v40 = vadd.f32 %v1564_v2, %v1528_v61  ;;  %v1731_v51 = vadd.f32 %v1699_v63, %v1663_v15  ;;  %v1767_v29 = vmul.f32 %v4040_v36, %v1177_v3  ;;  %v1429_v57 = vmul.f32 %v4005_v6, %v1018_v39 }
 0x110   : > { %v1134_v26 = vsel %vm1129_vm4, %v1097_v54, %v1115_v8  ;;  %v4383_v23 = vadd.f32 %v1362_v55, %v1326_v56  ;;  %v2536_v0 = vmul.f32 1.442695, %v2502_v25  ;;  %v1700_v16 = vmul.f32 %v4020_v19, %v4091_v11 }
 0x111   : > { %v1664_v9 = vadd.f32 %v1632_v22, %v1596_v40  ;;  %v4387_v58 = vpop.eup %3658  ;;  %3664 = vpow2.f32 %v2534_v34  ;;  %v1565_v2 = vmul.f32 %v4018_v18, %v1177_v3  ;;  %v4390_v32 = vadd.f32 %v1767_v29, %v1731_v51 }
 0x112   : > { %6436 = vst [vmem:[#allocation26_spill] sm:$0xff] %v4387_v58  ;;  %v4392_v63 = vadd.f32 %v1363_v46, %v1327_v48  ;;  %v2116_v39 = vsub.f32 2.0, %v2084_v41  ;;  %v1768_v55 = vmul.f32 %v4040_v36, %v1134_v26  ;;  %v1222_v56 = vmul.f32 %v3968_v50, %v1063_v12 }
 0x113   : > { %6437 = vst [vmem:[#allocation27_spill] sm:$0xff] %v4390_v32  ;;  %v1732_v61 = vadd.f32 %v1700_v16, %v1664_v9  ;;  %2794 = vrot.lane.b32.xlu1 %v4390_v32, %s3812_s21  ;;  %v4399_v25 = vmul.f32 0.70710677, %v4390_v32  ;;  %v1364_v34 = vmul.f32 %v4003_v5, %v1134_v26  ;;  %v4403_v3 = vadd.f32 %v3973_v52, %v613_v35  ;;  %v3554_v9 = vpop.f32.mrf.mxu0 }
 0x114   : > { %v1461_v15 = vadd.f32 %v1429_v57, %v4320_v30  ;;  %3666 = vpow2.f32 %v2536_v0  ;;  %v4407_v48 = vmul.f32 %v4018_v18, %v1134_v26  ;;  %v6440_v46 = vrot.slane %v4076_v4, 7 }
 0x115   : > { %6438 = vst [vmem:[#allocation28_spill] sm:$0xff] %v4399_v25  ;;  %v4409_v41 = vadd.f32 %v1768_v55, %v1732_v61  ;;  %v6441_v40 = vrot.slane %v4091_v11, 7  ;;  %v1959_v51 = vand.u32 2147483647, %v4399_v25  ;;  %v1430_v29 = vmul.f32 %v4005_v6, %v1063_v12 }
 0x116   : > { %v1152_v30 = vsel %vm1129_vm4, %v1115_v8, %v1097_v54  ;;  %v1529_v57 = vadd.f32 %v4106_v21, %v1461_v15  ;;  %v4424_v26 = vmul.f32 %v3657_v10, %v2116_v39  ;;  %v1260_v11 = vadd.f32 %v3989_v60, %v1222_v56 }
 0x117   : > { %6439 = vst [vmem:[#allocation29_spill] sm:$0xff] %v4409_v41  ;;  %v4417_v22 = vsel %vm1014_vm2, %v6441_v40, %v6440_v46  ;;  %2796 = vrot.lane.b32.xlu0 %v4409_v41, %s3812_s21  ;;  %v4430_v0 = vmul.f32 0.70710677, %v4409_v41  ;;  %v4433_v16 = vadd.f32 %v3554_v9, %v3973_v52  ;;  %v3661_v12 = vpop.eup %3660  ;;  %v1991_v35 = vmul.f32 0.3275911, %v1959_v51 }
 0x118   : > { %6442 = vst [vmem:[#allocation30_spill] sm:$0xff] %v4424_v26  ;;  %v1597_v54 = vadd.f32 %v1565_v2, %v1529_v57  ;;  %v1633_v21 = vmul.f32 %v4016_v14, %v4417_v22  ;;  %v2471_v10 = vsub.f32 0.0, %v1959_v51  ;;  %v4441_v39 = vmul.f32 %v3995_v1, %v4403_v3 }
 0x119   : > { %6443 = vst [vmem:[#allocation31_spill] sm:$0xff] %v4430_v0  ;;  %v1960_v8 = vand.u32 2147483647, %v4430_v0  ;;  %v1179_v55 = vsel %vm1092_vm5, %v1152_v30, 0.0  ;;  %v4447_v56 = vmul.f32 %v4014_v13, %v4403_v3  ;;  %v1701_v2 = vmul.f32 %v4020_v19, %v4076_v4 }
 0x11a   : > { %v1665_v15 = vadd.f32 %v1633_v21, %v1597_v54  ;;  %v1223_v46 = vmul.f32 %v3968_v50, %v4417_v22  ;;  %v3663_v40 = vpop.eup %3662  ;;  %v2085_v9 = vmul.f32 %v3661_v12, %v4330_v59  ;;  %v1328_v57 = vadd.f32 %v4141_v43, %v1260_v11 }
 0x11b   : > { %v1992_v61 = vmul.f32 0.3275911, %v1960_v8  ;;  %v2472_v0 = vsub.f32 0.0, %v1960_v8  ;;  %v4455_v41 = vadd.f32 1.0, %v1991_v35  ;;  %v1769_v32 = vmul.f32 %v4040_v36, %v1179_v55 }
 0x11c   : > { %v1733_v30 = vadd.f32 %v1701_v2, %v1665_v15  ;;  %v6444_v54 = vrot.slane %v4124_v28, 7  ;;  %v6445_v21 = vrot.slane %v4114_v24, 7  ;;  %v2503_v25 = vmul.f32 %v2471_v10, %v1959_v51 }
 0x11d   : > { %v4464_v58 = vadd.f32 1.0, %v1992_v61  ;;  %v4469_v43 = vmul.f32 %v3995_v1, %v4433_v16  ;;  %v2086_v11 = vmul.f32 %v3663_v40, %v4358_v44  ;;  %v2504_v35 = vmul.f32 %v2472_v0, %v1960_v8 }
 0x11e   : > { %v1038_v4 = vsel %vm1014_vm2, %v6445_v21, %v6444_v54  ;;  %v4472_v15 = vadd.f32 %v1769_v32, %v1733_v30  ;;  %v1261_v2 = vadd.f32 %v3989_v60, %v1223_v46  ;;  %v4475_v26 = vpop.eup %3664  ;;  %v2117_v27 = vsub.f32 2.0, %v2085_v9 }
 0x11f   : > { %6447 = vst [vmem:[#allocation33_spill] sm:$0xff] %v4475_v26  ;;  %v4479_v51 = vmul.f32 %v4014_v13, %v4433_v16  ;;  %v1065_v61 = vsel %vm976_vm3, %v1038_v4, 0.0  ;;  %v1462_v10 = vadd.f32 %v1430_v29, %v4383_v23  ;;  %3668 = vrcp.f32 %v4455_v41 }
 0x120   : > { %6446 = vst [vmem:[#allocation32_spill] sm:$0xff] %v4472_v15  ;;  %2798 = vrot.lane.b32.xlu1 %v4472_v15, %s3812_s21  ;;  %v4488_v44 = vmul.f32 0.70710677, %v4472_v15  ;;  %v1098_v32 = vrot.slane %v4124_v28, 1  ;;  %v1116_v0 = vrot.slane %v4114_v24, 1  ;;  %v1396_v46 = vadd.f32 %v1364_v34, %v1328_v57  ;;  %v623_v34 = vpop.f32.mrf.mxu0 }
 0x121   : > { %v2538_v8 = vmul.f32 1.442695, %v2503_v25  ;;  %3670 = vrcp.f32 %v4464_v58  ;;  %v1530_v9 = vadd.f32 %v4146_v45, %v1462_v10  ;;  %v4494_v30 = vpop.eup %3666  ;;  %v2118_v23 = vsub.f32 2.0, %v2086_v11 }
 0x122   : > { %6448 = vst [vmem:[#allocation34_spill] sm:$0xff] %v4488_v44  ;;  %6449 = vst [vmem:[#allocation35_spill] sm:$0xff] %v4494_v30  ;;  %v2540_v29 = vmul.f32 1.442695, %v2504_v35  ;;  %v1329_v54 = vadd.f32 %v4128_v31, %v1261_v2  ;;  %v1961_v21 = vand.u32 2147483647, %v4488_v44  ;;  %v1365_v4 = vmul.f32 %v4003_v5, %v1179_v55  ;;  %v3557_v30 = vpop.f32.mrf.mxu0 }
 0x123   : > { %v1567_v59 = vmul.f32 %v4018_v18, %v1179_v55  ;;  %v1598_v15 = vadd.f32 %v4407_v48, %v1530_v9  ;;  %v1634_v25 = vmul.f32 %v4016_v14, %v1065_v61  ;;  %v4502_v57 = vmul.f32 %v3661_v12, %v2117_v27 }
 0x124   : > { %v1993_v45 = vmul.f32 0.3275911, %v1961_v21  ;;  %v1135_v11 = vsel %vm1129_vm4, %v1098_v32, %v1116_v0  ;;  %v1224_v35 = vmul.f32 %v3968_v50, %v1065_v61  ;;  %3672 = vpow2.f32 %v2538_v8 }
 0x125   : > { %6450 = vst [vmem:[#allocation36_spill] sm:$0xff] %v4502_v57  ;;  %v1431_v31 = vmul.f32 %v4005_v6, %v4417_v22  ;;  %v1666_v2 = vadd.f32 %v1634_v25, %v1598_v15  ;;  %v1702_v55 = vmul.f32 %v4020_v19, %v4124_v28  ;;  %v4511_v48 = vmul.f32 %v3663_v40, %v2118_v23 }
 0x126   : > { %3674 = vpow2.f32 %v2540_v29  ;;  %v4513_v10 = vadd.f32 %v1365_v4, %v1329_v54  ;;  %v4516_v27 = vadd.f32 %v3973_v52, %v623_v34  ;;  %v4518_v12 = vadd.f32 1.0, %v1993_v45 }
 0x127   : > { %6451 = vst [vmem:[#allocation37_spill] sm:$0xff] %v4511_v48  ;;  %v2473_v9 = vsub.f32 0.0, %v1961_v21  ;;  %v1734_v44 = vadd.f32 %v1702_v55, %v1666_v2  ;;  %v1770_v8 = vmul.f32 %v4040_v36, %v1135_v11  ;;  %v1366_v22 = vmul.f32 %v4003_v5, %v1135_v11 }
 0x128   : > { %v1568_v15 = vmul.f32 %v4018_v18, %v1135_v11  ;;  %v1262_v40 = vadd.f32 %v3989_v60, %v1224_v35  ;;  %v4525_v23 = vadd.f32 %v3557_v30, %v3973_v52  ;;  %v1432_v54 = vmul.f32 %v4005_v6, %v1065_v61 }
 0x129   : > { %v4527_v29 = vadd.f32 %v1770_v8, %v1734_v44  ;;  %v1153_v4 = vsel %vm1129_vm4, %v1116_v0, %v1098_v32  ;;  %v1463_v25 = vadd.f32 %v1431_v31, %v4392_v63  ;;  %v4536_v45 = vmul.f32 %v3995_v1, %v4516_v27 }
 0x12a   : > { %v4540_v11 = vmul.f32 %v4014_v13, %v4516_v27  ;;  %v6453_v44 = vrot.slane %v4114_v24, 7  ;;  %v6454_v30 = vrot.slane %v4124_v28, 7  ;;  %3676 = vrcp.f32 %v4518_v12 }
 0x12b   : > { %6452 = vst [vmem:[#allocation38_spill] sm:$0xff] %v4527_v29  ;;  %v2505_v63 = vmul.f32 %v2473_v9, %v1961_v21  ;;  %2800 = vrot.lane.b32.xlu0 %v4527_v29, %s3812_s21  ;;  %v4552_v32 = vmul.f32 0.70710677, %v4527_v29  ;;  %v1531_v0 = vadd.f32 %v4136_v37, %v1463_v25  ;;  %v1330_v35 = vadd.f32 %v4164_v7, %v1262_v40 }
 0x12c   : > { %v1020_v61 = vsel %vm1014_vm2, %v6454_v30, %v6453_v44  ;;  %v1181_v28 = vsel %vm1092_vm5, %v1153_v4, 0.0  ;;  %v6456_v2 = vrot.slane %v4171_v17, 7  ;;  %v6457_v55 = vrot.slane %v4154_v49, 7  ;;  %v3669_v9 = vpop.eup %3668 }
 0x12d   : > { %6455 = vst [vmem:[#allocation39_spill] sm:$0xff] %v4552_v32  ;;  %v1962_v8 = vand.u32 2147483647, %v4552_v32  ;;  %v1599_v44 = vadd.f32 %v1567_v59, %v1531_v0  ;;  %v1635_v37 = vmul.f32 %v4016_v14, %v1020_v61  ;;  %v1225_v7 = vmul.f32 %v3968_v50, %v1020_v61 }
 0x12e   : > { %v1039_v21 = vsel %vm1014_vm2, %v6457_v55, %v6456_v2  ;;  %v3671_v40 = vpop.eup %3670  ;;  %v1703_v25 = vmul.f32 %v4020_v19, %v4114_v24  ;;  %v1464_v31 = vadd.f32 %v1432_v54, %v1396_v46  ;;  %v2087_v59 = vmul.f32 %v3669_v9, %v4455_v41 }
 0x12f   : > { %v1994_v34 = vmul.f32 0.3275911, %v1962_v8  ;;  %v2474_v29 = vsub.f32 0.0, %v1962_v8  ;;  %v1667_v2 = vadd.f32 %v1635_v37, %v1599_v44  ;;  %v1067_v55 = vsel %vm976_vm3, %v1039_v21, 0.0 }
 0x130   : > { %v4577_v0 = vmul.f32 %v3995_v1, %v4525_v23  ;;  %v1771_v32 = vmul.f32 %v4040_v36, %v1181_v28  ;;  %v1532_v24 = vadd.f32 %v4168_v20, %v1464_v31  ;;  %v2088_v4 = vmul.f32 %v3671_v40, %v4464_v58 }
 0x131   : > { %v4582_v30 = vadd.f32 1.0, %v1994_v34  ;;  %v1735_v46 = vadd.f32 %v1703_v25, %v1667_v2  ;;  %v1263_v54 = vadd.f32 %v3989_v60, %v1225_v7  ;;  %v4585_v44 = vpop.eup %3672  ;;  %v2506_v21 = vmul.f32 %v2474_v29, %v1962_v8 }
 0x132   : > { %6458 = vst [vmem:[#allocation40_spill] sm:$0xff] %v4577_v0  ;;  %6459 = vst [vmem:[#allocation41_spill] sm:$0xff] %v4585_v44  ;;  %v4589_v41 = vmul.f32 %v4014_v13, %v4525_v23  ;;  %v1600_v37 = vadd.f32 %v1568_v15, %v1532_v24  ;;  %v1636_v26 = vmul.f32 %v4016_v14, %v1067_v55  ;;  %v2542_v20 = vmul.f32 1.442695, %v2505_v63 }
 0x133   : > { %v4592_v48 = vpop.eup %3674  ;;  %v4594_v31 = vadd.f32 %v1366_v22, %v1330_v35  ;;  %v4596_v58 = vadd.f32 %v1771_v32, %v1735_v46  ;;  %v6463_v34 = vrot.slane %v4154_v49, 1  ;;  %v6464_v7 = vrot.slane %v4171_v17, 1  ;;  %v6465_v22 = vld [vmem:[#allocation3_spill] sm:$0xff]  ;;  %v633_v35 = vpop.f32.mrf.mxu0 }
 0x134   : > { %6460 = vst [vmem:[#allocation42_spill] sm:$0xff] %v4589_v41  ;;  %6461 = vst [vmem:[#allocation43_spill] sm:$0xff] %v4592_v48  ;;  %v2119_v8 = vsub.f32 2.0, %v2087_v59  ;;  %v1367_v25 = vmul.f32 %v4003_v5, %v1181_v28  ;;  %v1668_v15 = vadd.f32 %v1636_v26, %v1600_v37  ;;  %v1704_v2 = vmul.f32 %v4020_v19, %v4171_v17 }
 0x135   : > { %6462 = vst [vmem:[#allocation44_spill] sm:$0xff] %v4596_v58  ;;  %v1136_v29 = vsel %vm1129_vm4, %v6464_v7, %v6463_v34  ;;  %v2120_v24 = vsub.f32 2.0, %v2088_v4  ;;  %3678 = vrcp.f32 %v4582_v30  ;;  %2802 = vrot.lane.b32.xlu1 %v4596_v58, %s3812_s21  ;;  %v1331_v63 = vadd.f32 %v6465_v22, %v1263_v54 }
 0x136   : > { %v4612_v32 = vmul.f32 0.70710677, %v4596_v58  ;;  %v2544_v46 = vmul.f32 1.442695, %v2506_v21  ;;  %v1569_v59 = vmul.f32 %v4018_v18, %v1181_v28  ;;  %v1736_v34 = vadd.f32 %v1704_v2, %v1668_v15 }
 0x137   : > { %v1772_v26 = vmul.f32 %v4040_v36, %v1136_v29  ;;  %3680 = vpow2.f32 %v2542_v20  ;;  %v1433_v4 = vmul.f32 %v4005_v6, %v1020_v61  ;;  %v1226_v7 = vmul.f32 %v3968_v50, %v1067_v55  ;;  %v4619_v48 = vpop.eup %3676 }
 0x138   : > { %6466 = vst [vmem:[#allocation3_spill] sm:$0xff] %v4612_v32  ;;  %v1963_v37 = vand.u32 2147483647, %v4612_v32  ;;  %v4621_v54 = vmul.f32 %v3669_v9, %v2119_v8  ;;  %v4624_v22 = vmul.f32 %v4003_v5, %v1136_v29  ;;  %v4629_v28 = vadd.f32 %v3973_v52, %v633_v35  ;;  %v3560_v32 = vpop.f32.mrf.mxu0 }
 0x139   : > { %v4626_v21 = vadd.f32 %v1772_v26, %v1736_v34  ;;  %v4631_v15 = vmul.f32 %v3671_v40, %v2120_v24  ;;  %v4633_v20 = vadd.f32 %v1367_v25, %v1331_v63  ;;  %v1570_v2 = vmul.f32 %v4018_v18, %v1136_v29 }
 0x13a   : > { %6467 = vst [vmem:[#allocation45_spill] sm:$0xff] %v4621_v54  ;;  %v1995_v61 = vmul.f32 0.3275911, %v1963_v37  ;;  %3682 = vpow2.f32 %v2544_v46  ;;  %v1434_v9 = vmul.f32 %v4005_v6, %v1067_v55  ;;  %v4643_v35 = vadd.f32 %v3560_v32, %v3973_v52 }
 0x13b   : > { %6468 = vst [vmem:[#allocation46_spill] sm:$0xff] %v4626_v21  ;;  %6469 = vst [vmem:[#allocation47_spill] sm:$0xff] %v4631_v15  ;;  %2804 = vrot.lane.b32.xlu0 %v4626_v21, %s3812_s21  ;;  %v4640_v8 = vmul.f32 0.70710677, %v4626_v21  ;;  %v2089_v40 = vmul.f32 %v4619_v48, %v4518_v12  ;;  %v1264_v25 = vadd.f32 %v3989_v60, %v1226_v7  ;;  %v6471_v29 = vrot.slane %v4154_v49, 7 }
 0x13c   : > { %v6472_v24 = vrot.slane %v4171_v17, 7  ;;  %v1465_v55 = vadd.f32 %v1433_v4, %v4513_v10  ;;  %v2475_v46 = vsub.f32 0.0, %v1963_v37  ;;  %v4659_v32 = vmul.f32 %v3995_v1, %v4629_v28  ;;  %v6477_v4 = vld [vmem:[#allocation4_spill] sm:$0xff] }
 0x13d   : > { %6470 = vst [vmem:[#allocation48_spill] sm:$0xff] %v4640_v8  ;;  %v1964_v34 = vand.u32 2147483647, %v4640_v8  ;;  %v4661_v12 = vadd.f32 1.0, %v1995_v61  ;;  %v4665_v26 = vmul.f32 %v4014_v13, %v4629_v28  ;;  %v6475_v7 = vrot.slane %v4171_v17, 1  ;;  %v6479_v17 = vld [vmem:[#allocation5_spill] sm:$0xff] }
 0x13e   : > { %v1021_v63 = vsel %vm1014_vm2, %v6472_v24, %v6471_v29  ;;  %6473 = vst [vmem:[#allocation49_spill] sm:$0xff] %v4659_v32  ;;  %v6476_v29 = vrot.slane %v4154_v49, 1  ;;  %v1533_v24 = vadd.f32 %v6477_v4, %v1465_v55  ;;  %v2121_v58 = vsub.f32 2.0, %v2089_v40 }
 0x13f   : > { %6474 = vst [vmem:[#allocation50_spill] sm:$0xff] %v4665_v26  ;;  %v1996_v52 = vmul.f32 0.3275911, %v1964_v34  ;;  %v2476_v21 = vsub.f32 0.0, %v1964_v34  ;;  %v1227_v61 = vmul.f32 %v3968_v50, %v1021_v63  ;;  %v1637_v15 = vmul.f32 %v4016_v14, %v1021_v63  ;;  %v6482_v26 = vld [vmem:[#allocation9_spill] sm:$0xff] }
 0x140   : > { %v1154_v10 = vsel %vm1129_vm4, %v6476_v29, %v6475_v7  ;;  %v1601_v44 = vadd.f32 %v1569_v59, %v1533_v24  ;;  %v6478_v54 = vrot.slane %v4233_v62, 7  ;;  %v6480_v57 = vrot.slane %v6479_v17, 7 }
 0x141   : > { %v2507_v7 = vmul.f32 %v2475_v46, %v1963_v37  ;;  %v4683_v29 = vadd.f32 1.0, %v1996_v52  ;;  %v1183_v55 = vsel %vm1092_vm5, %v1154_v10, 0.0  ;;  %v1705_v4 = vmul.f32 %v4020_v19, %v4154_v49  ;;  %v6481_v46 = vld [vmem:[#allocation8_spill] sm:$0xff] }
 0x142   : > { %v1040_v41 = vsel %vm1014_vm2, %v6480_v57, %v6478_v54  ;;  %3684 = vrcp.f32 %v4661_v12  ;;  %v1669_v59 = vadd.f32 %v1637_v15, %v1601_v44  ;;  %v1100_v40 = vrot.slane %v4233_v62, 1  ;;  %v3679_v8 = vpop.eup %3678 }
 0x143   : > { %v1466_v24 = vadd.f32 %v1434_v9, %v4594_v31  ;;  %v2508_v0 = vmul.f32 %v2476_v21, %v1964_v34  ;;  %v1265_v57 = vadd.f32 %v3989_v60, %v1227_v61  ;;  %v1069_v37 = vsel %vm976_vm3, %v1040_v41, 0.0 }
 0x144   : > { %v1118_v54 = vrot.slane %v6479_v17, 1  ;;  %v1332_v52 = vadd.f32 %v6481_v46, %v1264_v25  ;;  %v1737_v10 = vadd.f32 %v1705_v4, %v1669_v59  ;;  %v1773_v49 = vmul.f32 %v4040_v36, %v1183_v55  ;;  %v4699_v15 = vpop.eup %3680 }
 0x145   : > { %v1534_v44 = vadd.f32 %v6482_v26, %v1466_v24  ;;  %6483 = vst [vmem:[#allocation4_spill] sm:$0xff] %v4699_v15  ;;  %v2546_v32 = vmul.f32 1.442695, %v2507_v7  ;;  %3686 = vrcp.f32 %v4683_v29  ;;  %v4704_v60 = vmul.f32 %v3995_v1, %v4643_v35  ;;  %v6487_v26 = vld [vmem:[#allocation6_spill] sm:$0xff] }
 0x146   : > { %v4708_v41 = vmul.f32 %v4014_v13, %v4643_v35  ;;  %v2090_v31 = vmul.f32 %v3679_v8, %v4582_v30  ;;  %v4711_v21 = vadd.f32 %v1773_v49, %v1737_v10  ;;  %v1638_v25 = vmul.f32 %v4016_v14, %v1069_v37  ;;  %v643_v10 = vpop.f32.mrf.mxu0 }
 0x147   : > { %6484 = vst [vmem:[#allocation5_spill] sm:$0xff] %v4704_v60  ;;  %v1602_v9 = vadd.f32 %v1570_v2, %v1534_v44  ;;  %v2548_v34 = vmul.f32 1.442695, %v2508_v0  ;;  %v1333_v61 = vadd.f32 %v6487_v26, %v1265_v57  ;;  %v1435_v7 = vmul.f32 %v4005_v6, %v1021_v63  ;;  %v4718_v59 = vpop.eup %3682 }
 0x148   : > { %6485 = vst [vmem:[#allocation8_spill] sm:$0xff] %v4708_v41  ;;  %6486 = vst [vmem:[#allocation9_spill] sm:$0xff] %v4711_v21  ;;  %v1137_v4 = vsel %vm1129_vm4, %v1100_v40, %v1118_v54  ;;  %v4721_v24 = vmul.f32 %v4619_v48, %v2121_v58  ;;  %2806 = vrot.lane.b32.xlu1 %v4711_v21, %s3812_s21  ;;  %v4726_v30 = vmul.f32 0.70710677, %v4711_v21  ;;  %3688 = vpow2.f32 %v2546_v32 }
 0x149   : > { %6488 = vst [vmem:[#allocation6_spill] sm:$0xff] %v4718_v59  ;;  %v1670_v2 = vadd.f32 %v1638_v25, %v1602_v9  ;;  %v1706_v0 = vmul.f32 %v4020_v19, %v4233_v62  ;;  %v1400_v63 = vadd.f32 %v4624_v22, %v1332_v52  ;;  %v1369_v57 = vmul.f32 %v4003_v5, %v1183_v55 }
 0x14a   : > { %6489 = vst [vmem:[#allocation51_spill] sm:$0xff] %v4721_v24  ;;  %6490 = vst [vmem:[#allocation52_spill] sm:$0xff] %v4726_v30  ;;  %v1571_v46 = vmul.f32 %v4018_v18, %v1183_v55  ;;  %v2122_v48 = vsub.f32 2.0, %v2090_v31  ;;  %v1965_v58 = vand.u32 2147483647, %v4726_v30  ;;  %v1774_v44 = vmul.f32 %v4040_v36, %v1137_v4 }
 0x14b   : > { %v1738_v49 = vadd.f32 %v1706_v0, %v1670_v2  ;;  %3690 = vpow2.f32 %v2548_v34  ;;  %v4735_v26 = vadd.f32 %v1369_v57, %v1333_v61  ;;  %v1228_v9 = vmul.f32 %v3968_v50, %v1069_v37  ;;  %v4744_v55 = vld [vmem:[%s6293_s2] ss:$0 sm:$0xff]  ;;  %v3563_v2 = vpop.f32.mrf.mxu0  ;;  %v6494_v57 = vld [vmem:[#allocation7_spill] sm:$0xff] }
 0x14c   : > { %v1467_v32 = vadd.f32 %v1435_v7, %v4633_v20  ;;  %v1997_v25 = vmul.f32 0.3275911, %v1965_v58  ;;  %v4747_v52 = vadd.f32 %v4744_v55, %v643_v10  ;;  %v6492_v31 = vrot.slane %v6479_v17, 7 }
 0x14d   : > { %v4739_v22 = vadd.f32 %v1774_v44, %v1738_v49  ;;  %v6493_v34 = vrot.slane %v4233_v62, 7  ;;  %v1370_v20 = vmul.f32 %v4003_v5, %v1137_v4  ;;  %v1572_v7 = vmul.f32 %v4018_v18, %v1137_v4 }
 0x14e   : > { %v1155_v0 = vsel %vm1129_vm4, %v1118_v54, %v1100_v40  ;;  %v1535_v49 = vadd.f32 %v6494_v57, %v1467_v32  ;;  %v4762_v10 = vmul.f32 %v3679_v8, %v2122_v48  ;;  %v1436_v62 = vmul.f32 %v4005_v6, %v1069_v37  ;;  %v4778_v40 = vld [vmem:[%s6295_s4] ss:$0 sm:$0xff] }
 0x14f   : > { %6491 = vst [vmem:[#allocation53_spill] sm:$0xff] %v4739_v22  ;;  %v4755_v61 = vsel %vm1014_vm2, %v6493_v34, %v6492_v31  ;;  %2808 = vrot.lane.b32.xlu0 %v4739_v22, %s3812_s21  ;;  %v4768_v44 = vmul.f32 0.70710677, %v4739_v22  ;;  %v4771_v31 = vadd.f32 %v4744_v55, %v3563_v2  ;;  %v3685_v4 = vpop.eup %3684  ;;  %v4773_v34 = vadd.f32 1.0, %v1997_v25 }
 0x150   : > { %6495 = vst [vmem:[#allocation7_spill] sm:$0xff] %v4762_v10  ;;  %v1266_v8 = vadd.f32 %v4778_v40, %v1228_v9  ;;  %v1603_v54 = vadd.f32 %v1571_v46, %v1535_v49  ;;  %v1639_v37 = vmul.f32 %v4016_v14, %v4755_v61  ;;  %v2477_v48 = vsub.f32 0.0, %v1965_v58 }
 0x151   : > { %6496 = vst [vmem:[#allocation54_spill] sm:$0xff] %v4768_v44  ;;  %v1966_v32 = vand.u32 2147483647, %v4768_v44  ;;  %v1185_v25 = vsel %vm1092_vm5, %v1155_v0, 0.0  ;;  %v4789_v57 = vmul.f32 %v3995_v1, %v4747_v52  ;;  %v1707_v9 = vmul.f32 %v4020_v19, %v6479_v17 }
 0x152   : > { %v1671_v22 = vadd.f32 %v1639_v37, %v1603_v54  ;;  %v1229_v46 = vmul.f32 %v3968_v50, %v4755_v61  ;;  %v3687_v49 = vpop.eup %3686  ;;  %v2091_v21 = vmul.f32 %v3685_v4, %v4661_v12  ;;  %v4798_v2 = vmul.f32 %v4014_v13, %v4747_v52  ;;  %v6501_v12 = vld [vmem:[#allocation14_spill] sm:$0xff] }
 0x153   : > { %6497 = vst [vmem:[#allocation55_spill] sm:$0xff] %v4789_v57  ;;  %v1998_v44 = vmul.f32 0.3275911, %v1966_v32  ;;  %v2478_v30 = vsub.f32 0.0, %v1966_v32  ;;  %3692 = vrcp.f32 %v4773_v34  ;;  %v1775_v54 = vmul.f32 %v4040_v36, %v1185_v25 }
 0x154   : > { %6498 = vst [vmem:[#allocation56_spill] sm:$0xff] %v4798_v2  ;;  %v1739_v0 = vadd.f32 %v1707_v9, %v1671_v22  ;;  %v6499_v37 = vrot.slane %v4302_v42, 7  ;;  %v6500_v17 = vrot.slane %v4236_v47, 7  ;;  %v2509_v15 = vmul.f32 %v2477_v48, %v1965_v58 }
 0x155   : > { %v1334_v10 = vadd.f32 %v6501_v12, %v1266_v8  ;;  %v4809_v24 = vadd.f32 1.0, %v1998_v44  ;;  %v2092_v60 = vmul.f32 %v3687_v49, %v4683_v29  ;;  %v4815_v22 = vmul.f32 %v3995_v1, %v4771_v31  ;;  %v4820_v57 = vpop.eup %3688 }
 0x156   : > { %v1041_v59 = vsel %vm1014_vm2, %v6500_v17, %v6499_v37  ;;  %v4817_v9 = vadd.f32 %v1775_v54, %v1739_v0  ;;  %v1267_v2 = vadd.f32 %v4778_v40, %v1229_v46  ;;  %6504 = vst [vmem:[#allocation58_spill] sm:$0xff] %v4820_v57  ;;  %v2123_v37 = vsub.f32 2.0, %v2091_v21  ;;  %v6509_v17 = vld [vmem:[#allocation11_spill] sm:$0xff] }
 0x157   : > { %6502 = vst [vmem:[#allocation14_spill] sm:$0xff] %v4815_v22  ;;  %v2510_v58 = vmul.f32 %v2478_v30, %v1966_v32  ;;  %v1071_v44 = vsel %vm976_vm3, %v1041_v59, 0.0  ;;  %v1468_v8 = vadd.f32 %v1436_v62, %v1400_v63  ;;  %3694 = vrcp.f32 %v4809_v24  ;;  %v6508_v63 = vld [vmem:[#allocation15_spill] sm:$0xff] }
 0x158   : > { %6503 = vst [vmem:[#allocation57_spill] sm:$0xff] %v4817_v9  ;;  %2810 = vrot.lane.b32.xlu1 %v4817_v9, %s3812_s21  ;;  %v4828_v29 = vmul.f32 0.70710677, %v4817_v9  ;;  %v1101_v48 = vrot.slane %v4302_v42, 1  ;;  %v1119_v46 = vrot.slane %v4236_v47, 1  ;;  %v4832_v0 = vpop.eup %3690  ;;  %v1402_v30 = vadd.f32 %v1370_v20, %v1334_v10  ;;  %v653_v20 = vpop.f32.mrf.mxu0 }
 0x159   : > { %6506 = vst [vmem:[#allocation60_spill] sm:$0xff] %v4832_v0  ;;  %v2550_v21 = vmul.f32 1.442695, %v2509_v15  ;;  %v4836_v59 = vmul.f32 %v4014_v13, %v4771_v31  ;;  %v1536_v62 = vadd.f32 %v6508_v63, %v1468_v8  ;;  %v2124_v32 = vsub.f32 2.0, %v2092_v60 }
 0x15a   : > { %6505 = vst [vmem:[#allocation59_spill] sm:$0xff] %v4828_v29  ;;  %v1371_v54 = vmul.f32 %v4003_v5, %v1185_v25  ;;  %v1335_v12 = vadd.f32 %v6509_v17, %v1267_v2  ;;  %v1967_v41 = vand.u32 2147483647, %v4828_v29  ;;  %v2552_v9 = vmul.f32 1.442695, %v2510_v58 }
 0x15b   : > { %6507 = vst [vmem:[#allocation61_spill] sm:$0xff] %v4836_v59  ;;  %v1573_v57 = vmul.f32 %v4018_v18, %v1185_v25  ;;  %v1604_v22 = vadd.f32 %v1572_v7, %v1536_v62  ;;  %v1640_v15 = vmul.f32 %v4016_v14, %v1071_v44  ;;  %v4844_v10 = vmul.f32 %v3685_v4, %v2123_v37 }
 0x15c   : > { %v1999_v0 = vmul.f32 0.3275911, %v1967_v41  ;;  %v1138_v8 = vsel %vm1129_vm4, %v1101_v48, %v1119_v46  ;;  %v1230_v60 = vmul.f32 %v3968_v50, %v1071_v44  ;;  %3696 = vpow2.f32 %v2550_v21 }
 0x15d   : > { %6510 = vst [vmem:[#allocation15_spill] sm:$0xff] %v4844_v10  ;;  %v1437_v2 = vmul.f32 %v4005_v6, %v4755_v61  ;;  %v1672_v63 = vadd.f32 %v1640_v15, %v1604_v22  ;;  %v1708_v25 = vmul.f32 %v4020_v19, %v4302_v42  ;;  %v4853_v7 = vmul.f32 %v3687_v49, %v2124_v32  ;;  %v3566_v32 = vpop.f32.mrf.mxu0 }
 0x15e   : > { %v4855_v58 = vadd.f32 %v1371_v54, %v1335_v12  ;;  %v4857_v4 = vadd.f32 1.0, %v1999_v0  ;;  %v4860_v37 = vadd.f32 %v4744_v55, %v653_v20  ;;  %3698 = vpow2.f32 %v2552_v9 }
 0x15f   : > { %6511 = vst [vmem:[#allocation11_spill] sm:$0xff] %v4853_v7  ;;  %v2479_v62 = vsub.f32 0.0, %v1967_v41  ;;  %v1740_v17 = vadd.f32 %v1708_v25, %v1672_v63  ;;  %v1776_v21 = vmul.f32 %v4040_v36, %v1138_v8  ;;  %v1372_v61 = vmul.f32 %v4003_v5, %v1138_v8 }
 0x160   : > { %v1574_v22 = vmul.f32 %v4018_v18, %v1138_v8  ;;  %v1268_v15 = vadd.f32 %v4778_v40, %v1230_v60  ;;  %v1438_v49 = vmul.f32 %v4005_v6, %v1071_v44  ;;  %v4867_v54 = vpop.eup %3692  ;;  %v4872_v12 = vadd.f32 %v4744_v55, %v3566_v32 }
 0x161   : > { %v4869_v0 = vadd.f32 %v1776_v21, %v1740_v17  ;;  %v1156_v9 = vsel %vm1129_vm4, %v1119_v46, %v1101_v48  ;;  %v1469_v20 = vadd.f32 %v1437_v2, %v4735_v26  ;;  %3700 = vrcp.f32 %v4857_v4  ;;  %v6517_v46 = vld [vmem:[#allocation12_spill] sm:$0xff] }
 0x162   : > { %v4881_v44 = vmul.f32 %v3995_v1, %v4860_v37  ;;  %v6513_v60 = vrot.slane %v4236_v47, 7  ;;  %v6514_v63 = vrot.slane %v4302_v42, 7  ;;  %v2511_v17 = vmul.f32 %v2479_v62, %v1967_v41  ;;  %v6518_v42 = vld [vmem:[#allocation22_spill] sm:$0xff] }
 0x163   : > { %6512 = vst [vmem:[#allocation62_spill] sm:$0xff] %v4869_v0  ;;  %2812 = vrot.lane.b32.xlu0 %v4869_v0, %s3812_s21  ;;  %v4892_v26 = vmul.f32 0.70710677, %v4869_v0  ;;  %v4896_v48 = vmul.f32 %v4014_v13, %v4860_v37  ;;  %v1537_v2 = vadd.f32 %v6517_v46, %v1469_v20  ;;  %v2093_v21 = vmul.f32 %v4867_v54, %v4773_v34 }
 0x164   : > { %v1023_v25 = vsel %vm1014_vm2, %v6514_v63, %v6513_v60  ;;  %v1336_v32 = vadd.f32 %v6518_v42, %v1268_v15  ;;  %v1187_v41 = vsel %vm1092_vm5, %v1156_v9, 0.0  ;;  %v6519_v62 = vrot.slane %v4403_v3, 7  ;;  %v3695_v8 = vpop.eup %3694 }
 0x165   : > { %6515 = vst [vmem:[#allocation63_spill] sm:$0xff] %v4892_v26  ;;  %6516 = vst [vmem:[#allocation64_spill] sm:$0xff] %v4896_v48  ;;  %v6520_v60 = vrot.slane %v4316_v33, 7  ;;  %v1968_v0 = vand.u32 2147483647, %v4892_v26  ;;  %v1605_v29 = vadd.f32 %v1573_v57, %v1537_v2  ;;  %v1641_v20 = vmul.f32 %v4016_v14, %v1023_v25 }
 0x166   : > { %v1231_v34 = vmul.f32 %v3968_v50, %v1023_v25  ;;  %v1709_v15 = vmul.f32 %v4020_v19, %v4236_v47  ;;  %v1470_v42 = vadd.f32 %v1438_v49, %v1402_v30  ;;  %v2094_v57 = vmul.f32 %v3695_v8, %v4809_v24  ;;  %v6522_v47 = vld [vmem:[#allocation23_spill] sm:$0xff] }
 0x167   : > { %v1042_v63 = vsel %vm1014_vm2, %v6520_v60, %v6519_v62  ;;  %v2000_v7 = vmul.f32 0.3275911, %v1968_v0  ;;  %v2480_v10 = vsub.f32 0.0, %v1968_v0  ;;  %v1673_v62 = vadd.f32 %v1641_v20, %v1605_v29 }
 0x168   : > { %v1073_v9 = vsel %vm976_vm3, %v1042_v63, 0.0  ;;  %v4923_v26 = vmul.f32 %v3995_v1, %v4872_v12  ;;  %v1538_v59 = vadd.f32 %v6522_v47, %v1470_v42  ;;  %v1777_v30 = vmul.f32 %v4040_v36, %v1187_v41 }
 0x169   : > { %v4926_v48 = vadd.f32 1.0, %v2000_v7  ;;  %v1741_v63 = vadd.f32 %v1709_v15, %v1673_v62  ;;  %v1269_v49 = vadd.f32 %v4778_v40, %v1231_v34  ;;  %v4930_v29 = vpop.eup %3696  ;;  %v2554_v20 = vmul.f32 1.442695, %v2511_v17 }
 0x16a   : > { %6521 = vst [vmem:[#allocation12_spill] sm:$0xff] %v4923_v26  ;;  %6523 = vst [vmem:[#allocation22_spill] sm:$0xff] %v4930_v29  ;;  %v4934_v24 = vmul.f32 %v4014_v13, %v4872_v12  ;;  %v1606_v2 = vadd.f32 %v1574_v22, %v1538_v59  ;;  %v1642_v46 = vmul.f32 %v4016_v14, %v1073_v9  ;;  %v2125_v60 = vsub.f32 2.0, %v2093_v21 }
 0x16b   : > { %v2512_v26 = vmul.f32 %v2480_v10, %v1968_v0  ;;  %v4937_v42 = vadd.f32 %v1777_v30, %v1741_v63  ;;  %v6526_v7 = vrot.slane %v4316_v33, 1  ;;  %v6527_v15 = vrot.slane %v4403_v3, 1  ;;  %v4945_v62 = vpop.eup %3698  ;;  %v6529_v0 = vld [vmem:[#allocation17_spill] sm:$0xff]  ;;  %v663_v30 = vpop.f32.mrf.mxu0 }
 0x16c   : > { %6524 = vst [vmem:[#allocation23_spill] sm:$0xff] %v4934_v24  ;;  %6528 = vst [vmem:[#allocation66_spill] sm:$0xff] %v4945_v62  ;;  %v2126_v17 = vsub.f32 2.0, %v2094_v57  ;;  %3702 = vrcp.f32 %v4926_v48  ;;  %v1674_v47 = vadd.f32 %v1642_v46, %v1606_v2  ;;  %v1710_v59 = vmul.f32 %v4020_v19, %v4403_v3 }
 0x16d   : > { %6525 = vst [vmem:[#allocation65_spill] sm:$0xff] %v4937_v42  ;;  %v1139_v34 = vsel %vm1129_vm4, %v6527_v15, %v6526_v7  ;;  %v1404_v22 = vadd.f32 %v1372_v61, %v1336_v32  ;;  %v1373_v10 = vmul.f32 %v4003_v5, %v1187_v41  ;;  %2814 = vrot.lane.b32.xlu1 %v4937_v42, %s3812_s21  ;;  %v4955_v63 = vmul.f32 0.70710677, %v4937_v42  ;;  %v3569_v42 = vpop.f32.mrf.mxu0 }
 0x16e   : > { %v1337_v21 = vadd.f32 %v6529_v0, %v1269_v49  ;;  %3704 = vpow2.f32 %v2554_v20  ;;  %v1575_v57 = vmul.f32 %v4018_v18, %v1187_v41  ;;  %v1742_v7 = vadd.f32 %v1710_v59, %v1674_v47  ;;  %v4959_v2 = vpop.eup %3700 }
 0x16f   : > { %6530 = vst [vmem:[#allocation17_spill] sm:$0xff] %v4955_v63  ;;  %v1778_v46 = vmul.f32 %v4040_v36, %v1139_v34  ;;  %v2556_v61 = vmul.f32 1.442695, %v2512_v26  ;;  %v1439_v32 = vmul.f32 %v4005_v6, %v1023_v25  ;;  %v1969_v15 = vand.u32 2147483647, %v4955_v63 }
 0x170   : > { %v1232_v62 = vmul.f32 %v3968_v50, %v1073_v9  ;;  %v4965_v49 = vmul.f32 %v4867_v54, %v2125_v60  ;;  %v4967_v0 = vmul.f32 %v3695_v8, %v2126_v17  ;;  %v4972_v41 = vadd.f32 %v4744_v55, %v663_v30 }
 0x171   : > { %v4969_v20 = vadd.f32 %v1778_v46, %v1742_v7  ;;  %v4974_v47 = vadd.f32 %v1373_v10, %v1337_v21  ;;  %v2001_v59 = vmul.f32 0.3275911, %v1969_v15  ;;  %v1374_v26 = vmul.f32 %v4003_v5, %v1139_v34 }
 0x172   : > { %6531 = vst [vmem:[#allocation67_spill] sm:$0xff] %v4965_v49  ;;  %6532 = vst [vmem:[#allocation68_spill] sm:$0xff] %v4967_v0  ;;  %v1576_v25 = vmul.f32 %v4018_v18, %v1139_v34  ;;  %v2095_v63 = vmul.f32 %v4959_v2, %v4857_v4  ;;  %v1440_v54 = vmul.f32 %v4005_v6, %v1073_v9  ;;  %3706 = vpow2.f32 %v2556_v61 }
 0x173   : > { %6533 = vst [vmem:[#allocation69_spill] sm:$0xff] %v4969_v20  ;;  %2816 = vrot.lane.b32.xlu0 %v4969_v20, %s3812_s21  ;;  %v4984_v8 = vmul.f32 0.70710677, %v4969_v20  ;;  %v4987_v60 = vadd.f32 %v4744_v55, %v3569_v42  ;;  %v1270_v17 = vadd.f32 %v4778_v40, %v1232_v62  ;;  %v6535_v34 = vrot.slane %v4316_v33, 7 }
 0x174   : > { %v6536_v10 = vrot.slane %v4403_v3, 7  ;;  %v1471_v21 = vadd.f32 %v1439_v32, %v4855_v58  ;;  %v2481_v30 = vsub.f32 0.0, %v1969_v15  ;;  %v5001_v42 = vmul.f32 %v3995_v1, %v4972_v41  ;;  %v6540_v32 = vld [vmem:[#allocation18_spill] sm:$0xff] }
 0x175   : > { %6534 = vst [vmem:[#allocation70_spill] sm:$0xff] %v4984_v8  ;;  %v1970_v9 = vand.u32 2147483647, %v4984_v8  ;;  %v5003_v46 = vadd.f32 1.0, %v2001_v59  ;;  %v5007_v62 = vmul.f32 %v4014_v13, %v4972_v41  ;;  %v6538_v61 = vrot.slane %v4403_v3, 1 }
 0x176   : > { %v1024_v4 = vsel %vm1014_vm2, %v6536_v10, %v6535_v34  ;;  %6537 = vst [vmem:[#allocation71_spill] sm:$0xff] %v5001_v42  ;;  %v6539_v34 = vrot.slane %v4316_v33, 1  ;;  %v1539_v10 = vadd.f32 %v6540_v32, %v1471_v21  ;;  %v2127_v7 = vsub.f32 2.0, %v2095_v63 }
 0x177   : > { %v2002_v8 = vmul.f32 0.3275911, %v1970_v9  ;;  %v2482_v20 = vsub.f32 0.0, %v1970_v9  ;;  %v1338_v59 = vadd.f32 %v4441_v39, %v1270_v17  ;;  %v1643_v49 = vmul.f32 %v4016_v14, %v1024_v4 }
 0x178   : > { %v1157_v58 = vsel %vm1129_vm4, %v6539_v34, %v6538_v61  ;;  %v1607_v0 = vadd.f32 %v1575_v57, %v1539_v10  ;;  %v6541_v24 = vrot.slane %v4516_v27, 7  ;;  %v6542_v3 = vrot.slane %v4433_v16, 7 }
 0x179   : > { %v2513_v61 = vmul.f32 %v2481_v30, %v1969_v15  ;;  %v5025_v34 = vadd.f32 1.0, %v2002_v8  ;;  %v1189_v63 = vsel %vm1092_vm5, %v1157_v58, 0.0  ;;  %v1233_v21 = vmul.f32 %v3968_v50, %v1024_v4  ;;  %v3703_v32 = vpop.eup %3702 }
 0x17a   : > { %v1043_v42 = vsel %vm1014_vm2, %v6542_v3, %v6541_v24  ;;  %3708 = vrcp.f32 %v5003_v46  ;;  %v1675_v39 = vadd.f32 %v1643_v49, %v1607_v0  ;;  %v1711_v57 = vmul.f32 %v4020_v19, %v4316_v33 }
 0x17b   : > { %v1472_v17 = vadd.f32 %v1440_v54, %v1404_v22  ;;  %v2514_v10 = vmul.f32 %v2482_v20, %v1970_v9  ;;  %v1075_v24 = vsel %vm976_vm3, %v1043_v42, 0.0  ;;  %v1103_v15 = vrot.slane %v4516_v27, 1  ;;  %v5037_v30 = vpop.eup %3704 }
 0x17c   : > { %v1121_v8 = vrot.slane %v4433_v16, 1  ;;  %6543 = vst [vmem:[#allocation18_spill] sm:$0xff] %v5037_v30  ;;  %3710 = vrcp.f32 %v5025_v34  ;;  %v1743_v58 = vadd.f32 %v1711_v57, %v1675_v39  ;;  %v1779_v3 = vmul.f32 %v4040_v36, %v1189_v63 }
 0x17d   : > { %v1540_v49 = vadd.f32 %v4447_v56, %v1472_v17  ;;  %v2096_v33 = vmul.f32 %v3703_v32, %v4926_v48  ;;  %v2558_v22 = vmul.f32 1.442695, %v2513_v61  ;;  %v5045_v0 = vmul.f32 %v3995_v1, %v4987_v60 }
 0x17e   : > { %v1271_v20 = vadd.f32 %v4778_v40, %v1233_v21  ;;  %v5048_v54 = vadd.f32 %v1779_v3, %v1743_v58  ;;  %v1441_v9 = vmul.f32 %v4005_v6, %v1024_v4  ;;  %v1644_v39 = vmul.f32 %v4016_v14, %v1075_v24  ;;  %v6550_v58 = vld [vmem:[#allocation24_spill] sm:$0xff] }
 0x17f   : > { %6544 = vst [vmem:[#allocation72_spill] sm:$0xff] %v5045_v0  ;;  %v1608_v42 = vadd.f32 %v1576_v25, %v1540_v49  ;;  %v5053_v57 = vmul.f32 %v4959_v2, %v2127_v7  ;;  %v2560_v56 = vmul.f32 1.442695, %v2514_v10  ;;  %v5057_v48 = vmul.f32 %v4014_v13, %v4987_v60  ;;  %v5068_v7 = vpop.eup %3706  ;;  %v673_v49 = vpop.f32.mrf.mxu0 }
 0x180   : > { %6545 = vst [vmem:[#allocation73_spill] sm:$0xff] %v5048_v54  ;;  %v1140_v61 = vsel %vm1129_vm4, %v1103_v15, %v1121_v8  ;;  %v1406_v17 = vadd.f32 %v1374_v26, %v1338_v59  ;;  %2818 = vrot.lane.b32.xlu1 %v5048_v54, %s3812_s21  ;;  %v5064_v4 = vmul.f32 0.70710677, %v5048_v54  ;;  %v1712_v2 = vmul.f32 %v4020_v19, %v4516_v27 }
 0x181   : > { %6546 = vst [vmem:[#allocation74_spill] sm:$0xff] %v5053_v57  ;;  %6547 = vst [vmem:[#allocation75_spill] sm:$0xff] %v5057_v48  ;;  %v1676_v25 = vadd.f32 %v1644_v39, %v1608_v42  ;;  %v2128_v21 = vsub.f32 2.0, %v2096_v33  ;;  %3712 = vpow2.f32 %v2558_v22  ;;  %v1375_v10 = vmul.f32 %v4003_v5, %v1189_v63 }
 0x182   : > { %6548 = vst [vmem:[#allocation76_spill] sm:$0xff] %v5064_v4  ;;  %6549 = vst [vmem:[#allocation77_spill] sm:$0xff] %v5068_v7  ;;  %v1339_v3 = vadd.f32 %v6550_v58, %v1271_v20  ;;  %v1971_v26 = vand.u32 2147483647, %v5064_v4  ;;  %v1780_v29 = vmul.f32 %v4040_v36, %v1140_v61  ;;  %v1473_v54 = vadd.f32 %v1441_v9, %v4974_v47 }
 0x183   : > { %v1744_v59 = vadd.f32 %v1712_v2, %v1676_v25  ;;  %3714 = vpow2.f32 %v2560_v56  ;;  %v1577_v42 = vmul.f32 %v4018_v18, %v1189_v63  ;;  %v1234_v39 = vmul.f32 %v3968_v50, %v1075_v24 }
 0x184   : > { %v1158_v33 = vsel %vm1129_vm4, %v1121_v8, %v1103_v15  ;;  %v2003_v22 = vmul.f32 0.3275911, %v1971_v26  ;;  %v5082_v20 = vadd.f32 %v4744_v55, %v673_v49  ;;  %v6552_v25 = vrot.slane %v4433_v16, 7  ;;  %v6554_v15 = vld [vmem:[#allocation25_spill] sm:$0xff] }
 0x185   : > { %v5079_v7 = vadd.f32 %v1780_v29, %v1744_v59  ;;  %v6553_v2 = vrot.slane %v4516_v27, 7  ;;  %v5090_v9 = vadd.f32 %v1375_v10, %v1339_v3  ;;  %v1376_v63 = vmul.f32 %v4003_v5, %v1140_v61 }
 0x186   : > { %v1578_v56 = vmul.f32 %v4018_v18, %v1140_v61  ;;  %v1541_v8 = vadd.f32 %v6554_v15, %v1473_v54  ;;  %v5095_v29 = vmul.f32 %v3703_v32, %v2128_v21  ;;  %v1442_v58 = vmul.f32 %v4005_v6, %v1075_v24 }
 0x187   : > { %6551 = vst [vmem:[#allocation24_spill] sm:$0xff] %v5079_v7  ;;  %v1025_v47 = vsel %vm1014_vm2, %v6553_v2, %v6552_v25  ;;  %2820 = vrot.lane.b32.xlu0 %v5079_v7, %s3812_s21  ;;  %v5101_v27 = vmul.f32 0.70710677, %v5079_v7  ;;  %v1191_v10 = vsel %vm1092_vm5, %v1158_v33, 0.0  ;;  %v3709_v3 = vpop.eup %3708  ;;  %v5105_v49 = vadd.f32 1.0, %v2003_v22 }
 0x188   : > { %6555 = vst [vmem:[#allocation25_spill] sm:$0xff] %v5095_v29  ;;  %v2483_v59 = vsub.f32 0.0, %v1971_v26  ;;  %v1609_v61 = vadd.f32 %v1577_v42, %v1541_v8  ;;  %v1645_v54 = vmul.f32 %v4016_v14, %v1025_v47  ;;  %v1272_v32 = vadd.f32 %v4778_v40, %v1234_v39 }
 0x189   : > { %6556 = vst [vmem:[#allocation78_spill] sm:$0xff] %v5101_v27  ;;  %v1972_v21 = vand.u32 2147483647, %v5101_v27  ;;  %v1235_v24 = vmul.f32 %v3968_v50, %v1025_v47  ;;  %v3711_v2 = vpop.eup %3710  ;;  %v5114_v15 = vmul.f32 %v3995_v1, %v5082_v20  ;;  %v5118_v33 = vmul.f32 %v4014_v13, %v5082_v20 }
 0x18a   : > { %v1677_v42 = vadd.f32 %v1645_v54, %v1609_v61  ;;  %v1713_v22 = vmul.f32 %v4020_v19, %v4433_v16  ;;  %v2097_v39 = vmul.f32 %v3709_v3, %v5003_v46  ;;  %v1781_v25 = vmul.f32 %v4040_v36, %v1191_v10 }
 0x18b   : > { %v2004_v8 = vmul.f32 0.3275911, %v1972_v21  ;;  %v6557_v7 = vrot.slane %v4629_v28, 7  ;;  %v6558_v27 = vrot.slane %v4525_v23, 7  ;;  %3716 = vrcp.f32 %v5105_v49 }
 0x18c   : > { %v2515_v4 = vmul.f32 %v2483_v59, %v1971_v26  ;;  %v2484_v30 = vsub.f32 0.0, %v1972_v21  ;;  %v1745_v61 = vadd.f32 %v1713_v22, %v1677_v42  ;;  %v2098_v54 = vmul.f32 %v3711_v2, %v5025_v34  ;;  %v3572_v22 = vpop.f32.mrf.mxu0 }
 0x18d   : > { %v1044_v1 = vsel %vm1014_vm2, %v6558_v27, %v6557_v7  ;;  %v5132_v16 = vadd.f32 1.0, %v2004_v8  ;;  %v1273_v46 = vadd.f32 %v4778_v40, %v1235_v24  ;;  %v1474_v29 = vadd.f32 %v1442_v58, %v1406_v17 }
 0x18e   : > { %v5135_v57 = vadd.f32 %v1781_v25, %v1745_v61  ;;  %v1077_v48 = vsel %vm976_vm3, %v1044_v1, 0.0  ;;  %v1104_v0 = vrot.slane %v4629_v28, 1  ;;  %v1122_v7 = vrot.slane %v4525_v23, 1  ;;  %v5141_v27 = vpop.eup %3712 }
 0x18f   : > { %6560 = vst [vmem:[#allocation80_spill] sm:$0xff] %v5141_v27  ;;  %v2129_v26 = vsub.f32 2.0, %v2097_v39  ;;  %v1340_v59 = vadd.f32 %v4536_v45, %v1272_v32  ;;  %v1377_v34 = vmul.f32 %v4003_v5, %v1191_v10  ;;  %v1542_v42 = vadd.f32 %v4540_v11, %v1474_v29 }
 0x190   : > { %6559 = vst [vmem:[#allocation79_spill] sm:$0xff] %v5135_v57  ;;  %v2562_v24 = vmul.f32 1.442695, %v2515_v4  ;;  %v2516_v17 = vmul.f32 %v2484_v30, %v1972_v21  ;;  %2822 = vrot.lane.b32.xlu1 %v5135_v57, %s3812_s21  ;;  %v1443_v58 = vmul.f32 %v4005_v6, %v1025_v47  ;;  %v5150_v25 = vmul.f32 0.70710677, %v5135_v57  ;;  %v5152_v8 = vpop.eup %3714  ;;  %v683_v57 = vpop.f32.mrf.mxu0 }
 0x191   : > { %6562 = vst [vmem:[#allocation82_spill] sm:$0xff] %v5152_v8  ;;  %v2130_v39 = vsub.f32 2.0, %v2098_v54  ;;  %3718 = vrcp.f32 %v5132_v16  ;;  %v1610_v45 = vadd.f32 %v1578_v56, %v1542_v42  ;;  %v1646_v32 = vmul.f32 %v4016_v14, %v1077_v48 }
 0x192   : > { %6561 = vst [vmem:[#allocation81_spill] sm:$0xff] %v5150_v25  ;;  %v1341_v11 = vadd.f32 %v4469_v43, %v1273_v46  ;;  %v1973_v30 = vand.u32 2147483647, %v5150_v25  ;;  %v1141_v4 = vsel %vm1129_vm4, %v1104_v0, %v1122_v7  ;;  %v1236_v47 = vmul.f32 %v3968_v50, %v1077_v48 }
 0x193   : > { %v1408_v29 = vadd.f32 %v1376_v63, %v1340_v59  ;;  %v1579_v21 = vmul.f32 %v4018_v18, %v1191_v10  ;;  %v1678_v1 = vadd.f32 %v1646_v32, %v1610_v45  ;;  %v1714_v61 = vmul.f32 %v4020_v19, %v4629_v28 }
 0x194   : > { %v5164_v54 = vmul.f32 %v3709_v3, %v2129_v26  ;;  %v2564_v56 = vmul.f32 1.442695, %v2516_v17  ;;  %v2005_v42 = vmul.f32 0.3275911, %v1973_v30  ;;  %v1475_v43 = vadd.f32 %v1443_v58, %v5090_v9  ;;  %v2916_v26 = vld [vmem:[%s6296_s5] sm:$0xff] }
 0x195   : > { %3720 = vpow2.f32 %v2562_v24  ;;  %v1746_v46 = vadd.f32 %v1714_v61, %v1678_v1  ;;  %v1782_v25 = vmul.f32 %v4040_v36, %v1141_v4  ;;  %v5169_v8 = vadd.f32 %v4744_v55, %v3572_v22  ;;  %3576 = vmatprep.subr.mxu1 %v2916_v26 }
 0x196   : > { %v5171_v63 = vmul.f32 %v3711_v2, %v2130_v39  ;;  %v5173_v10 = vadd.f32 %v1377_v34, %v1341_v11  ;;  %v1378_v59 = vmul.f32 %v4003_v5, %v1141_v4  ;;  %v1274_v3 = vadd.f32 %v4778_v40, %v1236_v47  ;;  %3577 = vmatpush3.msra.mxu1 %v2916_v26  ;;  %v6567_v11 = vld [vmem:[#allocation49_spill] sm:$0xff] }
 0x197   : > { %v1580_v9 = vmul.f32 %v4018_v18, %v1141_v4  ;;  %v5181_v24 = vadd.f32 %v1782_v25, %v1746_v46  ;;  %v5184_v17 = vadd.f32 %v4744_v55, %v683_v57  ;;  %v6564_v2 = vrot.slane %v4525_v23, 7 }
 0x198   : > { %v6565_v34 = vrot.slane %v4629_v28, 7  ;;  %3722 = vpow2.f32 %v2564_v56  ;;  %v5192_v22 = vadd.f32 1.0, %v2005_v42  ;;  %v1159_v39 = vsel %vm1129_vm4, %v1122_v7, %v1104_v0  ;;  %v3717_v45 = vpop.eup %3716 }
 0x199   : > { %6563 = vst [vmem:[#allocation83_spill] sm:$0xff] %v5181_v24  ;;  %v1543_v25 = vadd.f32 %v4479_v51, %v1475_v43  ;;  %v2485_v55 = vsub.f32 0.0, %v1973_v30  ;;  %2824 = vrot.lane.b32.xlu0 %v5181_v24, %s3812_s21  ;;  %v1444_v28 = vmul.f32 %v4005_v6, %v1077_v48  ;;  %v5201_v57 = vmul.f32 0.70710677, %v5181_v24 }
 0x19a   : > { %v1026_v58 = vsel %vm1014_vm2, %v6565_v34, %v6564_v2  ;;  %v1342_v4 = vadd.f32 %v6567_v11, %v1274_v3  ;;  %v5210_v1 = vmul.f32 %v4014_v13, %v5169_v8  ;;  %v1193_v61 = vsel %vm1092_vm5, %v1159_v39, 0.0 }
 0x19b   : > { %6566 = vst [vmem:[#allocation84_spill] sm:$0xff] %v5201_v57  ;;  %v1611_v0 = vadd.f32 %v1579_v21, %v1543_v25  ;;  %v1647_v51 = vmul.f32 %v4016_v14, %v1026_v58  ;;  %v1974_v7 = vand.u32 2147483647, %v5201_v57  ;;  %3724 = vrcp.f32 %v5192_v22 }
 0x19c   : > { %v1715_v42 = vmul.f32 %v4020_v19, %v4525_v23  ;;  %v6568_v21 = vrot.slane %v4747_v52, 7  ;;  %v6569_v43 = vrot.slane %v4643_v35, 7  ;;  %v2099_v3 = vmul.f32 %v3717_v45, %v5105_v49 }
 0x19d   : > { %v1679_v56 = vadd.f32 %v1647_v51, %v1611_v0  ;;  %v2517_v26 = vmul.f32 %v2485_v55, %v1973_v30  ;;  %v2006_v2 = vmul.f32 0.3275911, %v1974_v7  ;;  %v1237_v34 = vmul.f32 %v3968_v50, %v1026_v58 }
 0x19e   : > { %v1045_v46 = vsel %vm1014_vm2, %v6569_v43, %v6568_v21  ;;  %v3719_v39 = vpop.eup %3718  ;;  %v1783_v11 = vmul.f32 %v4040_v36, %v1193_v61  ;;  %v1105_v0 = vrot.slane %v4747_v52, 1  ;;  %v1476_v23 = vadd.f32 %v1444_v28, %v1408_v29 }
 0x19f   : > { %v1747_v25 = vadd.f32 %v1715_v42, %v1679_v56  ;;  %v5228_v51 = vadd.f32 1.0, %v2006_v2  ;;  %v2486_v47 = vsub.f32 0.0, %v1974_v7  ;;  %v1079_v32 = vsel %vm976_vm3, %v1045_v46, 0.0  ;;  %v6571_v56 = vld [vmem:[#allocation50_spill] sm:$0xff] }
 0x1a0   : > { %v1123_v21 = vrot.slane %v4643_v35, 1  ;;  %v5236_v30 = vmul.f32 %v4014_v13, %v5184_v17  ;;  %v1544_v42 = vadd.f32 %v6571_v56, %v1476_v23  ;;  %v2100_v29 = vmul.f32 %v3719_v39, %v5132_v16 }
 0x1a1   : > { %v5238_v55 = vadd.f32 %v1783_v11, %v1747_v25  ;;  %v5242_v28 = vadd.f32 %v1378_v59, %v1342_v4  ;;  %v1275_v43 = vadd.f32 %v4778_v40, %v1237_v34  ;;  %v1445_v46 = vmul.f32 %v4005_v6, %v1026_v58 }
 0x1a2   : > { %v5246_v2 = vpop.eup %3720  ;;  %3726 = vrcp.f32 %v5228_v51  ;;  %v1612_v25 = vadd.f32 %v1580_v9, %v1544_v42  ;;  %v1648_v11 = vmul.f32 %v4016_v14, %v1079_v32  ;;  %v2131_v16 = vsub.f32 2.0, %v2099_v3 }
 0x1a3   : > { %6570 = vst [vmem:[#allocation49_spill] sm:$0xff] %v5238_v55  ;;  %6572 = vst [vmem:[#allocation50_spill] sm:$0xff] %v5246_v2  ;;  %2826 = vrot.lane.b32.xlu1 %v5238_v55, %s3812_s21  ;;  %v5252_v13 = vmul.f32 0.70710677, %v5238_v55  ;;  %v2566_v59 = vmul.f32 1.442695, %v2517_v26  ;;  %v2518_v4 = vmul.f32 %v2486_v47, %v1974_v7  ;;  %v1142_v34 = vsel %vm1129_vm4, %v1105_v0, %v1123_v21 }
 0x1a4   : > { %v1379_v58 = vmul.f32 %v4003_v5, %v1193_v61  ;;  %v1680_v56 = vadd.f32 %v1648_v11, %v1612_v25  ;;  %v1716_v49 = vmul.f32 %v4020_v19, %v4747_v52  ;;  %v2132_v55 = vsub.f32 2.0, %v2100_v29  ;;  %v6575_v7 = vld [vmem:[#allocation40_spill] sm:$0xff] }
 0x1a5   : > { %6573 = vst [vmem:[#allocation85_spill] sm:$0xff] %v5252_v13  ;;  %v1975_v23 = vand.u32 2147483647, %v5252_v13  ;;  %v5261_v48 = vpop.eup %3722  ;;  %v1581_v9 = vmul.f32 %v4018_v18, %v1193_v61  ;;  %v1238_v3 = vmul.f32 %v3968_v50, %v1079_v32  ;;  %v1477_v47 = vadd.f32 %v1445_v46, %v5173_v10 }
 0x1a6   : > { %6574 = vst [vmem:[#allocation86_spill] sm:$0xff] %v5261_v48  ;;  %v1343_v26 = vadd.f32 %v6575_v7, %v1275_v43  ;;  %v1748_v24 = vadd.f32 %v1716_v49, %v1680_v56  ;;  %v1784_v57 = vmul.f32 %v4040_v36, %v1142_v34  ;;  %v5268_v13 = vmul.f32 %v3717_v45, %v2131_v16  ;;  %v6580_v56 = vld [vmem:[#allocation42_spill] sm:$0xff] }
 0x1a7   : > { %v2007_v42 = vmul.f32 0.3275911, %v1975_v23  ;;  %3728 = vpow2.f32 %v2566_v59  ;;  %v2568_v25 = vmul.f32 1.442695, %v2518_v4  ;;  %v1380_v11 = vmul.f32 %v4003_v5, %v1142_v34  ;;  %v3575_v59 = vpop.f32.mrf.mxu1  ;;  %v6582_v7 = vld [vmem:[#allocation2_spill] sm:$0xff] }
 0x1a8   : > { %v1582_v61 = vmul.f32 %v4018_v18, %v1142_v34  ;;  %v5274_v29 = vadd.f32 %v1784_v57, %v1748_v24  ;;  %v6577_v10 = vrot.slane %v4643_v35, 7  ;;  %v6578_v43 = vrot.slane %v4747_v52, 7  ;;  %v3725_v46 = vpop.eup %3724 }
 0x1a9   : > { %v5271_v48 = vadd.f32 1.0, %v2007_v42  ;;  %v5282_v45 = vmul.f32 %v3719_v39, %v2132_v55  ;;  %v1276_v16 = vadd.f32 %v4778_v40, %v1238_v3  ;;  %v1160_v4 = vsel %vm1129_vm4, %v1123_v21, %v1105_v0 }
 0x1aa   : > { %6576 = vst [vmem:[#allocation40_spill] sm:$0xff] %v5274_v29  ;;  %v1027_v49 = vsel %vm1014_vm2, %v6578_v43, %v6577_v10  ;;  %v1545_v34 = vadd.f32 %v6580_v56, %v1477_v47  ;;  %v5288_v24 = vadd.f32 %v1379_v58, %v1343_v26  ;;  %v2487_v57 = vsub.f32 0.0, %v1975_v23  ;;  %2828 = vrot.lane.b32.xlu0 %v5274_v29, %s3812_s21  ;;  %v6583_v26 = vld [vmem:[#allocation55_spill] sm:$0xff] }
 0x1ab   : > { %6579 = vst [vmem:[#allocation87_spill] sm:$0xff] %v5282_v45  ;;  %v5293_v52 = vmul.f32 0.70710677, %v5274_v29  ;;  %v5296_v39 = vadd.f32 %v3575_v59, %v6582_v7  ;;  %3730 = vpow2.f32 %v2568_v25  ;;  %v1446_v55 = vmul.f32 %v4005_v6, %v1079_v32 }
 0x1ac   : > { %v1613_v3 = vadd.f32 %v1581_v9, %v1545_v34  ;;  %v1649_v0 = vmul.f32 %v4016_v14, %v1027_v49  ;;  %v2101_v21 = vmul.f32 %v3725_v46, %v5192_v22  ;;  %3732 = vrcp.f32 %v5271_v48 }
 0x1ad   : > { %6581 = vst [vmem:[#allocation42_spill] sm:$0xff] %v5293_v52  ;;  %v1976_v58 = vand.u32 2147483647, %v5293_v52  ;;  %v1195_v47 = vsel %vm1092_vm5, %v1160_v4, 0.0  ;;  %v1344_v42 = vadd.f32 %v6583_v26, %v1276_v16  ;;  %v1717_v25 = vmul.f32 %v4020_v19, %v4643_v35 }
 0x1ae   : > { %v1681_v10 = vadd.f32 %v1649_v0, %v1613_v3  ;;  %v6584_v32 = vrot.slane %v4860_v37, 7  ;;  %v6585_v9 = vrot.slane %v4771_v31, 7  ;;  %v2519_v43 = vmul.f32 %v2487_v57, %v1975_v23 }
 0x1af   : > { %v2008_v59 = vmul.f32 0.3275911, %v1976_v58  ;;  %v1239_v34 = vmul.f32 %v3968_v50, %v1027_v49  ;;  %v3727_v4 = vpop.eup %3726  ;;  %v1785_v16 = vmul.f32 %v4040_v36, %v1195_v47  ;;  %v1106_v3 = vrot.slane %v4860_v37, 1 }
 0x1b0   : > { %v1046_v22 = vsel %vm1014_vm2, %v6585_v9, %v6584_v32  ;;  %v1749_v29 = vadd.f32 %v1717_v25, %v1681_v10  ;;  %v1478_v35 = vadd.f32 %v1446_v55, %v5242_v28  ;;  %v2488_v26 = vsub.f32 0.0, %v1976_v58  ;;  %v6587_v25 = vld [vmem:[#allocation56_spill] sm:$0xff] }
 0x1b1   : > { %v5319_v0 = vadd.f32 1.0, %v2008_v59  ;;  %v1081_v32 = vsel %vm976_vm3, %v1046_v22, 0.0  ;;  %v1124_v23 = vrot.slane %v4771_v31, 1  ;;  %v5327_v9 = vmul.f32 %v4020_v19, %v5296_v39 }
 0x1b2   : > { %v5329_v10 = vadd.f32 %v1785_v16, %v1749_v29  ;;  %v1546_v56 = vadd.f32 %v6587_v25, %v1478_v35  ;;  %v2133_v52 = vsub.f32 2.0, %v2101_v21  ;;  %v2102_v28 = vmul.f32 %v3727_v4, %v5228_v51 }
 0x1b3   : > { %v5333_v55 = vadd.f32 %v1380_v11, %v1344_v42  ;;  %v1277_v59 = vadd.f32 %v4778_v40, %v1239_v34  ;;  %v2570_v22 = vmul.f32 1.442695, %v2519_v43  ;;  %v1650_v29 = vmul.f32 %v4016_v14, %v1081_v32  ;;  %v693_v42 = vpop.f32.mrf.mxu1 }
 0x1b4   : > { %6586 = vst [vmem:[#allocation2_spill] sm:$0xff] %v5329_v10  ;;  %2830 = vrot.lane.b32.xlu1 %v5329_v10, %s3812_s21  ;;  %v5339_v57 = vmul.f32 0.70710677, %v5329_v10  ;;  %v1614_v2 = vadd.f32 %v1582_v61, %v1546_v56  ;;  %v5342_v16 = vpop.eup %3728  ;;  %3734 = vrcp.f32 %v5319_v0  ;;  %v2520_v21 = vmul.f32 %v2488_v26, %v1976_v58  ;;  %v6590_v58 = vld [vmem:[#allocation5_spill] sm:$0xff] }
 0x1b5   : > { %6589 = vst [vmem:[#allocation56_spill] sm:$0xff] %v5342_v16  ;;  %v1447_v51 = vmul.f32 %v4005_v6, %v1027_v49  ;;  %v1143_v11 = vsel %vm1129_vm4, %v1106_v3, %v1124_v23  ;;  %v1718_v35 = vmul.f32 %v4020_v19, %v4860_v37  ;;  %v1240_v61 = vmul.f32 %v3968_v50, %v1081_v32 }
 0x1b6   : > { %6588 = vst [vmem:[#allocation55_spill] sm:$0xff] %v5339_v57  ;;  %v1977_v43 = vand.u32 2147483647, %v5339_v57  ;;  %v1682_v34 = vadd.f32 %v1650_v29, %v1614_v2  ;;  %v5352_v56 = vmul.f32 %v3725_v46, %v2133_v52  ;;  %v2134_v25 = vsub.f32 2.0, %v2102_v28 }
 0x1b7   : > { %v1381_v10 = vmul.f32 %v4003_v5, %v1195_v47  ;;  %v1345_v26 = vadd.f32 %v6590_v58, %v1277_v59  ;;  %v1786_v27 = vmul.f32 %v4040_v36, %v1143_v11  ;;  %v5358_v45 = vadd.f32 %v6582_v7, %v693_v42 }
 0x1b8   : > { %v2009_v49 = vmul.f32 0.3275911, %v1977_v43  ;;  %v1750_v16 = vadd.f32 %v1718_v35, %v1682_v34  ;;  %v5360_v2 = vpop.eup %3730  ;;  %3736 = vpow2.f32 %v2570_v22  ;;  %v2572_v29 = vmul.f32 1.442695, %v2520_v21 }
 0x1b9   : > { %6591 = vst [vmem:[#allocation5_spill] sm:$0xff] %v5360_v2  ;;  %v1583_v57 = vmul.f32 %v4018_v18, %v1195_v47  ;;  %v1479_v46 = vadd.f32 %v1447_v51, %v5288_v24  ;;  %v3733_v52 = vpop.eup %3732  ;;  %v1382_v28 = vmul.f32 %v4003_v5, %v1143_v11  ;;  %v1584_v59 = vmul.f32 %v4018_v18, %v1143_v11 }
 0x1ba   : > { %v5366_v58 = vadd.f32 %v1786_v27, %v1750_v16  ;;  %v1278_v34 = vadd.f32 %v4778_v40, %v1240_v61  ;;  %v5369_v35 = vmul.f32 %v3727_v4, %v2134_v25  ;;  %v1413_v7 = vadd.f32 %v1381_v10, %v1345_v26  ;;  %v6597_v16 = vld [vmem:[#allocation8_spill] sm:$0xff] }
 0x1bb   : > { %v2489_v42 = vsub.f32 0.0, %v1977_v43  ;;  %v6594_v22 = vrot.slane %v4771_v31, 7  ;;  %v6595_v21 = vrot.slane %v4860_v37, 7  ;;  %v5377_v47 = vadd.f32 1.0, %v2009_v49 }
 0x1bc   : > { %6592 = vst [vmem:[#allocation88_spill] sm:$0xff] %v5366_v58  ;;  %6593 = vst [vmem:[#allocation89_spill] sm:$0xff] %v5369_v35  ;;  %2832 = vrot.lane.b32.xlu0 %v5366_v58, %s3812_s21  ;;  %v5382_v27 = vmul.f32 0.70710677, %v5366_v58  ;;  %v995_v40 = vrot.slane %v5358_v45, 7  ;;  %v1161_v4 = vsel %vm1129_vm4, %v1124_v23, %v1106_v3  ;;  %v2103_v10 = vmul.f32 %v3733_v52, %v5271_v48 }
 0x1bd   : > { %v1028_v24 = vsel %vm1014_vm2, %v6595_v21, %v6594_v22  ;;  %3738 = vpow2.f32 %v2572_v29  ;;  %v1448_v37 = vmul.f32 %v4005_v6, %v1081_v32  ;;  %v1547_v51 = vadd.f32 %v6597_v16, %v1479_v46 }
 0x1be   : > { %6596 = vst [vmem:[#allocation90_spill] sm:$0xff] %v5382_v27  ;;  %v1346_v11 = vadd.f32 %v4881_v44, %v1278_v34  ;;  %v1978_v61 = vand.u32 2147483647, %v5382_v27  ;;  %v1651_v26 = vmul.f32 %v4016_v14, %v1028_v24  ;;  %v2521_v49 = vmul.f32 %v2489_v42, %v1977_v43 }
 0x1bf   : > { %v5396_v22 = vmul.f32 %v4020_v19, %v5358_v45  ;;  %v1197_v48 = vsel %vm1092_vm5, %v1161_v4, 0.0  ;;  %v1615_v3 = vadd.f32 %v1583_v57, %v1547_v51  ;;  %3740 = vrcp.f32 %v5377_v47 }
 0x1c0   : > { %v2010_v32 = vmul.f32 0.3275911, %v1978_v61  ;;  %v6598_v44 = vrot.slane %v5296_v39, 7  ;;  %v6599_v29 = vrot.slane %v4972_v41, 7  ;;  %v6600_v43 = vrot.slane %v4872_v12, 7 }
 0x1c1   : > { %v2135_v34 = vsub.f32 2.0, %v2103_v10  ;;  %v1683_v21 = vadd.f32 %v1651_v26, %v1615_v3  ;;  %v1719_v4 = vmul.f32 %v4020_v19, %v4771_v31  ;;  %v3735_v16 = vpop.eup %3734  ;;  %v2490_v51 = vsub.f32 0.0, %v1978_v61 }
 0x1c2   : > { %v5405_v23 = vsel %vm1014_vm2, %v995_v40, %v6598_v44  ;;  %v1047_v46 = vsel %vm1014_vm2, %v6600_v43, %v6599_v29  ;;  %v6601_v42 = vmov %v6598_v44  ;;  %v1787_v44 = vmul.f32 %v4040_v36, %v1197_v48  ;;  %v6602_v43 = vld [vmem:[#allocation64_spill] sm:$0xff] }
 0x1c3   : > { %v1050_v57 = vsel %vm1014_vm2, %v6601_v42, %v995_v40  ;;  %v1241_v25 = vmul.f32 %v3968_v50, %v1028_v24  ;;  %v1480_v58 = vadd.f32 %v1448_v37, %v5333_v55  ;;  %v1751_v27 = vadd.f32 %v1719_v4, %v1683_v21 }
 0x1c4   : > { %v1083_v10 = vsel %vm976_vm3, %v1047_v46, 0.0  ;;  %v1107_v29 = vrot.slane %v4972_v41, 1  ;;  %v1125_v40 = vrot.slane %v4872_v12, 1  ;;  %v1414_v26 = vadd.f32 %v1382_v28, %v1346_v11 }
 0x1c5   : > { %v5426_v3 = vadd.f32 1.0, %v2010_v32  ;;  %v1449_v31 = vmul.f32 %v4005_v6, %v1028_v24  ;;  %v1548_v42 = vadd.f32 %v6602_v43, %v1480_v58  ;;  %v2104_v2 = vmul.f32 %v3735_v16, %v5319_v0  ;;  %v5437_v46 = vpop.eup %3736  ;;  %v5448_v0 = vld [vmem:[%s6295_s4] ss:$0 sm:$0xff] }
 0x1c6   : > { %v2574_v35 = vmul.f32 1.442695, %v2521_v49  ;;  %v5433_v55 = vsel %vm976_vm3, %v1050_v57, 0.0  ;;  %v5435_v37 = vadd.f32 %v1787_v44, %v1751_v27  ;;  %6604 = vst [vmem:[#allocation64_spill] sm:$0xff] %v5437_v46  ;;  %v5439_v21 = vmul.f32 %v3733_v52, %v2135_v34 }
 0x1c7   : > { %v1383_v28 = vmul.f32 %v4003_v5, %v1197_v48  ;;  %v1616_v11 = vadd.f32 %v1584_v59, %v1548_v42  ;;  %v1652_v24 = vmul.f32 %v4016_v14, %v1083_v10  ;;  %v2522_v32 = vmul.f32 %v2490_v51, %v1978_v61 }
 0x1c8   : > { %6603 = vst [vmem:[#allocation8_spill] sm:$0xff] %v5435_v37  ;;  %6605 = vst [vmem:[#allocation91_spill] sm:$0xff] %v5439_v21  ;;  %2834 = vrot.lane.b32.xlu1 %v5435_v37, %s3812_s21  ;;  %v1279_v58 = vadd.f32 %v5448_v0, %v1241_v25  ;;  %v5452_v27 = vmul.f32 0.70710677, %v5435_v37  ;;  %v1144_v52 = vsel %vm1129_vm4, %v1107_v29, %v1125_v40  ;;  %3742 = vrcp.f32 %v5426_v3 }
 0x1c9   : > { %v1684_v59 = vadd.f32 %v1652_v24, %v1616_v11  ;;  %v1720_v61 = vmul.f32 %v4020_v19, %v4972_v41  ;;  %v1481_v49 = vadd.f32 %v1449_v31, %v1413_v7  ;;  %v2136_v34 = vsub.f32 2.0, %v2104_v2  ;;  %v6610_v2 = vld [vmem:[#allocation61_spill] sm:$0xff]  ;;  %v6611_v24 = vld [vmem:[#allocation14_spill] sm:$0xff] }
 0x1ca   : > { %6606 = vst [vmem:[#allocation92_spill] sm:$0xff] %v5452_v27  ;;  %v1585_v57 = vmul.f32 %v4018_v18, %v1197_v48  ;;  %v1979_v4 = vand.u32 2147483647, %v5452_v27  ;;  %v6607_v25 = vrot.slane %v4872_v12, 7  ;;  %v6608_v51 = vrot.slane %v4972_v41, 7  ;;  %v5467_v43 = vpop.eup %3738 }
 0x1cb   : > { %6609 = vst [vmem:[#allocation93_spill] sm:$0xff] %v5467_v43  ;;  %v1752_v42 = vadd.f32 %v1720_v61, %v1684_v59  ;;  %v1788_v11 = vmul.f32 %v4040_v36, %v1144_v52  ;;  %v1162_v7 = vsel %vm1129_vm4, %v1125_v40, %v1107_v29  ;;  %v1549_v31 = vadd.f32 %v6610_v2, %v1481_v49 }
 0x1cc   : > { %v1029_v44 = vsel %vm1014_vm2, %v6608_v51, %v6607_v25  ;;  %3744 = vpow2.f32 %v2574_v35  ;;  %v2576_v48 = vmul.f32 1.442695, %v2522_v32  ;;  %v1347_v37 = vadd.f32 %v6611_v24, %v1279_v58  ;;  %v3741_v61 = vpop.eup %3740 }
 0x1cd   : > { %v1242_v27 = vmul.f32 %v3968_v50, %v1083_v10  ;;  %v1384_v41 = vmul.f32 %v4003_v5, %v1144_v52  ;;  %v5476_v46 = vadd.f32 %v1788_v11, %v1752_v42  ;;  %v1617_v25 = vadd.f32 %v1585_v57, %v1549_v31 }
 0x1ce   : > { %v1653_v59 = vmul.f32 %v4016_v14, %v1029_v44  ;;  %v2011_v51 = vmul.f32 0.3275911, %v1979_v4  ;;  %v2491_v43 = vsub.f32 0.0, %v1979_v4  ;;  %v1450_v29 = vmul.f32 %v4005_v6, %v1083_v10 }
 0x1cf   : > { %6612 = vst [vmem:[#allocation61_spill] sm:$0xff] %v5476_v46  ;;  %v1199_v35 = vsel %vm1092_vm5, %v1162_v7, 0.0  ;;  %v5482_v40 = vmul.f32 %v3735_v16, %v2136_v34  ;;  %2836 = vrot.lane.b32.xlu0 %v5476_v46, %s3812_s21  ;;  %v5487_v32 = vmul.f32 0.70710677, %v5476_v46  ;;  %v1721_v49 = vmul.f32 %v4020_v19, %v4872_v12 }
 0x1d0   : > { %v1685_v58 = vadd.f32 %v1653_v59, %v1617_v25  ;;  %v1415_v57 = vadd.f32 %v1383_v28, %v1347_v37  ;;  %v1586_v42 = vmul.f32 %v4018_v18, %v1144_v52  ;;  %v1280_v10 = vadd.f32 %v5448_v0, %v1242_v27 }
 0x1d1   : > { %6613 = vst [vmem:[#allocation14_spill] sm:$0xff] %v5482_v40  ;;  %6614 = vst [vmem:[#allocation94_spill] sm:$0xff] %v5487_v32  ;;  %v6615_v11 = vrot.slane %v5082_v20, 7  ;;  %v6616_v16 = vrot.slane %v4987_v60, 7  ;;  %v2105_v7 = vmul.f32 %v3741_v61, %v5377_v47  ;;  %v1980_v2 = vand.u32 2147483647, %v5487_v32 }
 0x1d2   : > { %v1753_v31 = vadd.f32 %v1721_v49, %v1685_v58  ;;  %v1789_v24 = vmul.f32 %v4040_v36, %v1199_v35  ;;  %v5502_v12 = vadd.f32 1.0, %v2011_v51  ;;  %v2523_v37 = vmul.f32 %v2491_v43, %v1979_v4  ;;  %v6618_v43 = vld [vmem:[#allocation71_spill] sm:$0xff] }
 0x1d3   : > { %v1048_v34 = vsel %vm1014_vm2, %v6616_v16, %v6615_v11  ;;  %v1243_v28 = vmul.f32 %v3968_v50, %v1029_v44  ;;  %v1482_v27 = vadd.f32 %v1450_v29, %v1414_v26  ;;  %v1108_v59 = vrot.slane %v5082_v20, 1 }
 0x1d4   : > { %v5505_v52 = vadd.f32 %v1789_v24, %v1753_v31  ;;  %v1085_v25 = vsel %vm976_vm3, %v1048_v34, 0.0  ;;  %v1126_v47 = vrot.slane %v4987_v60, 1  ;;  %3746 = vpow2.f32 %v2576_v48 }
 0x1d5   : > { %v2012_v11 = vmul.f32 0.3275911, %v1980_v2  ;;  %v5512_v58 = vmul.f32 %v4003_v5, %v1199_v35  ;;  %v1550_v51 = vadd.f32 %v5007_v62, %v1482_v27  ;;  %v2137_v4 = vsub.f32 2.0, %v2105_v7  ;;  %v3743_v16 = vpop.eup %3742 }
 0x1d6   : > { %6617 = vst [vmem:[#allocation95_spill] sm:$0xff] %v5505_v52  ;;  %v1348_v49 = vadd.f32 %v6618_v43, %v1280_v10  ;;  %v1587_v26 = vmul.f32 %v4018_v18, %v1199_v35  ;;  %2838 = vrot.lane.b32.xlu1 %v5505_v52, %s3812_s21  ;;  %v5520_v29 = vmul.f32 0.70710677, %v5505_v52  ;;  %3748 = vrcp.f32 %v5502_v12 }
 0x1d7   : > { %v1451_v48 = vmul.f32 %v4005_v6, %v1029_v44  ;;  %v1618_v34 = vadd.f32 %v1586_v42, %v1550_v51  ;;  %v1654_v31 = vmul.f32 %v4016_v14, %v1085_v25  ;;  %v2578_v62 = vmul.f32 1.442695, %v2523_v37 }
 0x1d8   : > { %6619 = vst [vmem:[#allocation71_spill] sm:$0xff] %v5520_v29  ;;  %v1281_v7 = vadd.f32 %v5448_v0, %v1243_v28  ;;  %v1981_v10 = vand.u32 2147483647, %v5520_v29  ;;  %v1145_v35 = vsel %vm1129_vm4, %v1108_v59, %v1126_v47  ;;  %v5529_v24 = vadd.f32 1.0, %v2012_v11 }
 0x1d9   : > { %v1686_v27 = vadd.f32 %v1654_v31, %v1618_v34  ;;  %v1722_v43 = vmul.f32 %v4020_v19, %v5082_v20  ;;  %v1244_v52 = vmul.f32 %v3968_v50, %v1085_v25  ;;  %v5534_v44 = vpop.eup %3744  ;;  %v2106_v42 = vmul.f32 %v3743_v16, %v5426_v3  ;;  %v6621_v34 = vld [vmem:[#allocation12_spill] sm:$0xff] }
 0x1da   : > { %6620 = vst [vmem:[#allocation96_spill] sm:$0xff] %v5534_v44  ;;  %v1416_v37 = vadd.f32 %v1384_v41, %v1348_v49  ;;  %v2492_v51 = vsub.f32 0.0, %v1980_v2  ;;  %v2013_v28 = vmul.f32 0.3275911, %v1981_v10  ;;  %v5537_v46 = vmul.f32 %v3741_v61, %v2137_v4 }
 0x1db   : > { %v1754_v29 = vadd.f32 %v1722_v43, %v1686_v27  ;;  %v1790_v32 = vmul.f32 %v4040_v36, %v1145_v35  ;;  %v1483_v11 = vadd.f32 %v1451_v48, %v1415_v57  ;;  %3750 = vpow2.f32 %v2578_v62  ;;  %v6624_v57 = vld [vmem:[#allocation23_spill] sm:$0xff] }
 0x1dc   : > { %v1349_v31 = vadd.f32 %v6621_v34, %v1281_v7  ;;  %v1282_v40 = vadd.f32 %v5448_v0, %v1244_v52  ;;  %v6622_v21 = vrot.slane %v4987_v60, 7  ;;  %v6623_v44 = vrot.slane %v5082_v20, 7 }
 0x1dd   : > { %3752 = vrcp.f32 %v5529_v24  ;;  %v5549_v41 = vadd.f32 %v1790_v32, %v1754_v29  ;;  %v1163_v61 = vsel %vm1129_vm4, %v1126_v47, %v1108_v59  ;;  %v1551_v4 = vadd.f32 %v6624_v57, %v1483_v11 }
 0x1de   : > { %v1030_v3 = vsel %vm1014_vm2, %v6623_v44, %v6622_v21  ;;  %v2138_v49 = vsub.f32 2.0, %v2106_v42  ;;  %v2524_v48 = vmul.f32 %v2492_v51, %v1980_v2  ;;  %v5554_v62 = vadd.f32 1.0, %v2013_v28 }
 0x1df   : > { %v1452_v52 = vmul.f32 %v4005_v6, %v1085_v25  ;;  %v2493_v7 = vsub.f32 0.0, %v1981_v10  ;;  %2840 = vrot.lane.b32.xlu0 %v5549_v41, %s3812_s21  ;;  %v5560_v20 = vmul.f32 0.70710677, %v5549_v41  ;;  %v1619_v21 = vadd.f32 %v1587_v26, %v1551_v4 }
 0x1e0   : > { %v1655_v32 = vmul.f32 %v4016_v14, %v1030_v3  ;;  %v1386_v59 = vmul.f32 %v4003_v5, %v1145_v35  ;;  %v1350_v47 = vadd.f32 %v5114_v15, %v1282_v40  ;;  %v1201_v2 = vsel %vm1092_vm5, %v1163_v61, 0.0 }
 0x1e1   : > { %v1723_v25 = vmul.f32 %v4020_v19, %v4987_v60  ;;  %v1982_v29 = vand.u32 2147483647, %v5560_v20  ;;  %v1245_v43 = vmul.f32 %v3968_v50, %v1030_v3  ;;  %v6625_v44 = vrot.slane %v5184_v17, 7  ;;  %v5577_v51 = vpop.eup %3746 }
 0x1e2   : > { %v1687_v27 = vadd.f32 %v1655_v32, %v1619_v21  ;;  %v6626_v26 = vrot.slane %v5169_v8, 7  ;;  %v2580_v15 = vmul.f32 1.442695, %v2524_v48  ;;  %3754 = vrcp.f32 %v5554_v62 }
 0x1e3   : > { %v1484_v40 = vadd.f32 %v1452_v52, %v1416_v37  ;;  %v2525_v28 = vmul.f32 %v2493_v7, %v1981_v10  ;;  %v2014_v11 = vmul.f32 0.3275911, %v1982_v29  ;;  %v1791_v50 = vmul.f32 %v4040_v36, %v1201_v2  ;;  %v5583_v61 = vpop.eup %3748 }
 0x1e4   : > { %v1049_v42 = vsel %vm1014_vm2, %v6626_v26, %v6625_v44  ;;  %v1755_v34 = vadd.f32 %v1723_v25, %v1687_v27  ;;  %v1417_v57 = vadd.f32 %v5512_v58, %v1349_v31  ;;  %v1588_v4 = vmul.f32 %v4018_v18, %v1145_v35 }
 0x1e5   : > { %v1087_v60 = vsel %vm976_vm3, %v1049_v42, 0.0  ;;  %v1552_v21 = vadd.f32 %v5118_v33, %v1484_v40  ;;  %v5589_v32 = vmul.f32 %v3743_v16, %v2138_v49  ;;  %v1418_v44 = vadd.f32 %v1386_v59, %v1350_v47 }
 0x1e6   : > { %v1656_v48 = vmul.f32 %v4016_v14, %v1087_v60  ;;  %v5591_v26 = vadd.f32 %v1791_v50, %v1755_v34  ;;  %v1283_v10 = vadd.f32 %v5448_v0, %v1245_v43  ;;  %3756 = vpow2.f32 %v2580_v15  ;;  %v6630_v43 = vld [vmem:[#allocation72_spill] sm:$0xff] }
 0x1e7   : > { %v5594_v37 = vadd.f32 1.0, %v2014_v11  ;;  %v1387_v52 = vmul.f32 %v4003_v5, %v1201_v2  ;;  %v1620_v7 = vadd.f32 %v1588_v4, %v1552_v21  ;;  %v5597_v58 = vmul.f32 1.442695, %v2525_v28 }
 0x1e8   : > { %6627 = vst [vmem:[#allocation12_spill] sm:$0xff] %v5591_v26  ;;  %2842 = vrot.lane.b32.xlu1 %v5591_v26, %s3812_s21  ;;  %v5602_v33 = vmul.f32 0.70710677, %v5591_v26  ;;  %v6628_v16 = vrot.slane %v5169_v8, 1  ;;  %v6629_v35 = vrot.slane %v5184_v17, 1  ;;  %v1454_v31 = vmul.f32 %v4005_v6, %v1087_v60  ;;  %v5618_v25 = vpop.eup %3750 }
 0x1e9   : > { %v5613_v5 = vmul.f32 %v5583_v61, %v5502_v12  ;;  %v1453_v49 = vmul.f32 %v4005_v6, %v1030_v3  ;;  %v1688_v59 = vadd.f32 %v1656_v48, %v1620_v7  ;;  %v1724_v47 = vmul.f32 %v4020_v19, %v5184_v17 }
 0x1ea   : > { %v1146_v0 = vsel %vm1129_vm4, %v6629_v35, %v6628_v16  ;;  %v2494_v27 = vsub.f32 0.0, %v1982_v29  ;;  %v1351_v42 = vadd.f32 %v6630_v43, %v1283_v10  ;;  %v1983_v15 = vand.u32 2147483647, %v5602_v33  ;;  %v3753_v28 = vpop.eup %3752 }
 0x1eb   : > { %v1486_v40 = vadd.f32 %v1454_v31, %v1418_v44  ;;  %3758 = vrcp.f32 %v5594_v37  ;;  %v1590_v12 = vmul.f32 %v4018_v18, %v1146_v0  ;;  %v1756_v60 = vadd.f32 %v1724_v47, %v1688_v59 }
 0x1ec   : > { %v1792_v3 = vmul.f32 %v4040_v36, %v1146_v0  ;;  %v2015_v11 = vmul.f32 0.3275911, %v1983_v15  ;;  %v1658_v50 = vmul.f32 %v4016_v14, %v5433_v55  ;;  %v6631_v4 = vrot.slane %v5169_v8, 7 }
 0x1ed   : > { %v1554_v34 = vadd.f32 %v5236_v30, %v1486_v40  ;;  %v6632_v21 = vrot.slane %v5184_v17, 7  ;;  %v1589_v44 = vmul.f32 %v4018_v18, %v1201_v2  ;;  %v6634_v7 = vmov %v6629_v35 }
 0x1ee   : > { %v5635_v10 = vadd.f32 %v1792_v3, %v1756_v60  ;;  %v1164_v30 = vsel %vm1129_vm4, %v6628_v16, %v6634_v7  ;;  %v1485_v35 = vadd.f32 %v1453_v49, %v1417_v57  ;;  %v2108_v55 = vmul.f32 %v3753_v28, %v5529_v24  ;;  %v6637_v57 = vld [vmem:[#allocation75_spill] sm:$0xff] }
 0x1ef   : > { %v1031_v48 = vsel %vm1014_vm2, %v6632_v21, %v6631_v4  ;;  %v2526_v0 = vmul.f32 %v2494_v27, %v1982_v29  ;;  %v5644_v31 = vadd.f32 1.0, %v2015_v11  ;;  %v1622_v59 = vadd.f32 %v1590_v12, %v1554_v34  ;;  %v3755_v29 = vpop.eup %3754 }
 0x1f0   : > { %6633 = vst [vmem:[#allocation23_spill] sm:$0xff] %v5635_v10  ;;  %2844 = vrot.lane.b32.xlu0 %v5635_v10, %s3812_s21  ;;  %v5649_v2 = vmul.f32 0.70710677, %v5635_v10  ;;  %v6635_v17 = vrot.slane %v5296_v39, 1  ;;  %v6636_v47 = vrot.slane %v5358_v45, 1  ;;  %v1553_v49 = vadd.f32 %v6637_v57, %v1485_v35 }
 0x1f1   : > { %v1657_v24 = vmul.f32 %v4016_v14, %v1031_v48  ;;  %v2139_v27 = vsub.f32 2.0, %v5613_v5  ;;  %v1419_v40 = vadd.f32 %v1387_v52, %v1351_v42  ;;  %v1690_v12 = vadd.f32 %v1658_v50, %v1622_v59 }
 0x1f2   : > { %v1147_v43 = vsel %vm1129_vm4, %v6636_v47, %v6635_v17  ;;  %v1203_v60 = vsel %vm1092_vm5, %v1164_v30, 0.0  ;;  %3760 = vrcp.f32 %v5644_v31  ;;  %v1984_v3 = vand.u32 2147483647, %v5649_v2 }
 0x1f3   : > { %v1621_v11 = vadd.f32 %v1589_v44, %v1553_v49  ;;  %v1455_v34 = vmul.f32 %v4005_v6, %v1031_v48  ;;  %v2584_v4 = vmul.f32 1.442695, %v2526_v0  ;;  %v2495_v21 = vsub.f32 0.0, %v1983_v15  ;;  %v5670_v50 = vpop.eup %3756  ;;  %v6643_v49 = vld [vmem:[#allocation30_spill] sm:$0xff] }
 0x1f4   : > { %v1758_v7 = vadd.f32 %v5396_v22, %v1690_v12  ;;  %v1794_v16 = vmul.f32 %v4040_v36, %v1147_v43  ;;  %v2140_v35 = vsub.f32 2.0, %v2108_v55  ;;  %v2109_v52 = vmul.f32 %v3755_v29, %v5554_v62 }
 0x1f5   : > { %v1689_v5 = vadd.f32 %v1657_v24, %v1621_v11  ;;  %v1725_v42 = vmul.f32 %v4020_v19, %v5169_v8  ;;  %v1591_v44 = vmul.f32 %v4018_v18, %v1203_v60  ;;  %v6639_v6 = vmov %v6636_v47 }
 0x1f6   : > { %v5672_v30 = vadd.f32 %v1794_v16, %v1758_v7  ;;  %v6640_v48 = vmov %v6635_v17  ;;  %v1487_v55 = vadd.f32 %v1455_v34, %v1419_v40  ;;  %v2016_v0 = vmul.f32 0.3275911, %v1984_v3  ;;  %v6646_v16 = vld [vmem:[#allocation36_spill] sm:$0xff] }
 0x1f7   : > { %v1165_v22 = vsel %vm1129_vm4, %v6640_v48, %v6639_v6  ;;  %v2496_v62 = vsub.f32 0.0, %v1984_v3  ;;  %v1757_v59 = vadd.f32 %v1725_v42, %v1689_v5  ;;  %v1793_v17 = vmul.f32 %v4040_v36, %v1203_v60 }
 0x1f8   : > { %6638 = vst [vmem:[#allocation72_spill] sm:$0xff] %v5672_v30  ;;  %v2527_v19 = vmul.f32 %v2495_v21, %v1983_v15  ;;  %2848 = vrot.lane.b32.xlu0 %v5672_v30, %s3812_s21  ;;  %v5685_v8 = vmul.f32 0.70710677, %v5672_v30  ;;  %v1555_v18 = vadd.f32 %v5210_v1, %v1487_v55  ;;  %v1659_v45 = vmul.f32 %v4016_v14, %v5405_v23  ;;  %v3759_v47 = vpop.eup %3758  ;;  %v6648_v55 = vld [vmem:[#allocation10_spill] sm:$0xff] }
 0x1f9   : > { %v5691_v38 = vmul.f32 %v5583_v61, %v2139_v27  ;;  %3762 = vpow2.f32 %v5597_v58  ;;  %v5694_v39 = vadd.f32 %v1793_v17, %v1757_v59  ;;  %v1205_v15 = vsel %vm1092_vm5, %v1165_v22, 0.0 }
 0x1fa   : > { %6641 = vst [vmem:[#allocation75_spill] sm:$0xff] %v5685_v8  ;;  %3764 = vpow2.f32 %v2584_v4  ;;  %v1986_v43 = vand.u32 2147483647, %v5685_v8  ;;  %v1623_v57 = vadd.f32 %v1591_v44, %v1555_v18  ;;  %v2180_v1 = vmul.f32 1.0614054, %v6643_v49  ;;  %v6645_v4 = vld [vmem:[#allocation13_spill] sm:$0xff] }
 0x1fb   : > { %6642 = vst [vmem:[#allocation97_spill] sm:$0xff] %v5694_v39  ;;  %v5700_v24 = vmul.f32 %v3753_v28, %v2140_v35  ;;  %v5702_v14 = vadd.f32 1.0, %v2016_v0  ;;  %v2528_v23 = vmul.f32 %v2496_v62, %v1984_v3  ;;  %2846 = vrot.lane.b32.xlu1 %v5694_v39, %s3812_s21  ;;  %v5707_v61 = vmul.f32 0.70710677, %v5694_v39 }
 0x1fc   : > { %v2141_v53 = vsub.f32 2.0, %v2109_v52  ;;  %v2586_v58 = vmul.f32 1.442695, %v2527_v19  ;;  %v1691_v27 = vadd.f32 %v1659_v45, %v1623_v57  ;;  %v1795_v40 = vmul.f32 %v4040_v36, %v1205_v15  ;;  %v6650_v15 = vld [vmem:[#allocation16_spill] sm:$0xff]  ;;  %v6651_v57 = vld [vmem:[#allocation37_spill] sm:$0xff] }
 0x1fd   : > { %6644 = vst [vmem:[#allocation30_spill] sm:$0xff] %v5707_v61  ;;  %v2110_v12 = vmul.f32 %v3759_v47, %v5594_v37  ;;  %v2498_v60 = vsub.f32 0.0, %v1986_v43  ;;  %v1985_v28 = vand.u32 2147483647, %v5707_v61  ;;  %v2212_v11 = vadd.f32 -1.4531521, %v2180_v1 }
 0x1fe   : > { %v2018_v34 = vmul.f32 0.3275911, %v1986_v43  ;;  %v1759_v3 = vadd.f32 %v5327_v9, %v1691_v27  ;;  %vm1892_vm6 = vcmp.ge.f32.partialorder %v6645_v4, 0.0  ;;  %3766 = vrcp.f32 %v5702_v14 }
 0x1ff   : > { %v2588_v21 = vmul.f32 1.442695, %v2528_v23  ;;  %v2244_v7 = vmul.f32 %v2212_v11, %v6643_v49  ;;  %v2181_v35 = vmul.f32 1.0614054, %v6646_v16  ;;  %v3761_v52 = vpop.eup %3760  ;;  %v5717_v36 = vmul.f32 %v3755_v29, %v2141_v53 }
 0x200   : > { %3768 = vpow2.f32 %v2586_v58  ;;  %v2497_v37 = vsub.f32 0.0, %v1985_v28  ;;  %v5719_v5 = vadd.f32 %v1795_v40, %v1759_v3  ;;  %v2142_v42 = vsub.f32 2.0, %v2110_v12  ;;  %v6652_v12 = vld [vmem:[#allocation19_spill] sm:$0xff]  ;;  %v6653_v3 = vld [vmem:[#allocation21_spill] sm:$0xff] }
 0x201   : > { %v2530_v44 = vmul.f32 %v2498_v60, %v1986_v43  ;;  %v2276_v6 = vadd.f32 1.4214138, %v2244_v7  ;;  %v2213_v9 = vadd.f32 -1.4531521, %v2181_v35  ;;  %v5721_v48 = vadd.f32 1.0, %v2018_v34  ;;  %v6654_v35 = vld [vmem:[#allocation45_spill] sm:$0xff] }
 0x202   : > { %6647 = vst [vmem:[#allocation13_spill] sm:$0xff] %v5719_v5  ;;  %v2017_v22 = vmul.f32 0.3275911, %v1985_v28  ;;  %2850 = vrot.lane.b32.xlu1 %v5719_v5, %s3812_s21  ;;  %v5726_v0 = vmul.f32 0.5, %v6648_v55  ;;  %v6394_v62 = vmov -1.0   ;;  %v2111_v59 = vmul.f32 %v3761_v52, %v5644_v31 }
 0x203   : > { %v5731_v29 = vsel %vm1892_vm6, 1.0, %v6394_v62  ;;  %3770 = vpow2.f32 %v2588_v21  ;;  %v2308_v17 = vmul.f32 %v2276_v6, %v6643_v49  ;;  %v2245_v19 = vmul.f32 %v2213_v9, %v6646_v16  ;;  %v6655_v6 = vld [vmem:[#allocation20_spill] sm:$0xff] }
 0x204   : > { %v2529_v18 = vmul.f32 %v2497_v37, %v1985_v28  ;;  %v5737_v45 = vmul.f32 0.70710677, %v5719_v5  ;;  %v5740_v43 = vmul.f32 0.5, %v6650_v15  ;;  %v2182_v1 = vmul.f32 1.0614054, %v6651_v57 }
 0x205   : > { %v5743_v23 = vmul.f32 %v3759_v47, %v2142_v42  ;;  %v2592_v53 = vmul.f32 1.442695, %v2530_v44  ;;  %v2340_v58 = vadd.f32 -0.28449672, %v2308_v17  ;;  %v2277_v27 = vadd.f32 1.4214138, %v2245_v19 }
 0x206   : > { %6649 = vst [vmem:[#allocation36_spill] sm:$0xff] %v5737_v45  ;;  %v5745_v31 = vpop.eup %3762  ;;  %3772 = vrcp.f32 %v5721_v48  ;;  %v5748_v40 = vadd.f32 1.0, %v2017_v22  ;;  %vm1893_vm7 = vcmp.ge.f32.partialorder %v6652_v12, 0.0  ;;  %v2214_v60 = vadd.f32 -1.4531521, %v2182_v1 }
 0x207   : > { %v5751_v28 = vpop.eup %3764  ;;  %v2143_v11 = vsub.f32 2.0, %v2111_v59  ;;  %v2372_v34 = vmul.f32 %v2340_v58, %v6643_v49  ;;  %v2309_v47 = vmul.f32 %v2277_v27, %v6646_v16  ;;  %vm1894_vm8 = vcmp.ge.f32.partialorder %v6653_v3, 0.0 }
 0x208   : > { %v2590_v4 = vmul.f32 1.442695, %v2529_v18  ;;  %v1987_v21 = vand.u32 2147483647, %v5737_v45  ;;  %v2246_v7 = vmul.f32 %v2214_v60, %v6651_v57  ;;  %v2183_v37 = vmul.f32 1.0614054, %v6654_v35 }
 0x209   : > { %3774 = vpow2.f32 %v2592_v53  ;;  %v2404_v42 = vadd.f32 0.2548296, %v2372_v34  ;;  %v2341_v44 = vadd.f32 -0.28449672, %v2309_v47  ;;  %v5760_v9 = vmul.f32 0.5, %v6655_v6  ;;  %v6658_v34 = vld [vmem:[#allocation47_spill] sm:$0xff] }
 0x20a   : > { %3776 = vrcp.f32 %v5748_v40  ;;  %v1925_v22 = vsel %vm1893_vm7, 1.0, %v6394_v62  ;;  %v2278_v55 = vadd.f32 1.4214138, %v2246_v7  ;;  %v2215_v59 = vadd.f32 -1.4531521, %v2183_v37  ;;  %v6659_v37 = vld [vmem:[#allocation27_spill] sm:$0xff] }
 0x20b   : > { %v5766_v17 = vmul.f32 %v3761_v52, %v2143_v11  ;;  %v2436_v19 = vmul.f32 %v2404_v42, %v6643_v49  ;;  %v2373_v18 = vmul.f32 %v2341_v44, %v6646_v16  ;;  %v5773_v15 = vsel %vm1894_vm8, 1.0, %v6394_v62  ;;  %v3767_v1 = vpop.eup %3766  ;;  %v6656_v52 = vld [vmem:[#allocation26_spill] sm:$0xff]  ;;  %v6657_v49 = vld [vmem:[#allocation28_spill] sm:$0xff] }
 0x20c   : > { %3778 = vpow2.f32 %v2590_v4  ;;  %v2019_v53 = vmul.f32 0.3275911, %v1987_v21  ;;  %v2310_v58 = vmul.f32 %v2278_v55, %v6651_v57  ;;  %v2247_v27 = vmul.f32 %v2215_v59, %v6654_v35 }
 0x20d   : > { %v5777_v12 = vpop.eup %3768  ;;  %v2596_v60 = vmul.f32 %v6656_v52, %v2436_v19  ;;  %v2405_v11 = vadd.f32 0.2548296, %v2373_v18  ;;  %vm1895_vm9 = vcmp.ge.f32.partialorder %v6657_v49, 0.0  ;;  %v2184_v47 = vmul.f32 1.0614054, %v6658_v34 }
 0x20e   : > { %v2499_v7 = vsub.f32 0.0, %v1987_v21  ;;  %v2342_v3 = vadd.f32 -0.28449672, %v2310_v58  ;;  %v5783_v42 = vmul.f32 0.5, %v6659_v37  ;;  %v2279_v4 = vadd.f32 1.4214138, %v2247_v27 }
 0x20f   : > { %v2112_v44 = vmul.f32 %v3767_v1, %v5702_v14  ;;  %v2628_v6 = vsub.f32 1.0, %v2596_v60  ;;  %v2437_v55 = vmul.f32 %v2405_v11, %v6646_v16  ;;  %v2216_v59 = vadd.f32 -1.4531521, %v2184_v47  ;;  %v6662_v58 = vld [vmem:[#allocation51_spill] sm:$0xff]  ;;  %v6663_v14 = vld [vmem:[#allocation33_spill] sm:$0xff]  ;;  %v2789_v47 = vpop.permute.xlu0 %2788 }
 0x210   : > { %v5787_v62 = vpop.eup %3770  ;;  %v2374_v19 = vmul.f32 %v2342_v3, %v6651_v57  ;;  %v6661_v18 = vmov -1.0   ;;  %v2311_v49 = vmul.f32 %v2279_v4, %v6654_v35  ;;  %v2185_v5 = vmul.f32 1.0614054, %v6662_v58 }
 0x211   : > { %6660 = vst [vmem:[#allocation10_spill] sm:$0xff] %v5787_v62  ;;  %v5791_v52 = vsel %vm1895_vm9, 1.0, %v6661_v18  ;;  %v5795_v37 = vadd.f32 1.0, %v2019_v53  ;;  %v2660_v27 = vmul.f32 %v2628_v6, %v5731_v29  ;;  %v2597_v60 = vmul.f32 %v6663_v14, %v2437_v55  ;;  %v6664_v62 = vld [vmem:[#allocation29_spill] sm:$0xff] }
 0x212   : > { %v2248_v16 = vmul.f32 %v2216_v59, %v6658_v34  ;;  %v2531_v11 = vmul.f32 %v2499_v7, %v1987_v21  ;;  %v2406_v39 = vadd.f32 0.2548296, %v2374_v19  ;;  %v2343_v30 = vadd.f32 -0.28449672, %v2311_v49  ;;  %v6665_v59 = vld [vmem:[#allocation35_spill] sm:$0xff] }
 0x213   : > { %v2217_v3 = vadd.f32 -1.4531521, %v2185_v5  ;;  %v3773_v45 = vpop.eup %3772  ;;  %v2144_v61 = vsub.f32 2.0, %v2112_v44  ;;  %v2692_v10 = vadd.f32 1.0, %v2660_v27  ;;  %v2629_v8 = vsub.f32 1.0, %v2597_v60  ;;  %v6666_v27 = vld [vmem:[#allocation31_spill] sm:$0xff] }
 0x214   : > { %v2280_v4 = vadd.f32 1.4214138, %v2248_v16  ;;  %v2438_v26 = vmul.f32 %v2406_v39, %v6651_v57  ;;  %v2375_v53 = vmul.f32 %v2343_v30, %v6654_v35  ;;  %v5803_v29 = vmul.f32 0.5, %v6664_v62 }
 0x215   : > { %v2249_v6 = vmul.f32 %v2217_v3, %v6662_v58  ;;  %3780 = vrcp.f32 %v5795_v37  ;;  %v2724_v21 = vmul.f32 %v2692_v10, %v5726_v0  ;;  %v2661_v7 = vmul.f32 %v2629_v8, %v1925_v22  ;;  %v2791_v8 = vpop.permute.xlu0 %2790  ;;  %v6667_v3 = vld [vmem:[#allocation7_spill] sm:$0xff] }
 0x216   : > { %v2312_v5 = vmul.f32 %v2280_v4, %v6658_v34  ;;  %v5809_v44 = vpop.eup %3774  ;;  %v5811_v55 = vmul.f32 1.442695, %v2531_v11  ;;  %v2598_v39 = vmul.f32 %v6665_v59, %v2438_v26  ;;  %v2407_v57 = vadd.f32 0.2548296, %v2375_v53  ;;  %v6668_v53 = vld [vmem:[#allocation41_spill] sm:$0xff] }
 0x217   : > { %v2281_v30 = vadd.f32 1.4214138, %v2249_v6  ;;  %v5814_v19 = vpop.eup %3776  ;;  %v2884_v62 = vmul.f32 %v2789_v47, %v2724_v21  ;;  %v2693_v49 = vadd.f32 1.0, %v2661_v7  ;;  %vm1896_vm11 = vcmp.ge.f32.partialorder %v6666_v27, 0.0 }
 0x218   : > { %v2344_v14 = vadd.f32 -0.28449672, %v2312_v5  ;;  %v2114_v10 = vmul.f32 %v3773_v45, %v5721_v48  ;;  %v2630_v0 = vsub.f32 1.0, %v2598_v39  ;;  %v2439_v22 = vmul.f32 %v2407_v57, %v6654_v35  ;;  %v2793_v5 = vpop.permute.xlu1 %2792 }
 0x219   : > { %v2313_v60 = vmul.f32 %v2281_v30, %v6662_v58  ;;  %v5820_v16 = vpop.eup %3778  ;;  %v5822_v26 = vmul.f32 %v3767_v1, %v2144_v61  ;;  %3578 = vmatprep.mubr.msk.f32.mxu1 %vm2924_vm10, %v2884_v62  ;;  %v2725_v11 = vmul.f32 %v2693_v49, %v5740_v43  ;;  %v2186_v4 = vmul.f32 1.0614054, %v6667_v3  ;;  %v6669_v61 = vld [vmem:[#allocation34_spill] sm:$0xff]  ;;  %v6670_v62 = vld [vmem:[#allocation32_spill] sm:$0xff] }
 0x21a   : > { %v2376_v47 = vmul.f32 %v2344_v14, %v6658_v34  ;;  %v2662_v48 = vmul.f32 %v2630_v0, %v5773_v15  ;;  %v2599_v6 = vmul.f32 %v6668_v53, %v2439_v22  ;;  %v1928_v35 = vsel %vm1896_vm11, 1.0, %v6661_v18  ;;  %v6671_v14 = vld [vmem:[#allocation15_spill] sm:$0xff] }
 0x21b   : > { %v2345_v21 = vadd.f32 -0.28449672, %v2313_v60  ;;  %v2885_v7 = vmul.f32 %v2791_v8, %v2725_v11  ;;  %vm1897_vm12 = vcmp.ge.f32.partialorder %v6669_v61, 0.0  ;;  %v2218_v1 = vadd.f32 -1.4531521, %v2186_v4  ;;  %v6672_v11 = vld [vmem:[#allocation43_spill] sm:$0xff] }
 0x21c   : > { %v2408_v59 = vadd.f32 0.2548296, %v2376_v47  ;;  %v2146_v39 = vsub.f32 2.0, %v2114_v10  ;;  %v2694_v57 = vadd.f32 1.0, %v2662_v48  ;;  %v2631_v43 = vsub.f32 1.0, %v2599_v6 }
 0x21d   : > { %v2377_v30 = vmul.f32 %v2345_v21, %v6662_v58  ;;  %3579 = vmatmul.mubr.msk.f32.vlgmr.msra.gmra.mxu1 %vm2924_vm10, %v2885_v7  ;;  %v1833_v49 = vmul.f32 0.5, %v6670_v62  ;;  %v2250_v27 = vmul.f32 %v2218_v1, %v6667_v3  ;;  %v2187_v8 = vmul.f32 1.0614054, %v6671_v14  ;;  %v2795_v7 = vpop.permute.xlu1 %2794  ;;  %v6673_v1 = vld [vmem:[#allocation11_spill] sm:$0xff] }
 0x21e   : > { %v2440_v15 = vmul.f32 %v2408_v59, %v6658_v34  ;;  %v5840_v0 = vmul.f32 %v5814_v19, %v5748_v40  ;;  %v2726_v10 = vmul.f32 %v2694_v57, %v5760_v9  ;;  %v2663_v22 = vmul.f32 %v2631_v43, %v5791_v52 }
 0x21f   : > { %v2409_v60 = vadd.f32 0.2548296, %v2377_v30  ;;  %v1929_v34 = vsel %vm1897_vm12, 1.0, %v6661_v18  ;;  %v2282_v4 = vadd.f32 1.4214138, %v2250_v27  ;;  %v5848_v53 = vmul.f32 %v3773_v45, %v2146_v39  ;;  %v6675_v30 = vld [vmem:[#allocation39_spill] sm:$0xff] }
 0x220   : > { %v2600_v47 = vmul.f32 %v6672_v11, %v2440_v15  ;;  %v2219_v48 = vadd.f32 -1.4531521, %v2187_v8  ;;  %v2886_v6 = vmul.f32 %v2793_v5, %v2726_v10  ;;  %v2695_v21 = vadd.f32 1.0, %v2663_v22  ;;  %v6674_v5 = vld [vmem:[#allocation4_spill] sm:$0xff]  ;;  %v6676_v22 = vld [vmem:[#allocation38_spill] sm:$0xff]  ;;  %v6677_v11 = vld [vmem:[#allocation67_spill] sm:$0xff] }
 0x221   : > { %v2441_v40 = vmul.f32 %v2409_v60, %v6662_v58  ;;  %v2314_v9 = vmul.f32 %v2282_v4, %v6667_v3  ;;  %v2188_v57 = vmul.f32 1.0614054, %v6673_v1  ;;  %v2145_v61 = vsub.f32 2.0, %v5840_v0 }
 0x222   : > { %v2632_v59 = vsub.f32 1.0, %v2600_v47  ;;  %v2251_v52 = vmul.f32 %v2219_v48, %v6671_v14  ;;  %v5854_v43 = vpop.eup %3780  ;;  %3581 = vmatprep.mubr.msk.f32.mxu1 %vm2924_vm10, %v2886_v6  ;;  %v2727_v45 = vmul.f32 %v2695_v21, %v5783_v42  ;;  %vm1898_vm13 = vcmp.ge.f32.partialorder %v6675_v30, 0.0  ;;  %v2797_v21 = vpop.permute.xlu0 %2796 }
 0x223   : > { %v2601_v39 = vmul.f32 %v6674_v5, %v2441_v40  ;;  %v2346_v15 = vadd.f32 -0.28449672, %v2314_v9  ;;  %v2220_v27 = vadd.f32 -1.4531521, %v2188_v57  ;;  %v5862_v60 = vmul.f32 0.5, %v6676_v22 }
 0x224   : > { %v2664_v58 = vmul.f32 %v2632_v59, %v1928_v35  ;;  %v2283_v62 = vadd.f32 1.4214138, %v2251_v52  ;;  %v2887_v8 = vmul.f32 %v2795_v7, %v2727_v45  ;;  %v2189_v47 = vmul.f32 1.0614054, %v6677_v11 }
 0x225   : > { %v2633_v10 = vsub.f32 1.0, %v2601_v39  ;;  %v2378_v48 = vmul.f32 %v2346_v15, %v6667_v3  ;;  %v2252_v6 = vmul.f32 %v2220_v27, %v6673_v1  ;;  %v5870_v35 = vmul.f32 %v5854_v43, %v5795_v37  ;;  %v6678_v39 = vld [vmem:[#allocation44_spill] sm:$0xff] }
 0x226   : > { %v2696_v4 = vadd.f32 1.0, %v2664_v58  ;;  %v2315_v42 = vmul.f32 %v2283_v62, %v6671_v14  ;;  %3582 = vmatmul.mubr.msk.f32.gmra.mxu1 %vm2924_vm10, %v2887_v8  ;;  %v1930_v7 = vsel %vm1898_vm13, 1.0, %v6661_v18  ;;  %v2221_v59 = vadd.f32 -1.4531521, %v2189_v47  ;;  %v6679_v15 = vld [vmem:[#allocation68_spill] sm:$0xff] }
 0x227   : > { %v2665_v40 = vmul.f32 %v2633_v10, %v1929_v34  ;;  %v2410_v52 = vadd.f32 0.2548296, %v2378_v48  ;;  %v2284_v45 = vadd.f32 1.4214138, %v2252_v6  ;;  %v5878_v58 = vmul.f32 0.5, %v6678_v39  ;;  %v2799_v34 = vpop.permute.xlu1 %2798  ;;  %v6680_v48 = vld [vmem:[#allocation6_spill] sm:$0xff] }
 0x228   : > { %v2728_v9 = vmul.f32 %v2696_v4, %v5803_v29  ;;  %v2347_v57 = vadd.f32 -0.28449672, %v2315_v42  ;;  %v2253_v37 = vmul.f32 %v2221_v59, %v6677_v11  ;;  %v2190_v62 = vmul.f32 1.0614054, %v6679_v15  ;;  %v6681_v6 = vld [vmem:[#allocation3_spill] sm:$0xff] }
 0x229   : > { %v2697_v5 = vadd.f32 1.0, %v2665_v40  ;;  %v2442_v8 = vmul.f32 %v2410_v52, %v6667_v3  ;;  %v2316_v10 = vmul.f32 %v2284_v45, %v6673_v1  ;;  %v2147_v29 = vsub.f32 2.0, %v5870_v35 }
 0x22a   : > { %v2888_v27 = vmul.f32 %v2797_v21, %v2728_v9  ;;  %v2379_v30 = vmul.f32 %v2347_v57, %v6671_v14  ;;  %v2285_v47 = vadd.f32 1.4214138, %v2253_v37  ;;  %v2222_v4 = vadd.f32 -1.4531521, %v2190_v62  ;;  %v6682_v9 = vld [vmem:[#allocation48_spill] sm:$0xff]  ;;  %v6684_v62 = vld [vmem:[#allocation46_spill] sm:$0xff] }
 0x22b   : > { %v2729_v22 = vmul.f32 %v2697_v5, %v1833_v49  ;;  %v2602_v42 = vmul.f32 %v6680_v48, %v2442_v8  ;;  %vm1899_vm14 = vcmp.ge.f32.partialorder %v6681_v6, 0.0  ;;  %v2348_v21 = vadd.f32 -0.28449672, %v2316_v10  ;;  %v6683_v5 = vld [vmem:[#allocation74_spill] sm:$0xff]  ;;  %v6686_v6 = vld [vmem:[#allocation25_spill] sm:$0xff] }
 0x22c   : > { %3584 = vmatprep.mubr.msk.f32.mxu1 %vm2924_vm10, %v2888_v27  ;;  %v2411_v40 = vadd.f32 0.2548296, %v2379_v30  ;;  %vm1900_vm15 = vcmp.ge.f32.partialorder %v6682_v9, 0.0  ;;  %v2317_v3 = vmul.f32 %v2285_v47, %v6677_v11  ;;  %v2254_v52 = vmul.f32 %v2222_v4, %v6679_v15  ;;  %v6685_v10 = vld [vmem:[#allocation58_spill] sm:$0xff] }
 0x22d   : > { %v2889_v59 = vmul.f32 %v2799_v34, %v2729_v22  ;;  %v2634_v57 = vsub.f32 1.0, %v2602_v42  ;;  %v2380_v45 = vmul.f32 %v2348_v21, %v6673_v1  ;;  %v2191_v39 = vmul.f32 1.0614054, %v6683_v5 }
 0x22e   : > { %v2443_v49 = vmul.f32 %v2411_v40, %v6671_v14  ;;  %v1931_v37 = vsel %vm1899_vm14, 1.0, %v6661_v18  ;;  %v1836_v27 = vmul.f32 0.5, %v6684_v62  ;;  %v2349_v34 = vadd.f32 -0.28449672, %v2317_v3 }
 0x22f   : > { %3585 = vmatmul.mubr.msk.f32.gmra.mxu1 %vm2924_vm10, %v2889_v59  ;;  %v2286_v8 = vadd.f32 1.4214138, %v2254_v52  ;;  %v2666_v30 = vmul.f32 %v2634_v57, %v1930_v7  ;;  %v2412_v47 = vadd.f32 0.2548296, %v2380_v45  ;;  %v2223_v4 = vadd.f32 -1.4531521, %v2191_v39  ;;  %v2801_v57 = vpop.permute.xlu0 %2800 }
 0x230   : > { %v2603_v22 = vmul.f32 %v6685_v10, %v2443_v49  ;;  %v1932_v14 = vsel %vm1900_vm15, 1.0, %v6661_v18  ;;  %v2381_v48 = vmul.f32 %v2349_v34, %v6677_v11  ;;  %v2192_v40 = vmul.f32 1.0614054, %v6686_v6  ;;  %v6687_v34 = vld [vmem:[#allocation60_spill] sm:$0xff] }
 0x231   : > { %v2318_v42 = vmul.f32 %v2286_v8, %v6679_v15  ;;  %v2698_v21 = vadd.f32 1.0, %v2666_v30  ;;  %v2444_v3 = vmul.f32 %v2412_v47, %v6673_v1  ;;  %v2255_v7 = vmul.f32 %v2223_v4, %v6683_v5  ;;  %v6688_v10 = vld [vmem:[#allocation52_spill] sm:$0xff] }
 0x232   : > { %v2635_v59 = vsub.f32 1.0, %v2603_v22  ;;  %v5910_v52 = vmul.f32 %v5814_v19, %v2145_v61  ;;  %v2413_v9 = vadd.f32 0.2548296, %v2381_v48  ;;  %v2224_v45 = vadd.f32 -1.4531521, %v2192_v40  ;;  %v2803_v48 = vpop.permute.xlu1 %2802 }
 0x233   : > { %v2350_v49 = vadd.f32 -0.28449672, %v2318_v42  ;;  %v2730_v39 = vmul.f32 %v2698_v21, %v5862_v60  ;;  %v2604_v8 = vmul.f32 %v6687_v34, %v2444_v3  ;;  %v2287_v30 = vadd.f32 1.4214138, %v2255_v7  ;;  %v6689_v42 = vld [vmem:[#allocation9_spill] sm:$0xff] }
 0x234   : > { %v2667_v62 = vmul.f32 %v2635_v59, %v1931_v37  ;;  %vm1901_vm0 = vcmp.ge.f32.partialorder %v6688_v10, 0.0  ;;  %v2445_v1 = vmul.f32 %v2413_v9, %v6677_v11  ;;  %v2256_v0 = vmul.f32 %v2224_v45, %v6686_v6  ;;  %v6690_v37 = vld [vmem:[#allocation22_spill] sm:$0xff] }
 0x235   : > { %v2382_v22 = vmul.f32 %v2350_v49, %v6679_v15  ;;  %v2890_v19 = vmul.f32 %v2801_v57, %v2730_v39  ;;  %v2636_v47 = vsub.f32 1.0, %v2604_v8  ;;  %v2319_v4 = vmul.f32 %v2287_v30, %v6683_v5  ;;  %v6691_v8 = vld [vmem:[#allocation54_spill] sm:$0xff] }
 0x236   : > { %v2699_v61 = vadd.f32 1.0, %v2667_v62  ;;  %v1837_v60 = vmul.f32 0.5, %v6689_v42  ;;  %v2605_v40 = vmul.f32 %v6690_v37, %v2445_v1  ;;  %v2288_v59 = vadd.f32 1.4214138, %v2256_v0  ;;  %v6692_v1 = vld [vmem:[#allocation66_spill] sm:$0xff] }
 0x237   : > { %v2414_v21 = vadd.f32 0.2548296, %v2382_v22  ;;  %3587 = vmatprep.mubr.msk.f32.mxu1 %vm2924_vm10, %v2890_v19  ;;  %v2668_v3 = vmul.f32 %v2636_v47, %v1932_v14  ;;  %v1933_v7 = vsel %vm1901_vm0, 1.0, %v6661_v18  ;;  %v2351_v57 = vadd.f32 -0.28449672, %v2319_v4 }
 0x238   : > { %v2731_v11 = vmul.f32 %v2699_v61, %v5878_v58  ;;  %v2637_v9 = vsub.f32 1.0, %v2605_v40  ;;  %v2320_v45 = vmul.f32 %v2288_v59, %v6686_v6  ;;  %v2193_v39 = vmul.f32 1.0614054, %v5164_v54  ;;  %v2805_v58 = vpop.permute.xlu0 %2804  ;;  %v2807_v59 = vpop.permute.xlu1 %2806 }
 0x239   : > { %v2446_v49 = vmul.f32 %v2414_v21, %v6679_v15  ;;  %v2700_v34 = vadd.f32 1.0, %v2668_v3  ;;  %vm1902_vm2 = vcmp.ge.f32.partialorder %v6691_v8, 0.0  ;;  %v2383_v30 = vmul.f32 %v2351_v57, %v6683_v5  ;;  %v6693_v15 = vld [vmem:[#allocation53_spill] sm:$0xff] }
 0x23a   : > { %v2891_v62 = vmul.f32 %v2803_v48, %v2731_v11  ;;  %v2669_v14 = vmul.f32 %v2637_v9, %v1933_v7  ;;  %v2352_v10 = vadd.f32 -0.28449672, %v2320_v45  ;;  %v2225_v0 = vadd.f32 -1.4531521, %v2193_v39  ;;  %v6694_v45 = vld [vmem:[#allocation59_spill] sm:$0xff]  ;;  %v6695_v39 = vld [vmem:[#allocation18_spill] sm:$0xff] }
 0x23b   : > { %v2606_v22 = vmul.f32 %v6692_v1, %v2446_v49  ;;  %v2732_v19 = vmul.f32 %v2700_v34, %v1836_v27  ;;  %v1838_v61 = vmul.f32 0.5, %v6693_v15  ;;  %v2415_v47 = vadd.f32 0.2548296, %v2383_v30  ;;  %v6696_v34 = vld [vmem:[#allocation63_spill] sm:$0xff]  ;;  %v6697_v1 = vld [vmem:[#allocation57_spill] sm:$0xff] }
 0x23c   : > { %3588 = vmatmul.mubr.msk.f32.gmra.mxu1 %vm2924_vm10, %v2891_v62  ;;  %v2194_v4 = vmul.f32 1.0614054, %v5171_v63  ;;  %v2701_v48 = vadd.f32 1.0, %v2669_v14  ;;  %v2384_v37 = vmul.f32 %v2352_v10, %v6686_v6  ;;  %v2257_v40 = vmul.f32 %v2225_v0, %v5164_v54 }
 0x23d   : > { %v2638_v42 = vsub.f32 1.0, %v2606_v22  ;;  %v2892_v21 = vmul.f32 %v2805_v58, %v2732_v19  ;;  %v1934_v11 = vsel %vm1902_vm2, 1.0, %v6661_v18  ;;  %v2447_v27 = vmul.f32 %v2415_v47, %v6683_v5 }
 0x23e   : > { %v2226_v3 = vadd.f32 -1.4531521, %v2194_v4  ;;  %v2733_v7 = vmul.f32 %v2701_v48, %v1837_v60  ;;  %v2416_v9 = vadd.f32 0.2548296, %v2384_v37  ;;  %v2289_v49 = vadd.f32 1.4214138, %v2257_v40  ;;  %v2809_v60 = vpop.permute.xlu0 %2808 }
 0x23f   : > { %v2670_v57 = vmul.f32 %v2638_v42, %v1934_v11  ;;  %3590 = vmatprep.mubr.msk.f32.mxu1 %vm2924_vm10, %v2892_v21  ;;  %vm1903_vm3 = vcmp.ge.f32.partialorder %v6694_v45, 0.0  ;;  %v2607_v62 = vmul.f32 %v6695_v39, %v2447_v27  ;;  %vm1904_vm4 = vcmp.ge.f32.partialorder %v6696_v34, 0.0  ;;  %v6698_v4 = vld [vmem:[#allocation77_spill] sm:$0xff]  ;;  %v2811_v45 = vpop.permute.xlu1 %2810  ;;  %v6701_v39 = vld [vmem:[#allocation62_spill] sm:$0xff] }
 0x240   : > { %v2258_v30 = vmul.f32 %v2226_v3, %v5171_v63  ;;  %v2893_v58 = vmul.f32 %v2807_v59, %v2733_v7  ;;  %v2448_v14 = vmul.f32 %v2416_v9, %v6686_v6  ;;  %v2321_v5 = vmul.f32 %v2289_v49, %v5164_v54  ;;  %v6699_v27 = vld [vmem:[#allocation17_spill] sm:$0xff]  ;;  %v6700_v9 = vld [vmem:[#allocation87_spill] sm:$0xff] }
 0x241   : > { %v2702_v8 = vadd.f32 1.0, %v2670_v57  ;;  %v1839_v22 = vmul.f32 0.5, %v6697_v1  ;;  %v2639_v10 = vsub.f32 1.0, %v2607_v62  ;;  %v2195_v19 = vmul.f32 1.0614054, %v5268_v13 }
 0x242   : > { %v2290_v0 = vadd.f32 1.4214138, %v2258_v30  ;;  %3591 = vmatmul.mubr.msk.f32.gmra.mxu1 %vm2924_vm10, %v2893_v58  ;;  %v1935_v47 = vsel %vm1903_vm3, 1.0, %v6661_v18  ;;  %v2608_v48 = vmul.f32 %v6698_v4, %v2448_v14  ;;  %v2353_v42 = vadd.f32 -0.28449672, %v2321_v5  ;;  %v6702_v30 = vld [vmem:[#allocation65_spill] sm:$0xff]  ;;  %v2813_v4 = vpop.permute.xlu0 %2812 }
 0x243   : > { %v2734_v15 = vmul.f32 %v2702_v8, %v1838_v61  ;;  %v2671_v37 = vmul.f32 %v2639_v10, %v1935_v47  ;;  %v1936_v6 = vsel %vm1904_vm4, 1.0, %v6661_v18  ;;  %v2227_v21 = vadd.f32 -1.4531521, %v2195_v19 }
 0x244   : > { %v2322_v40 = vmul.f32 %v2290_v0, %v5171_v63  ;;  %v2640_v11 = vsub.f32 1.0, %v2608_v48  ;;  %vm1905_vm5 = vcmp.ge.f32.partialorder %v6699_v27, 0.0  ;;  %v2385_v61 = vmul.f32 %v2353_v42, %v5164_v54  ;;  %v6705_v27 = vld [vmem:[#allocation70_spill] sm:$0xff] }
 0x245   : > { %v2894_v59 = vmul.f32 %v2809_v60, %v2734_v15  ;;  %v2703_v3 = vadd.f32 1.0, %v2671_v37  ;;  %v2259_v57 = vmul.f32 %v2227_v21, %v5268_v13  ;;  %v2196_v49 = vmul.f32 1.0614054, %v6700_v9  ;;  %v6704_v21 = vld [vmem:[#allocation69_spill] sm:$0xff] }
 0x246   : > { %v2354_v7 = vadd.f32 -0.28449672, %v2322_v40  ;;  %v1840_v62 = vmul.f32 0.5, %v6701_v39  ;;  %v2672_v34 = vmul.f32 %v2640_v11, %v1936_v6  ;;  %v1841_v58 = vmul.f32 0.5, %v6702_v30  ;;  %v6703_v6 = vld [vmem:[#allocation80_spill] sm:$0xff]  ;;  %v6707_v39 = vld [vmem:[#allocation82_spill] sm:$0xff] }
 0x247   : > { %3593 = vmatprep.mubr.msk.f32.mxu1 %vm2924_vm10, %v2894_v59  ;;  %v2417_v8 = vadd.f32 0.2548296, %v2385_v61  ;;  %v2735_v14 = vmul.f32 %v2703_v3, %v1839_v22  ;;  %v2291_v60 = vadd.f32 1.4214138, %v2259_v57  ;;  %v2228_v1 = vadd.f32 -1.4531521, %v2196_v49 }
 0x248   : > { %v2386_v5 = vmul.f32 %v2354_v7, %v5171_v63  ;;  %v2704_v10 = vadd.f32 1.0, %v2672_v34  ;;  %v1937_v0 = vsel %vm1905_vm5, 1.0, %v6661_v18  ;;  %v2197_v15 = vmul.f32 1.0614054, %v5352_v56  ;;  %v6706_v49 = vld [vmem:[#allocation76_spill] sm:$0xff] }
 0x249   : > { %v2449_v19 = vmul.f32 %v2417_v8, %v5164_v54  ;;  %v2895_v47 = vmul.f32 %v2811_v45, %v2735_v14  ;;  %v2323_v42 = vmul.f32 %v2291_v60, %v5268_v13  ;;  %v2260_v22 = vmul.f32 %v2228_v1, %v6700_v9  ;;  %v6708_v8 = vld [vmem:[#allocation89_spill] sm:$0xff] }
 0x24a   : > { %v2418_v48 = vadd.f32 0.2548296, %v2386_v5  ;;  %v2736_v37 = vmul.f32 %v2704_v10, %v1840_v62  ;;  %v1842_v59 = vmul.f32 0.5, %v6704_v21  ;;  %v2229_v11 = vadd.f32 -1.4531521, %v2197_v15  ;;  %v6709_v60 = vld [vmem:[#allocation73_spill] sm:$0xff] }
 0x24b   : > { %v2609_v40 = vmul.f32 %v6703_v6, %v2449_v19  ;;  %3594 = vmatmul.mubr.msk.f32.gmra.mxu1 %vm2924_vm10, %v2895_v47  ;;  %vm1906_vm6 = vcmp.ge.f32.partialorder %v6705_v27, 0.0  ;;  %v2355_v61 = vadd.f32 -0.28449672, %v2323_v42  ;;  %v2292_v3 = vadd.f32 1.4214138, %v2260_v22 }
 0x24c   : > { %v2450_v54 = vmul.f32 %v2418_v48, %v5171_v63  ;;  %v2896_v7 = vmul.f32 %v2813_v4, %v2736_v37  ;;  %vm1907_vm7 = vcmp.ge.f32.partialorder %v6706_v49, 0.0  ;;  %v2261_v45 = vmul.f32 %v2229_v11, %v5352_v56  ;;  %v6710_v37 = vld [vmem:[#allocation91_spill] sm:$0xff]  ;;  %v6711_v11 = vld [vmem:[#allocation78_spill] sm:$0xff] }
 0x24d   : > { %v2641_v57 = vsub.f32 1.0, %v2609_v40  ;;  %v2387_v34 = vmul.f32 %v2355_v61, %v5268_v13  ;;  %v2324_v30 = vmul.f32 %v2292_v3, %v6700_v9  ;;  %v2198_v14 = vmul.f32 1.0614054, %v6708_v8  ;;  %v2815_v40 = vpop.permute.xlu1 %2814  ;;  %v6712_v49 = vld [vmem:[#allocation50_spill] sm:$0xff] }
 0x24e   : > { %v2610_v62 = vmul.f32 %v6707_v39, %v2450_v54  ;;  %3596 = vmatprep.mubr.msk.f32.mxu1 %vm2924_vm10, %v2896_v7  ;;  %v1938_v63 = vsel %vm1906_vm6, 1.0, %v6661_v18  ;;  %v1843_v1 = vmul.f32 0.5, %v6709_v60  ;;  %v2293_v10 = vadd.f32 1.4214138, %v2261_v45  ;;  %v6713_v39 = vld [vmem:[#allocation24_spill] sm:$0xff] }
 0x24f   : > { %v2673_v5 = vmul.f32 %v2641_v57, %v1937_v0  ;;  %v1939_v15 = vsel %vm1907_vm7, 1.0, %v6661_v18  ;;  %v2419_v47 = vadd.f32 0.2548296, %v2387_v34  ;;  %v2356_v4 = vadd.f32 -0.28449672, %v2324_v30 }
 0x250   : > { %v2642_v19 = vsub.f32 1.0, %v2610_v62  ;;  %v2325_v42 = vmul.f32 %v2293_v10, %v5352_v56  ;;  %v2230_v22 = vadd.f32 -1.4531521, %v2198_v14  ;;  %v2199_v6 = vmul.f32 1.0614054, %v6710_v37  ;;  %v2817_v14 = vpop.permute.xlu0 %2816 }
 0x251   : > { %v2705_v48 = vadd.f32 1.0, %v2673_v5  ;;  %v2451_v0 = vmul.f32 %v2419_v47, %v5268_v13  ;;  %vm1908_vm8 = vcmp.ge.f32.partialorder %v6711_v11, 0.0  ;;  %v2388_v27 = vmul.f32 %v2356_v4, %v6700_v9 }
 0x252   : > { %v2674_v21 = vmul.f32 %v2642_v19, %v1938_v63  ;;  %v2357_v61 = vadd.f32 -0.28449672, %v2325_v42  ;;  %v2262_v3 = vmul.f32 %v2230_v22, %v6708_v8  ;;  %v2231_v7 = vadd.f32 -1.4531521, %v2199_v6  ;;  %v6714_v42 = vld [vmem:[#allocation14_spill] sm:$0xff] }
 0x253   : > { %v2737_v54 = vmul.f32 %v2705_v48, %v1841_v58  ;;  %v2611_v45 = vmul.f32 %v6712_v49, %v2451_v0  ;;  %v1844_v62 = vmul.f32 0.5, %v6713_v39  ;;  %v2420_v34 = vadd.f32 0.2548296, %v2388_v27 }
 0x254   : > { %v2706_v57 = vadd.f32 1.0, %v2674_v21  ;;  %v2389_v5 = vmul.f32 %v2357_v61, %v5352_v56  ;;  %v2294_v13 = vadd.f32 1.4214138, %v2262_v3  ;;  %v2263_v63 = vmul.f32 %v2231_v7, %v6710_v37  ;;  %v6715_v21 = vld [vmem:[#allocation86_spill] sm:$0xff]  ;;  %v6717_v7 = vld [vmem:[#allocation79_spill] sm:$0xff] }
 0x255   : > { %v2897_v30 = vmul.f32 %v2815_v40, %v2737_v54  ;;  %v2643_v10 = vsub.f32 1.0, %v2611_v45  ;;  %v1940_v58 = vsel %vm1908_vm8, 1.0, %v6661_v18  ;;  %v2452_v19 = vmul.f32 %v2420_v34, %v6700_v9  ;;  %v2819_v45 = vpop.permute.xlu1 %2818 }
 0x256   : > { %v2738_v60 = vmul.f32 %v2706_v57, %v1842_v59  ;;  %v2421_v47 = vadd.f32 0.2548296, %v2389_v5  ;;  %v2326_v4 = vmul.f32 %v2294_v13, %v6708_v8  ;;  %v2295_v48 = vadd.f32 1.4214138, %v2263_v63  ;;  %v6716_v59 = vld [vmem:[#allocation81_spill] sm:$0xff] }
 0x257   : > { %3597 = vmatmul.mubr.msk.f32.gmra.mxu1 %vm2924_vm10, %v2897_v30  ;;  %v2200_v22 = vmul.f32 1.0614054, %v6714_v42  ;;  %v2675_v40 = vmul.f32 %v2643_v10, %v1939_v15  ;;  %v2612_v0 = vmul.f32 %v6715_v21, %v2452_v19  ;;  %vm1909_vm9 = vcmp.ge.f32.partialorder %v6716_v59, 0.0  ;;  %v6718_v15 = vld [vmem:[#allocation56_spill] sm:$0xff] }
 0x258   : > { %v2898_v6 = vmul.f32 %v2817_v14, %v2738_v60  ;;  %v2453_v27 = vmul.f32 %v2421_v47, %v5352_v56  ;;  %v2358_v11 = vadd.f32 -0.28449672, %v2326_v4  ;;  %v2327_v54 = vmul.f32 %v2295_v48, %v6710_v37 }
 0x259   : > { %v2232_v9 = vadd.f32 -1.4531521, %v2200_v22  ;;  %v2707_v61 = vadd.f32 1.0, %v2675_v40  ;;  %v2644_v3 = vsub.f32 1.0, %v2612_v0  ;;  %v1845_v57 = vmul.f32 0.5, %v6717_v7  ;;  %v6719_v22 = vld [vmem:[#allocation84_spill] sm:$0xff]  ;;  %v2821_v40 = vpop.permute.xlu0 %2820 }
 0x25a   : > { %3599 = vmatprep.mubr.msk.f32.mxu1 %vm2924_vm10, %v2898_v6  ;;  %v2201_v49 = vmul.f32 1.0614054, %v5537_v46  ;;  %v2613_v39 = vmul.f32 %v6718_v15, %v2453_v27  ;;  %v2390_v34 = vmul.f32 %v2358_v11, %v6708_v8  ;;  %v2359_v30 = vadd.f32 -0.28449672, %v2327_v54  ;;  %v6720_v27 = vld [vmem:[#allocation85_spill] sm:$0xff] }
 0x25b   : > { %v2264_v56 = vmul.f32 %v2232_v9, %v6714_v42  ;;  %v2739_v14 = vmul.f32 %v2707_v61, %v1843_v1  ;;  %v2676_v5 = vmul.f32 %v2644_v3, %v1940_v58  ;;  %v1941_v13 = vsel %vm1909_vm9, 1.0, %v6661_v18  ;;  %v6721_v61 = vld [vmem:[#allocation5_spill] sm:$0xff] }
 0x25c   : > { %v2233_v63 = vadd.f32 -1.4531521, %v2201_v49  ;;  %v2645_v60 = vsub.f32 1.0, %v2613_v39  ;;  %v2422_v10 = vadd.f32 0.2548296, %v2390_v34  ;;  %v2391_v19 = vmul.f32 %v2359_v30, %v6710_v37 }
 0x25d   : > { %v2296_v47 = vadd.f32 1.4214138, %v2264_v56  ;;  %v2899_v4 = vmul.f32 %v2819_v45, %v2739_v14  ;;  %v2708_v48 = vadd.f32 1.0, %v2676_v5  ;;  %vm1910_vm11 = vcmp.ge.f32.partialorder %v6719_v22, 0.0  ;;  %v6722_v56 = vld [vmem:[#allocation64_spill] sm:$0xff] }
 0x25e   : > { %v2265_v6 = vmul.f32 %v2233_v63, %v5537_v46  ;;  %v2677_v21 = vmul.f32 %v2645_v60, %v1941_v13  ;;  %v2454_v1 = vmul.f32 %v2422_v10, %v6708_v8  ;;  %v2423_v58 = vadd.f32 0.2548296, %v2391_v19  ;;  %v6723_v10 = vld [vmem:[#allocation42_spill] sm:$0xff] }
 0x25f   : > { %v2328_v0 = vmul.f32 %v2296_v47, %v6714_v42  ;;  %v2740_v59 = vmul.f32 %v2708_v48, %v1844_v62  ;;  %3600 = vmatmul.mubr.msk.f32.gmra.mxu1 %vm2924_vm10, %v2899_v4  ;;  %vm1911_vm12 = vcmp.ge.f32.partialorder %v6720_v27, 0.0  ;;  %v2202_v54 = vmul.f32 1.0614054, %v5589_v32  ;;  %v2823_v62 = vpop.permute.xlu1 %2822  ;;  %v6724_v48 = vld [vmem:[#allocation83_spill] sm:$0xff] }
 0x260   : > { %v2297_v11 = vadd.f32 1.4214138, %v2265_v6  ;;  %v2709_v9 = vadd.f32 1.0, %v2677_v21  ;;  %v2614_v3 = vmul.f32 %v6721_v61, %v2454_v1  ;;  %v2455_v7 = vmul.f32 %v2423_v58, %v6710_v37  ;;  %v2825_v1 = vpop.permute.xlu0 %2824  ;;  %v6725_v58 = vld [vmem:[#allocation49_spill] sm:$0xff] }
 0x261   : > { %v2360_v49 = vadd.f32 -0.28449672, %v2328_v0  ;;  %v6030_v8 = vmul.f32 %v5854_v43, %v2147_v29  ;;  %v2900_v45 = vmul.f32 %v2821_v40, %v2740_v59  ;;  %v2234_v39 = vadd.f32 -1.4531521, %v2202_v54 }
 0x262   : > { %v2329_v15 = vmul.f32 %v2297_v11, %v5537_v46  ;;  %v2741_v34 = vmul.f32 %v2709_v9, %v1845_v57  ;;  %v2646_v30 = vsub.f32 1.0, %v2614_v3  ;;  %v2615_v14 = vmul.f32 %v6722_v56, %v2455_v7  ;;  %v6726_v3 = vld [vmem:[#allocation93_spill] sm:$0xff]  ;;  %v6727_v56 = vld [vmem:[#allocation55_spill] sm:$0xff] }
 0x263   : > { %v2392_v5 = vmul.f32 %v2360_v49, %v6714_v42  ;;  %3602 = vmatprep.mubr.msk.f32.mxu1 %vm2924_vm10, %v2900_v45  ;;  %v1942_v35 = vsel %vm1910_vm11, 1.0, %v6661_v18  ;;  %v1943_v43 = vsel %vm1911_vm12, 1.0, %v6661_v18  ;;  %v2266_v37 = vmul.f32 %v2234_v39, %v5589_v32  ;;  %v2827_v49 = vpop.permute.xlu1 %2826 }
 0x264   : > { %v2361_v29 = vadd.f32 -0.28449672, %v2329_v15  ;;  %v2901_v13 = vmul.f32 %v2823_v62, %v2741_v34  ;;  %v2678_v57 = vmul.f32 %v2646_v30, %v1942_v35  ;;  %v2647_v63 = vsub.f32 1.0, %v2615_v14  ;;  %v6728_v14 = vld [vmem:[#allocation96_spill] sm:$0xff] }
 0x265   : > { %v2424_v60 = vadd.f32 0.2548296, %v2392_v5  ;;  %vm1912_vm13 = vcmp.ge.f32.partialorder %v6723_v10, 0.0  ;;  %v2298_v47 = vadd.f32 1.4214138, %v2266_v37  ;;  %v1846_v22 = vmul.f32 0.5, %v6724_v48 }
 0x266   : > { %v2393_v19 = vmul.f32 %v2361_v29, %v5537_v46  ;;  %v2203_v4 = vmul.f32 1.0614054, %v5691_v38  ;;  %v2710_v6 = vadd.f32 1.0, %v2678_v57  ;;  %3603 = vmatmul.mubr.msk.f32.gmra.mxu1 %vm2924_vm10, %v2901_v13  ;;  %v2679_v40 = vmul.f32 %v2647_v63, %v1943_v43  ;;  %v6730_v48 = vld [vmem:[#allocation2_spill] sm:$0xff] }
 0x267   : > { %v2456_v21 = vmul.f32 %v2424_v60, %v6714_v42  ;;  %v1847_v0 = vmul.f32 0.5, %v6725_v58  ;;  %v2330_v27 = vmul.f32 %v2298_v47, %v5589_v32  ;;  %v1944_v61 = vsel %vm1912_vm13, 1.0, %v6661_v18 }
 0x268   : > { %v2425_v59 = vadd.f32 0.2548296, %v2393_v19  ;;  %v2235_v11 = vadd.f32 -1.4531521, %v2203_v4  ;;  %v2742_v54 = vmul.f32 %v2710_v6, %v1846_v22  ;;  %v2711_v9 = vadd.f32 1.0, %v2679_v40 }
 0x269   : > { %v2616_v7 = vmul.f32 %v6726_v3, %v2456_v21  ;;  %v2362_v62 = vadd.f32 -0.28449672, %v2330_v27  ;;  %v2204_v15 = vmul.f32 1.0614054, %v5700_v24  ;;  %vm1913_vm14 = vcmp.ge.f32.partialorder %v6727_v56, 0.0  ;;  %v2829_v21 = vpop.permute.xlu0 %2828 }
 0x26a   : > { %v2457_v45 = vmul.f32 %v2425_v59, %v5537_v46  ;;  %v2267_v42 = vmul.f32 %v2235_v11, %v5691_v38  ;;  %v2902_v39 = vmul.f32 %v2825_v1, %v2742_v54  ;;  %v2743_v34 = vmul.f32 %v2711_v9, %v1847_v0  ;;  %v6729_v46 = vld [vmem:[#allocation40_spill] sm:$0xff]  ;;  %v6731_v11 = vld [vmem:[#allocation90_spill] sm:$0xff] }
 0x26b   : > { %v2648_v30 = vsub.f32 1.0, %v2616_v7  ;;  %v2394_v35 = vmul.f32 %v2362_v62, %v5589_v32  ;;  %v2236_v29 = vadd.f32 -1.4531521, %v2204_v15  ;;  %v1848_v13 = vmul.f32 0.5, %v6729_v46  ;;  %v2831_v62 = vpop.permute.xlu1 %2830 }
 0x26c   : > { %v2617_v5 = vmul.f32 %v6728_v14, %v2457_v45  ;;  %v2299_v43 = vadd.f32 1.4214138, %v2267_v42  ;;  %3605 = vmatprep.mubr.msk.f32.mxu1 %vm2924_vm10, %v2902_v39  ;;  %v2903_v37 = vmul.f32 %v2827_v49, %v2743_v34  ;;  %v2205_v63 = vmul.f32 1.0614054, %v5717_v36  ;;  %v6732_v42 = vld [vmem:[#allocation88_spill] sm:$0xff] }
 0x26d   : > { %v2680_v57 = vmul.f32 %v2648_v30, %v1944_v61  ;;  %v2426_v10 = vadd.f32 0.2548296, %v2394_v35  ;;  %v2268_v47 = vmul.f32 %v2236_v29, %v5700_v24  ;;  %v1849_v22 = vmul.f32 0.5, %v6730_v48 }
 0x26e   : > { %v2649_v60 = vsub.f32 1.0, %v2617_v5  ;;  %v2331_v19 = vmul.f32 %v2299_v43, %v5691_v38  ;;  %3606 = vmatmul.mubr.msk.f32.gmra.mxu1 %vm2924_vm10, %v2903_v37  ;;  %v1945_v6 = vsel %vm1913_vm14, 1.0, %v6661_v18  ;;  %v2237_v40 = vadd.f32 -1.4531521, %v2205_v63  ;;  %v6733_v5 = vld [vmem:[#allocation92_spill] sm:$0xff] }
 0x26f   : > { %v2712_v4 = vadd.f32 1.0, %v2680_v57  ;;  %v2458_v58 = vmul.f32 %v2426_v10, %v5589_v32  ;;  %v2300_v59 = vadd.f32 1.4214138, %v2268_v47  ;;  %vm1914_vm15 = vcmp.ge.f32.partialorder %v6731_v11, 0.0  ;;  %v6734_v57 = vld [vmem:[#allocation8_spill] sm:$0xff] }
 0x270   : > { %v2681_v1 = vmul.f32 %v2649_v60, %v1945_v6  ;;  %v2363_v0 = vadd.f32 -0.28449672, %v2331_v19  ;;  %v2269_v54 = vmul.f32 %v2237_v40, %v5717_v36  ;;  %v2206_v9 = vmul.f32 1.0614054, %v5743_v23  ;;  %v6735_v60 = vld [vmem:[#allocation94_spill] sm:$0xff]  ;;  %v2833_v6 = vpop.permute.xlu0 %2832 }
 0x271   : > { %v2744_v27 = vmul.f32 %v2712_v4, %v1848_v13  ;;  %v2618_v3 = vmul.f32 %v5577_v51, %v2458_v58  ;;  %v2332_v49 = vmul.f32 %v2300_v59, %v5700_v24  ;;  %v1850_v32 = vmul.f32 0.5, %v6732_v42 }
 0x272   : > { %v2713_v61 = vadd.f32 1.0, %v2681_v1  ;;  %v2395_v7 = vmul.f32 %v2363_v0, %v5691_v38  ;;  %v2301_v15 = vadd.f32 1.4214138, %v2269_v54  ;;  %v2238_v39 = vadd.f32 -1.4531521, %v2206_v9 }
 0x273   : > { %v2904_v45 = vmul.f32 %v2829_v21, %v2744_v27  ;;  %v2650_v30 = vsub.f32 1.0, %v2618_v3  ;;  %v2364_v14 = vadd.f32 -0.28449672, %v2332_v49  ;;  %v1946_v51 = vsel %vm1914_vm15, 1.0, %v6661_v18 }
 0x274   : > { %v2745_v34 = vmul.f32 %v2713_v61, %v1849_v22  ;;  %v2427_v56 = vadd.f32 0.2548296, %v2395_v7  ;;  %vm1915_vm0 = vcmp.ge.f32.partialorder %v6733_v5, 0.0  ;;  %v2333_v35 = vmul.f32 %v2301_v15, %v5717_v36 }
 0x275   : > { %3608 = vmatprep.mubr.msk.f32.mxu1 %vm2924_vm10, %v2904_v45  ;;  %v2270_v43 = vmul.f32 %v2238_v39, %v5743_v23  ;;  %v2682_v37 = vmul.f32 %v2650_v30, %v1946_v51  ;;  %v2396_v13 = vmul.f32 %v2364_v14, %v5700_v24  ;;  %v1851_v63 = vmul.f32 0.5, %v6734_v57  ;;  %v2835_v14 = vpop.permute.xlu1 %2834 }
 0x276   : > { %v2905_v29 = vmul.f32 %v2831_v62, %v2745_v34  ;;  %v2459_v46 = vmul.f32 %v2427_v56, %v5691_v38  ;;  %vm1916_vm2 = vcmp.ge.f32.partialorder %v6735_v60, 0.0  ;;  %v2365_v10 = vadd.f32 -0.28449672, %v2333_v35  ;;  %v6737_v62 = vld [vmem:[#allocation71_spill] sm:$0xff] }
 0x277   : > { %v2302_v19 = vadd.f32 1.4214138, %v2270_v43  ;;  %v2714_v47 = vadd.f32 1.0, %v2682_v37  ;;  %v2428_v48 = vadd.f32 0.2548296, %v2396_v13  ;;  %v1947_v38 = vsel %vm1915_vm0, 1.0, %v6661_v18 }
 0x278   : > { %3609 = vmatmul.mubr.msk.f32.gmra.mxu1 %vm2924_vm10, %v2905_v29  ;;  %v2619_v4 = vmul.f32 %v5618_v25, %v2459_v46  ;;  %v2207_v22 = vmul.f32 1.0614054, %v5766_v17  ;;  %v2397_v40 = vmul.f32 %v2365_v10, %v5717_v36  ;;  %v2208_v1 = vmul.f32 1.0614054, %v5822_v26  ;;  %v6736_v25 = vld [vmem:[#allocation61_spill] sm:$0xff]  ;;  %v6738_v34 = vld [vmem:[#allocation95_spill] sm:$0xff] }
 0x279   : > { %v2334_v21 = vmul.f32 %v2302_v19, %v5743_v23  ;;  %v2746_v58 = vmul.f32 %v2714_v47, %v1850_v32  ;;  %v2460_v59 = vmul.f32 %v2428_v48, %v5700_v24  ;;  %v1852_v11 = vmul.f32 0.5, %v6736_v25  ;;  %v2837_v47 = vpop.permute.xlu0 %2836 }
 0x27a   : > { %v2651_v0 = vsub.f32 1.0, %v2619_v4  ;;  %v2239_v27 = vadd.f32 -1.4531521, %v2207_v22  ;;  %v1948_v54 = vsel %vm1916_vm2, 1.0, %v6661_v18  ;;  %v2429_v9 = vadd.f32 0.2548296, %v2397_v40 }
 0x27b   : > { %v2366_v61 = vadd.f32 -0.28449672, %v2334_v21  ;;  %v2906_v3 = vmul.f32 %v2833_v6, %v2746_v58  ;;  %v2620_v49 = vmul.f32 %v5670_v50, %v2460_v59  ;;  %vm1917_vm3 = vcmp.ge.f32.partialorder %v6737_v62, 0.0 }
 0x27c   : > { %v2683_v7 = vmul.f32 %v2651_v0, %v1947_v38  ;;  %v2271_v45 = vmul.f32 %v2239_v27, %v5766_v17  ;;  %v2461_v42 = vmul.f32 %v2429_v9, %v5717_v36  ;;  %v2240_v32 = vadd.f32 -1.4531521, %v2208_v1  ;;  %v2839_v27 = vpop.permute.xlu1 %2838 }
 0x27d   : > { %v2398_v24 = vmul.f32 %v2366_v61, %v5743_v23  ;;  %3611 = vmatprep.mubr.msk.f32.mxu1 %vm2924_vm10, %v2906_v3  ;;  %v2652_v39 = vsub.f32 1.0, %v2620_v49  ;;  %v1853_v30 = vmul.f32 0.5, %v6738_v34  ;;  %v2210_v35 = vmul.f32 1.0614054, %v5848_v53 }
 0x27e   : > { %v2715_v15 = vadd.f32 1.0, %v2683_v7  ;;  %v2303_v56 = vadd.f32 1.4214138, %v2271_v45  ;;  %v2621_v51 = vmul.f32 %v5745_v31, %v2461_v42  ;;  %v2272_v5 = vmul.f32 %v2240_v32, %v5822_v26 }
 0x27f   : > { %v2430_v50 = vadd.f32 0.2548296, %v2398_v24  ;;  %v2684_v36 = vmul.f32 %v2652_v39, %v1948_v54  ;;  %v1949_v29 = vsel %vm1917_vm3, 1.0, %v6661_v18  ;;  %v2242_v60 = vadd.f32 -1.4531521, %v2210_v35  ;;  %v2841_v24 = vpop.permute.xlu0 %2840 }
 0x280   : > { %v2747_v43 = vmul.f32 %v2715_v15, %v1851_v63  ;;  %v2335_v37 = vmul.f32 %v2303_v56, %v5766_v17  ;;  %v2653_v46 = vsub.f32 1.0, %v2621_v51  ;;  %v2304_v57 = vadd.f32 1.4214138, %v2272_v5 }
 0x281   : > { %v2462_v13 = vmul.f32 %v2430_v50, %v5743_v23  ;;  %v2716_v31 = vadd.f32 1.0, %v2684_v36  ;;  %vm1918_vm4 = vcmp.ge.f32.partialorder %v5560_v20, 0.0  ;;  %v2274_v22 = vmul.f32 %v2242_v60, %v5848_v53 }
 0x282   : > { %v2907_v10 = vmul.f32 %v2835_v14, %v2747_v43  ;;  %v2367_v19 = vadd.f32 -0.28449672, %v2335_v37  ;;  %v2685_v4 = vmul.f32 %v2653_v46, %v1949_v29  ;;  %v2336_v48 = vmul.f32 %v2304_v57, %v5822_v26  ;;  %v6740_v29 = vld [vmem:[#allocation12_spill] sm:$0xff] }
 0x283   : > { %v2622_v63 = vmul.f32 %v5751_v28, %v2462_v13  ;;  %v2748_v6 = vmul.f32 %v2716_v31, %v1852_v11  ;;  %v1854_v23 = vmul.f32 0.5, %v5549_v41  ;;  %v2209_v40 = vmul.f32 1.0614054, %v5910_v52 }
 0x284   : > { %3612 = vmatmul.mubr.msk.f32.gmra.mxu1 %vm2924_vm10, %v2907_v10  ;;  %v2399_v38 = vmul.f32 %v2367_v19, %v5766_v17  ;;  %v2717_v21 = vadd.f32 1.0, %v2685_v4  ;;  %v2368_v58 = vadd.f32 -0.28449672, %v2336_v48  ;;  %v2306_v0 = vadd.f32 1.4214138, %v2274_v22  ;;  %v2843_v10 = vpop.permute.xlu1 %2842  ;;  %v6741_v19 = vld [vmem:[#allocation75_spill] sm:$0xff] }
 0x285   : > { %v2654_v1 = vsub.f32 1.0, %v2622_v63  ;;  %v2908_v59 = vmul.f32 %v2837_v47, %v2748_v6  ;;  %v1950_v28 = vsel %vm1918_vm4, 1.0, %v6661_v18  ;;  %v2241_v11 = vadd.f32 -1.4531521, %v2209_v40  ;;  %v6742_v22 = vld [vmem:[#allocation23_spill] sm:$0xff]  ;;  %v2845_v40 = vpop.permute.xlu0 %2844 }
 0x286   : > { %v2431_v25 = vadd.f32 0.2548296, %v2399_v38  ;;  %v2749_v54 = vmul.f32 %v2717_v21, %v1853_v30  ;;  %v2400_v41 = vmul.f32 %v2368_v58, %v5822_v26  ;;  %v2338_v61 = vmul.f32 %v2306_v0, %v5848_v53 }
 0x287   : > { %v2686_v9 = vmul.f32 %v2654_v1, %v1950_v28  ;;  %3614 = vmatprep.mubr.msk.f32.mxu1 %vm2924_vm10, %v2908_v59  ;;  %vm1919_vm5 = vcmp.ge.f32.partialorder %v5602_v33, 0.0  ;;  %v2273_v7 = vmul.f32 %v2241_v11, %v5910_v52  ;;  %v2211_v49 = vmul.f32 1.0614054, %v6030_v8 }
 0x288   : > { %v2463_v3 = vmul.f32 %v2431_v25, %v5766_v17  ;;  %v2909_v20 = vmul.f32 %v2839_v27, %v2749_v54  ;;  %v2432_v62 = vadd.f32 0.2548296, %v2400_v41  ;;  %v2370_v42 = vadd.f32 -0.28449672, %v2338_v61 }
 0x289   : > { %v2718_v45 = vadd.f32 1.0, %v2686_v9  ;;  %v2305_v15 = vadd.f32 1.4214138, %v2273_v7  ;;  %v2243_v39 = vadd.f32 -1.4531521, %v2211_v49  ;;  %3782 = vpow2.f32 %v5811_v55  ;;  %v6739_v55 = vld [vmem:[#allocation10_spill] sm:$0xff] }
 0x28a   : > { %v2623_v32 = vmul.f32 %v5777_v12, %v2463_v3  ;;  %3615 = vmatmul.mubr.msk.f32.gmra.mxu1 %vm2924_vm10, %v2909_v20  ;;  %v2464_v17 = vmul.f32 %v2432_v62, %v5822_v26  ;;  %v2402_v30 = vmul.f32 %v2370_v42, %v5848_v53  ;;  %v1951_v56 = vsel %vm1919_vm5, 1.0, %v6661_v18  ;;  %v6744_v3 = vld [vmem:[#allocation36_spill] sm:$0xff]  ;;  %v2849_v62 = vpop.permute.xlu0 %2848 }
 0x28b   : > { %v2750_v34 = vmul.f32 %v2718_v45, %v1854_v23  ;;  %v2337_v51 = vmul.f32 %v2305_v15, %v5910_v52  ;;  %v2275_v12 = vmul.f32 %v2243_v39, %v6030_v8  ;;  %vm1920_vm6 = vcmp.ge.f32.partialorder %v5649_v2, 0.0  ;;  %v6745_v49 = vld [vmem:[#allocation72_spill] sm:$0xff]  ;;  %v2847_v45 = vpop.permute.xlu1 %2846 }
 0x28c   : > { %v2655_v14 = vsub.f32 1.0, %v2623_v32  ;;  %v2624_v5 = vmul.f32 %v6739_v55, %v2464_v17  ;;  %v2434_v35 = vadd.f32 0.2548296, %v2402_v30  ;;  %v1855_v37 = vmul.f32 0.5, %v6740_v29 }
 0x28d   : > { %v2910_v50 = vmul.f32 %v2841_v24, %v2750_v34  ;;  %v2369_v36 = vadd.f32 -0.28449672, %v2337_v51  ;;  %v2307_v26 = vadd.f32 1.4214138, %v2275_v12  ;;  %v1952_v57 = vsel %vm1920_vm6, 1.0, %v6661_v18 }
 0x28e   : > { %v2687_v43 = vmul.f32 %v2655_v14, %v1951_v56  ;;  %v2656_v33 = vsub.f32 1.0, %v2624_v5  ;;  %v2466_v46 = vmul.f32 %v2434_v35, %v5848_v53  ;;  %vm1922_vm7 = vcmp.ge.f32.partialorder %v6741_v19, 0.0  ;;  %v6747_v56 = vld [vmem:[#allocation13_spill] sm:$0xff] }
 0x28f   : > { %3617 = vmatprep.mubr.msk.f32.mxu1 %vm2924_vm10, %v2910_v50  ;;  %v2401_v60 = vmul.f32 %v2369_v36, %v5910_v52  ;;  %v2339_v2 = vmul.f32 %v2307_v26, %v6030_v8  ;;  %v1856_v6 = vmul.f32 0.5, %v6742_v22  ;;  %v1954_v21 = vsel %vm1922_vm7, 1.0, %v6661_v18  ;;  %v2851_v12 = vpop.permute.xlu1 %2850 }
 0x290   : > { %v2719_v13 = vadd.f32 1.0, %v2687_v43  ;;  %v2688_v31 = vmul.f32 %v2656_v33, %v1952_v57  ;;  %v2626_v47 = vmul.f32 %v5809_v44, %v2466_v46  ;;  %v6743_v44 = vld [vmem:[#allocation30_spill] sm:$0xff]  ;;  %vm1923_vm9 = vcmp.ge.f32.partialorder %v6744_v3, 0.0 }
 0x291   : > { %v2433_v63 = vadd.f32 0.2548296, %v2401_v60  ;;  %v2371_v48 = vadd.f32 -0.28449672, %v2339_v2  ;;  %vm1921_vm8 = vcmp.ge.f32.partialorder %v6743_v44, 0.0  ;;  %v1858_v20 = vmul.f32 0.5, %v6745_v49 }
 0x292   : > { %v2751_v4 = vmul.f32 %v2719_v13, %v1855_v37  ;;  %v2720_v23 = vadd.f32 1.0, %v2688_v31  ;;  %v2658_v53 = vsub.f32 1.0, %v2626_v47  ;;  %v1859_v14 = vmul.f32 0.5, %v6747_v56 }
 0x293   : > { %v2465_v1 = vmul.f32 %v2433_v63, %v5910_v52  ;;  %v2403_v58 = vmul.f32 %v2371_v48, %v6030_v8  ;;  %v1953_v52 = vsel %vm1921_vm8, 1.0, %v6661_v18 }
 0x294   : > { %v2911_v38 = vmul.f32 %v2843_v10, %v2751_v4  ;;  %v2752_v0 = vmul.f32 %v2720_v23, %v1856_v6  ;;  %v2690_v59 = vmul.f32 %v2658_v53, %v1954_v21 }
 0x295   : > { %v2625_v27 = vmul.f32 %v5820_v16, %v2465_v1  ;;  %v2435_v28 = vadd.f32 0.2548296, %v2403_v58  ;;  %v6746_v16 = vld [vmem:[#allocation97_spill] sm:$0xff] }
 0x296   : > { %3618 = vmatmul.mubr.msk.f32.gmra.mxu1 %vm2924_vm10, %v2911_v38  ;;  %v2912_v25 = vmul.f32 %v2845_v40, %v2752_v0  ;;  %v3783_v11 = vpop.eup %3782  ;;  %v2722_v41 = vadd.f32 1.0, %v2690_v59  ;;  %v1857_v42 = vmul.f32 0.5, %v6746_v16 }
 0x297   : > { %v2657_v54 = vsub.f32 1.0, %v2625_v27  ;;  %v2467_v9 = vmul.f32 %v2435_v28, %v6030_v8  ;;  %v1955_v8 = vsel %vm1923_vm9, 1.0, %v6661_v18  ;;  %v6179_v18 = vld [vmem:[%s6297_s6] ss:$0 sm:$0xff] }
 0x298   : > { %3620 = vmatprep.mubr.msk.f32.mxu1 %vm2924_vm10, %v2912_v25  ;;  %v2754_v15 = vmul.f32 %v2722_v41, %v1858_v20 }
 0x299   : > { %v2689_v61 = vmul.f32 %v2657_v54, %v1953_v52  ;;  %v2627_v7 = vmul.f32 %v3783_v11, %v2467_v9 }
 0x29a   : > { %v2914_v17 = vmul.f32 %v2849_v62, %v2754_v15 }
 0x29b   : > { %v2721_v24 = vadd.f32 1.0, %v2689_v61  ;;  %v2659_v32 = vsub.f32 1.0, %v2627_v7 }
 0x29d   : > { %v2753_v39 = vmul.f32 %v2721_v24, %v1857_v42  ;;  %v2691_v34 = vmul.f32 %v2659_v32, %v1955_v8 }
 0x29f   : > { %v2913_v30 = vmul.f32 %v2847_v45, %v2753_v39  ;;  %v2723_v51 = vadd.f32 1.0, %v2691_v34 }
 0x2a1   : > { %3621 = vmatmul.mubr.msk.f32.gmra.mxu1 %vm2924_vm10, %v2913_v30  ;;  %v2755_v50 = vmul.f32 %v2723_v51, %v1859_v14 }
 0x2a2   : > { %3623 = vmatprep.mubr.msk.f32.mxu1 %vm2924_vm10, %v2914_v17 }
 0x2a3   : > { %v2915_v55 = vmul.f32 %v2851_v12, %v2755_v50 }
 0x2a5   : > { %3624 = vmatmul.mubr.msk.f32.gmra.mxu1 %vm2924_vm10, %v2915_v55 }
 0x2dd   : > { %v3580_v5 = vpop.f32.mrf.mxu1 }
 0x2de   : > { %v3093_v35 = vadd.f32 %v3580_v5, %v6179_v18 }
 0x2df   : > { %v3087_v43 = vpop.f32.mrf.mxu1 }
 0x2e0   : > { %3247 = vst.msk [vmem:[%s6184_s16 + $0x8] sm:$0xff] %vm344_vm1, %v3093_v35  ;;  %v3088_v36 = vadd.f32 %v6179_v18, %v3087_v43 }
 0x2e2   : > { %3246 = vst.msk [vmem:[%s6184_s16] sm:$0xff] %vm344_vm1, %v3088_v36 }
 0x2e6   : > { %v3583_v26 = vpop.f32.mrf.mxu1 }
 0x2e7   : > { %v3103_v29 = vadd.f32 %v3583_v26, %v6179_v18 }
 0x2e8   : > { %v3097_v37 = vpop.f32.mrf.mxu1 }
 0x2e9   : > { %3249 = vst.msk [vmem:[%s6184_s16 + $0x18] sm:$0xff] %vm344_vm1, %v3103_v29  ;;  %v3098_v33 = vadd.f32 %v6179_v18, %v3097_v37 }
 0x2eb   : > { %3248 = vst.msk [vmem:[%s6184_s16 + $0x10] sm:$0xff] %vm344_vm1, %v3098_v33 }
 0x2ef   : > { %v3586_v46 = vpop.f32.mrf.mxu1 }
 0x2f0   : > { %v3113_v13 = vadd.f32 %v3586_v46, %v6179_v18 }
 0x2f1   : > { %v3107_v57 = vpop.f32.mrf.mxu1 }
 0x2f2   : > { %3251 = vst.msk [vmem:[%s6184_s16 + $0x28] sm:$0xff] %vm344_vm1, %v3113_v13  ;;  %v3108_v60 = vadd.f32 %v6179_v18, %v3107_v57 }
 0x2f4   : > { %3250 = vst.msk [vmem:[%s6184_s16 + $0x20] sm:$0xff] %vm344_vm1, %v3108_v60 }
 0x2fc   : > { %v3589_v2 = vpop.f32.mrf.mxu1 }
 0x2fd   : > { %v3123_v10 = vadd.f32 %v3589_v2, %v6179_v18 }
 0x2fe   : > { %v3117_v31 = vpop.f32.mrf.mxu1 }
 0x2ff   : > { %3253 = vst.msk [vmem:[%s6184_s16 + $0x38] sm:$0xff] %vm344_vm1, %v3123_v10  ;;  %v3118_v19 = vadd.f32 %v6179_v18, %v3117_v31 }
 0x301   : > { %3252 = vst.msk [vmem:[%s6184_s16 + $0x30] sm:$0xff] %vm344_vm1, %v3118_v19 }
 0x302   : > { %v3592_v47 = vpop.f32.mrf.mxu1 }
 0x303   : > { %v3133_v4 = vadd.f32 %v3592_v47, %v6179_v18 }
 0x304   : > { %v3127_v63 = vpop.f32.mrf.mxu1 }
 0x305   : > { %3255 = vst.msk [vmem:[%s6184_s16 + $0x48] sm:$0xff] %vm344_vm1, %v3133_v4  ;;  %v3128_v48 = vadd.f32 %v6179_v18, %v3127_v63 }
 0x307   : > { %3254 = vst.msk [vmem:[%s6184_s16 + $0x40] sm:$0xff] %vm344_vm1, %v3128_v48 }
 0x30b   : > { %v3595_v22 = vpop.f32.mrf.mxu1 }
 0x30c   : > { %v3143_v6 = vadd.f32 %v3595_v22, %v6179_v18 }
 0x30d   : > { %v3137_v23 = vpop.f32.mrf.mxu1 }
 0x30e   : > { %3257 = vst.msk [vmem:[%s6184_s16 + $0x58] sm:$0xff] %vm344_vm1, %v3143_v6  ;;  %v3138_v53 = vadd.f32 %v6179_v18, %v3137_v23 }
 0x310   : > { %3256 = vst.msk [vmem:[%s6184_s16 + $0x50] sm:$0xff] %vm344_vm1, %v3138_v53 }
 0x317   : > { %v3598_v38 = vpop.f32.mrf.mxu1 }
 0x318   : > { %v3153_v40 = vadd.f32 %v3598_v38, %v6179_v18 }
 0x319   : > { %v3147_v21 = vpop.f32.mrf.mxu1 }
 0x31a   : > { %3259 = vst.msk [vmem:[%s6184_s16 + $0x68] sm:$0xff] %vm344_vm1, %v3153_v40  ;;  %v3148_v1 = vadd.f32 %v6179_v18, %v3147_v21 }
 0x31c   : > { %3258 = vst.msk [vmem:[%s6184_s16 + $0x60] sm:$0xff] %vm344_vm1, %v3148_v1 }
 0x31f   : > { %v3601_v58 = vpop.f32.mrf.mxu1 }
 0x320   : > { %v3163_v0 = vadd.f32 %v3601_v58, %v6179_v18 }
 0x321   : > { %v3157_v59 = vpop.f32.mrf.mxu1 }
 0x322   : > { %3261 = vst.msk [vmem:[%s6184_s16 + $0x78] sm:$0xff] %vm344_vm1, %v3163_v0  ;;  %v3158_v44 = vadd.f32 %v6179_v18, %v3157_v59 }
 0x324   : > { %3260 = vst.msk [vmem:[%s6184_s16 + $0x70] sm:$0xff] %vm344_vm1, %v3158_v44 }
 0x326   : > { %v3604_v27 = vpop.f32.mrf.mxu1 }
 0x327   : > { %v3173_v28 = vadd.f32 %v3604_v27, %v6179_v18 }
 0x328   : > { %v3167_v25 = vpop.f32.mrf.mxu1 }
 0x329   : > { %3263 = vst.msk [vmem:[%s6184_s16 + $0x88] sm:$0xff] %vm344_vm1, %v3173_v28  ;;  %v3168_v11 = vadd.f32 %v6179_v18, %v3167_v25 }
 0x32b   : > { %3262 = vst.msk [vmem:[%s6184_s16 + $0x80] sm:$0xff] %vm344_vm1, %v3168_v11 }
 0x32e   : > { %v3607_v54 = vpop.f32.mrf.mxu1 }
 0x32f   : > { %v3183_v9 = vadd.f32 %v3607_v54, %v6179_v18 }
 0x330   : > { %v3177_v41 = vpop.f32.mrf.mxu1 }
 0x331   : > { %3265 = vst.msk [vmem:[%s6184_s16 + $0x98] sm:$0xff] %vm344_vm1, %v3183_v9  ;;  %v3178_v52 = vadd.f32 %v6179_v18, %v3177_v41 }
 0x333   : > { %3264 = vst.msk [vmem:[%s6184_s16 + $0x90] sm:$0xff] %vm344_vm1, %v3178_v52 }
 0x338   : > { %v3610_v61 = vpop.f32.mrf.mxu1 }
 0x339   : > { %v3193_v3 = vadd.f32 %v3610_v61, %v6179_v18 }
 0x33a   : > { %v3187_v7 = vpop.f32.mrf.mxu1 }
 0x33b   : > { %3267 = vst.msk [vmem:[%s6184_s16 + $0xa8] sm:$0xff] %vm344_vm1, %v3193_v3  ;;  %v3188_v49 = vadd.f32 %v6179_v18, %v3187_v7 }
 0x33d   : > { %3266 = vst.msk [vmem:[%s6184_s16 + $0xa0] sm:$0xff] %vm344_vm1, %v3188_v49 }
 0x344   : > { %v3613_v20 = vpop.f32.mrf.mxu1 }
 0x345   : > { %v3203_v45 = vadd.f32 %v3613_v20, %v6179_v18 }
 0x346   : > { %v3197_v62 = vpop.f32.mrf.mxu1 }
 0x347   : > { %3269 = vst.msk [vmem:[%s6184_s16 + $0xb8] sm:$0xff] %vm344_vm1, %v3203_v45  ;;  %v3198_v16 = vadd.f32 %v6179_v18, %v3197_v62 }
 0x349   : > { %3268 = vst.msk [vmem:[%s6184_s16 + $0xb0] sm:$0xff] %vm344_vm1, %v3198_v16 }
 0x34a   : > { %v3616_v42 = vpop.f32.mrf.mxu1 }
 0x34b   : > { %v3213_v24 = vadd.f32 %v3616_v42, %v6179_v18 }
 0x34c   : > { %v3207_v32 = vpop.f32.mrf.mxu1 }
 0x34d   : > { %3271 = vst.msk [vmem:[%s6184_s16 + $0xc8] sm:$0xff] %vm344_vm1, %v3213_v24  ;;  %v3208_v15 = vadd.f32 %v6179_v18, %v3207_v32 }
 0x34f   : > { %3270 = vst.msk [vmem:[%s6184_s16 + $0xc0] sm:$0xff] %vm344_vm1, %v3208_v15 }
 0x356   : > { %v3619_v8 = vpop.f32.mrf.mxu1 }
 0x357   : > { %v3223_v39 = vadd.f32 %v3619_v8, %v6179_v18 }
 0x358   : > { %v3217_v34 = vpop.f32.mrf.mxu1 }
 0x359   : > { %3273 = vst.msk [vmem:[%s6184_s16 + $0xd8] sm:$0xff] %vm344_vm1, %v3223_v39  ;;  %v3218_v17 = vadd.f32 %v6179_v18, %v3217_v34 }
 0x35b   : > { %3272 = vst.msk [vmem:[%s6184_s16 + $0xd0] sm:$0xff] %vm344_vm1, %v3218_v17 }
 0x361   : > { %v3622_v30 = vpop.f32.mrf.mxu1 }
 0x362   : > { %v3233_v56 = vadd.f32 %v3622_v30, %v6179_v18 }
 0x363   : > { %v3227_v14 = vpop.f32.mrf.mxu1 }
 0x364   : > { %3275 = vst.msk [vmem:[%s6184_s16 + $0xe8] sm:$0xff] %vm344_vm1, %v3233_v56  ;;  %v3228_v51 = vadd.f32 %v6179_v18, %v3227_v14 }
 0x365   : > { %v3625_v12 = vpop.f32.mrf.mxu1 }
 0x366   : > { %3274 = vst.msk [vmem:[%s6184_s16 + $0xe0] sm:$0xff] %vm344_vm1, %v3228_v51  ;;  %v3243_v50 = vadd.f32 %v3625_v12, %v6179_v18 }
 0x367   : > { %v3237_v55 = vpop.f32.mrf.mxu1 }
 0x368   : > { %3277 = vst.msk [vmem:[%s6184_s16 + $0xf8] sm:$0xff] %vm344_vm1, %v3243_v50  ;;  %v3238_v5 = vadd.f32 %v6179_v18, %v3237_v55 }
 0x36a   : > { %3276 = vst.msk [vmem:[%s6184_s16 + $0xf0] sm:$0xff] %vm344_vm1, %v3238_v5 }
 0x36b PF: > { %s17_s26 = sadd.s32 1, %s3809_s26   ;;  %s6748_s24 = smov %s3805_s25 }
 0x36c   : > { %p14_p5 = scmp.ge.s32.totalorder %s17_s26, 4   ;;  %s6749_s25 = smov %s6751_s27 }
 0x36e   :  { %16 = sbr.rel (!%p14_p5) target bundleno = 2 (0x2), region = 79 }

</bundles_post_ra>
